<compile_context>
chip_gen: v6e
topology: v6e:2x2x1
jax: 0.10.0
libtpu: 0.0.40
codegen_flags: <defaults>
</compile_context>

<pallas_src>
import functools
import math

import jax
import jax.numpy as jnp
from jax.experimental import pallas as pl
from jax.experimental.pallas import tpu as pltpu


# ---------------------------------------------------------------------------
# helpers
# ---------------------------------------------------------------------------

def _round_up(x, m):
    return (x + m - 1) // m * m


def _nbytes(shape, dtype=jnp.float32):
    return math.prod(shape) * jnp.dtype(dtype).itemsize


def _vmem_limit(block_bytes):
    # double-buffered pipelined blocks + compiler scratch headroom, clamped to
    # stay below every generation's physical VMEM (v7x: 64 MiB per TensorCore).
    return int(min(max(2 * block_bytes + (2 << 20), 8 << 20), 64 << 20))


# ---------------------------------------------------------------------------
# kernel 1: row-tiled matmul + bias (+ optional ReLU)   (used for the 1x1 conv)
# ---------------------------------------------------------------------------

def _matmul_bias_kernel(x_ref, w_ref, b_ref, o_ref, *, relu):
    acc = jnp.dot(x_ref[...], w_ref[...], preferred_element_type=jnp.float32)
    acc = acc + b_ref[...]
    if relu:
        acc = jnp.maximum(acc, 0.0)
    o_ref[...] = acc.astype(o_ref.dtype)


def linear_pallas(x2d, w, b, *, relu=False, tm=256):
    """(M, K) @ (K, N) + b, row-tiled over the MXU; rows padded to the tile."""
    M, K = x2d.shape
    N = w.shape[1]
    tm = min(tm, _round_up(M, 8))           # big tiles, but never beyond the data
    Mp = _round_up(M, tm)
    if Mp != M:
        x2d = jnp.pad(x2d, ((0, Mp - M), (0, 0)))
    b2 = b.reshape(1, N)

    block_bytes = (_nbytes((tm, K)) + _nbytes((K, N)) + _nbytes((1, N))
                   + _nbytes((tm, N)))
    out = pl.pallas_call(
        functools.partial(_matmul_bias_kernel, relu=relu),
        out_shape=jax.ShapeDtypeStruct((Mp, N), x2d.dtype),
        grid_spec=pltpu.PrefetchScalarGridSpec(
            num_scalar_prefetch=0,
            grid=(Mp // tm,),
            in_specs=[
                pl.BlockSpec((tm, K), lambda i: (i, 0)),
                # constant block index -> weights/bias stay resident in VMEM
                pl.BlockSpec((K, N), lambda i: (0, 0)),
                pl.BlockSpec((1, N), lambda i: (0, 0)),
            ],
            out_specs=pl.BlockSpec((tm, N), lambda i: (i, 0)),
        ),
        compiler_params=pltpu.CompilerParams(
            dimension_semantics=("parallel",),
            vmem_limit_bytes=_vmem_limit(block_bytes),
        ),
        cost_estimate=pl.CostEstimate(
            flops=2 * Mp * K * N,
            transcendentals=0,
            bytes_accessed=_nbytes((Mp, K)) + _nbytes((K, N)) + _nbytes((Mp, N)),
        ),
    )(x2d, w, b2)
    return out[:M]


# ---------------------------------------------------------------------------
# kernel 2: 3x3 conv (NHWC, padding=1) as 9 shifted matmuls, fused
#           BN-affine / bias, ReLU, residual-add and optional full max-pool
# ---------------------------------------------------------------------------

def _conv3x3_kernel(xpad_ref, w_ref, scale_ref, shift_ref, *rest,
                    H, W, relu, with_skip, reduce_max):
    if with_skip:
        skip_ref, o_ref = rest
    else:
        (o_ref,) = rest
    cin = xpad_ref.shape[-1]
    cout = w_ref.shape[-1]

    xp = xpad_ref[0]                                    # (H+2, W+2, Cin)
    acc = jnp.zeros((H * W, cout), jnp.float32)
    for kh in range(3):                                 # 9 shifted MXU matmuls
        for kw in range(3):
            patch = xp[kh:kh + H, kw:kw + W, :].reshape(H * W, cin)
            acc = acc + jnp.dot(patch, w_ref[kh * 3 + kw],
                                preferred_element_type=jnp.float32)

    acc = acc * scale_ref[...] + shift_ref[...]         # folded BN / conv bias
    if relu:
        acc = jnp.maximum(acc, 0.0)
    if with_skip:                                       # out = relu(res + skip)
        skip = skip_ref[0].reshape(H * W, cout).astype(jnp.float32)
        acc = jnp.maximum(acc + skip, 0.0)

    if reduce_max:                                      # fused MaxPool2d(full plane)
        o_ref[...] = jnp.max(acc, axis=0, keepdims=True
                             ).reshape(1, 1, cout).astype(o_ref.dtype)
    else:
        o_ref[...] = acc.reshape(1, H, W, cout).astype(o_ref.dtype)


def conv3x3_pallas(x, w9, scale, shift, *, relu, skip=None, reduce_max=False):
    """x: (B, H, W, Cin) NHWC; w9: (9, Cin, Cout); per-channel scale/shift."""
    B, H, W, Cin = x.shape
    Cout = w9.shape[-1]
    xpad = jnp.pad(x, ((0, 0), (1, 1), (1, 1), (0, 0)))
    scale2 = scale.reshape(1, Cout)
    shift2 = shift.reshape(1, Cout)

    in_specs = [
        pl.BlockSpec((1, H + 2, W + 2, Cin), lambda b: (b, 0, 0, 0)),
        pl.BlockSpec((9, Cin, Cout), lambda b: (0, 0, 0)),   # resident weights
        pl.BlockSpec((1, Cout), lambda b: (0, 0)),
        pl.BlockSpec((1, Cout), lambda b: (0, 0)),
    ]
    args = [xpad, w9, scale2, shift2]
    block_bytes = (_nbytes((1, H + 2, W + 2, Cin)) + _nbytes((9, Cin, Cout))
                   + 2 * _nbytes((1, Cout)))
    if skip is not None:
        in_specs.append(pl.BlockSpec((1, H, W, Cout), lambda b: (b, 0, 0, 0)))
        args.append(skip)
        block_bytes += _nbytes((1, H, W, Cout))
    if reduce_max:
        out_shape = jax.ShapeDtypeStruct((B, 1, Cout), x.dtype)
        out_spec = pl.BlockSpec((1, 1, Cout), lambda b: (b, 0, 0))
        block_bytes += _nbytes((1, 1, Cout))
    else:
        out_shape = jax.ShapeDtypeStruct((B, H, W, Cout), x.dtype)
        out_spec = pl.BlockSpec((1, H, W, Cout), lambda b: (b, 0, 0, 0))
        block_bytes += _nbytes((1, H, W, Cout))

    kernel = functools.partial(_conv3x3_kernel, H=H, W=W, relu=relu,
                               with_skip=skip is not None, reduce_max=reduce_max)
    out = pl.pallas_call(
        kernel,
        out_shape=out_shape,
        grid_spec=pltpu.PrefetchScalarGridSpec(
            num_scalar_prefetch=0,
            grid=(B,),
            in_specs=in_specs,
            out_specs=out_spec,
        ),
        compiler_params=pltpu.CompilerParams(
            dimension_semantics=("parallel",),
            vmem_limit_bytes=_vmem_limit(block_bytes),
        ),
        cost_estimate=pl.CostEstimate(
            flops=2 * B * H * W * 9 * Cin * Cout,
            transcendentals=0,
            bytes_accessed=(_nbytes(xpad.shape) + _nbytes((9, Cin, Cout))
                            + _nbytes(out_shape.shape)),
        ),
    )(*args)
    if reduce_max:
        return out.reshape(B, Cout)
    return out


# ---------------------------------------------------------------------------
# kernel 3: fused value head — MLP + softmax + support expectation
# ---------------------------------------------------------------------------

def _value_head_kernel(f_ref, w1_ref, b1_ref, w2_ref, b2_ref, sup_ref, o_ref,
                       *, inv_support):
    h = jnp.dot(f_ref[...], w1_ref[...], preferred_element_type=jnp.float32) + b1_ref[...]
    h = jnp.maximum(h, 0.0)
    logits = jnp.dot(h, w2_ref[...], preferred_element_type=jnp.float32) + b2_ref[...]
    m = jnp.max(logits, axis=-1, keepdims=True)
    e = jnp.exp(logits - m)
    p = e / jnp.sum(e, axis=-1, keepdims=True)
    v = jnp.sum(p * sup_ref[...], axis=-1, keepdims=True) * inv_support
    o_ref[...] = v.astype(o_ref.dtype)


def value_head_pallas(feat, w1, b1, w2, b2, support, *, support_size, tb=256):
    B, D = feat.shape
    S = w2.shape[1]
    tb = min(tb, _round_up(B, 8))
    Bp = _round_up(B, tb)
    if Bp != B:
        feat = jnp.pad(feat, ((0, Bp - B), (0, 0)))

    block_bytes = (_nbytes((tb, D)) + _nbytes((D, D)) + _nbytes((1, D))
                   + _nbytes((D, S)) + 2 * _nbytes((1, S)) + _nbytes((tb, 1)))
    out = pl.pallas_call(
        functools.partial(_value_head_kernel, inv_support=1.0 / float(support_size)),
        out_shape=jax.ShapeDtypeStruct((Bp, 1), feat.dtype),
        grid_spec=pltpu.PrefetchScalarGridSpec(
            num_scalar_prefetch=0,
            grid=(Bp // tb,),
            in_specs=[
                pl.BlockSpec((tb, D), lambda i: (i, 0)),
                pl.BlockSpec((D, D), lambda i: (0, 0)),
                pl.BlockSpec((1, D), lambda i: (0, 0)),
                pl.BlockSpec((D, S), lambda i: (0, 0)),
                pl.BlockSpec((1, S), lambda i: (0, 0)),
                pl.BlockSpec((1, S), lambda i: (0, 0)),
            ],
            out_specs=pl.BlockSpec((tb, 1), lambda i: (i, 0)),
        ),
        compiler_params=pltpu.CompilerParams(
            dimension_semantics=("parallel",),
            vmem_limit_bytes=_vmem_limit(block_bytes),
        ),
        cost_estimate=pl.CostEstimate(
            flops=2 * Bp * D * (D + S),
            transcendentals=Bp * S,
            bytes_accessed=(_nbytes((Bp, D)) + _nbytes((D, D)) + _nbytes((D, S))
                            + _nbytes((Bp, 1))),
        ),
    )(feat, w1, b1.reshape(1, D), w2, b2.reshape(1, S), support.reshape(1, S))
    return out[:B, 0]


# ---------------------------------------------------------------------------
# full forward pass
# ---------------------------------------------------------------------------

@functools.partial(jax.jit, static_argnames=("support_size",))
def discrete_support_value_forward(params, name_ids, inv_ids, *, support_size):
    B, Wd, Hd, d2, d3 = name_ids.shape
    # MaxPool2d(obs_name_shape[1]) collapses the whole plane only when W == H.
    assert Wd == Hd, "demo assumes square name observation (W == H)"
    E = params["name_emb"].shape[1]

    # --- embeddings + feature-plane assembly (layout plumbing, stays in JAX) ---
    x = jnp.take(params["name_emb"], name_ids, axis=0)        # (B, W, H, d2, d3, E)
    x = x.reshape(B, Wd, Hd, d2 * d3 * E)
    inv = jnp.take(params["inv_emb"], inv_ids, axis=0)        # (B, L, E)
    inv = inv.reshape(B, 1, 1, -1)
    inv = jnp.broadcast_to(inv, (B, Wd, Hd, inv.shape[-1]))
    z = jnp.concatenate([x, inv], axis=-1)                    # (B, W, H, C) NHWC

    # --- conv stem: 1x1 conv == per-pixel channel matmul ---
    Cin = z.shape[-1]
    h = linear_pallas(z.reshape(B * Wd * Hd, Cin), params["conv0_w"], params["conv0_b"])
    h = h.reshape(B, Wd, Hd, 64)

    # --- 2 x ResidualConv(64, 64); BN folded into per-channel affine (eval) ---
    for blk in ("res1", "res2"):
        p = params[blk]
        t = conv3x3_pallas(h, p["w1"], p["s1"], p["sh1"], relu=True)
        h = conv3x3_pallas(t, p["w2"], p["s2"], p["sh2"], relu=True, skip=h)

    # --- final 3x3 conv (64 -> 128, bias) fused with full-spatial max-pool ---
    feat = conv3x3_pallas(h, params["conv3_w"], params["conv3_s"], params["conv3_b"],
                          relu=False, reduce_max=True)        # (B, 128)

    # --- value head: MLP + softmax expectation over the discrete support ---
    return value_head_pallas(feat, params["mlp1_w"], params["mlp1_b"],
                             params["mlp2_w"], params["mlp2_b"], params["support"],
                             support_size=support_size)       # (B,)


# ---------------------------------------------------------------------------
# parameters (fresh init mimicking the PyTorch module's defaults)
# ---------------------------------------------------------------------------

def bn_eval_affine(gamma, beta, running_mean, running_var, eps=1e-5):
    scale = gamma / jnp.sqrt(running_var + eps)
    return scale, beta - running_mean * scale


def init_params(key, *, vocab_size, emb_dim, n_channels, support_size,
                dtype=jnp.float32):
    ks = list(jax.random.split(key, 12))

    def unif(k, shape, fan_in):
        lim = 1.0 / math.sqrt(fan_in)
        return jax.random.uniform(k, shape, dtype, -lim, lim)

    def bn_init(c):
        # fresh BatchNorm2d: gamma=1, beta=0, running_mean=0, running_var=1
        return bn_eval_affine(jnp.ones((c,), dtype), jnp.zeros((c,), dtype),
                              jnp.zeros((c,), dtype), jnp.ones((c,), dtype))

    def res_block(k):
        k1, k2 = jax.random.split(k)
        s1, sh1 = bn_init(64)
        s2, sh2 = bn_init(64)
        return {"w1": unif(k1, (9, 64, 64), 9 * 64), "s1": s1, "sh1": sh1,
                "w2": unif(k2, (9, 64, 64), 9 * 64), "s2": s2, "sh2": sh2}

    n_logits = 2 * support_size + 1
    return {
        "name_emb": jax.random.normal(ks[0], (vocab_size, emb_dim), dtype),
        "inv_emb": jax.random.normal(ks[1], (vocab_size, emb_dim), dtype),
        "conv0_w": unif(ks[2], (n_channels, 64), n_channels),
        "conv0_b": unif(ks[3], (64,), n_channels),
        "res1": res_block(ks[4]),
        "res2": res_block(ks[5]),
        "conv3_w": unif(ks[6], (9, 64, 128), 9 * 64),
        "conv3_b": unif(ks[7], (128,), 9 * 64),
        "conv3_s": jnp.ones((128,), dtype),   # no BN on last conv: scale=1, shift=bias
        "mlp1_w": unif(ks[8], (128, 128), 128),
        "mlp1_b": unif(ks[9], (128,), 128),
        "mlp2_w": unif(ks[10], (128, n_logits), 128),
        "mlp2_b": unif(ks[11], (n_logits,), 128),
        "support": jnp.arange(-support_size, support_size + 1, dtype=dtype),
    }


# ---------------------------------------------------------------------------
# pure-JAX reference (same math, HIGHEST precision) for the correctness check
# ---------------------------------------------------------------------------

def reference_forward(params, name_ids, inv_ids, support_size):
    HI = jax.lax.Precision.HIGHEST
    B, Wd, Hd, d2, d3 = name_ids.shape
    E = params["name_emb"].shape[1]
    x = jnp.take(params["name_emb"], name_ids, axis=0).reshape(B, Wd, Hd, d2 * d3 * E)
    inv = jnp.take(params["inv_emb"], inv_ids, axis=0).reshape(B, 1, 1, -1)
    inv = jnp.broadcast_to(inv, (B, Wd, Hd, inv.shape[-1]))
    z = jnp.concatenate([x, inv], axis=-1)

    def conv3x3(x, w9, scale, shift):
        w = w9.reshape(3, 3, w9.shape[1], w9.shape[2])
        y = jax.lax.conv_general_dilated(
            x, w, window_strides=(1, 1), padding="SAME",
            dimension_numbers=("NHWC", "HWIO", "NHWC"), precision=HI)
        return y * scale + shift

    h = jnp.einsum("bwhc,co->bwho", z, params["conv0_w"], precision=HI) + params["conv0_b"]
    for blk in ("res1", "res2"):
        p = params[blk]
        t = jnp.maximum(conv3x3(h, p["w1"], p["s1"], p["sh1"]), 0.0)
        r = jnp.maximum(conv3x3(t, p["w2"], p["s2"], p["sh2"]), 0.0)
        h = jnp.maximum(r + h, 0.0)
    y = conv3x3(h, params["conv3_w"], params["conv3_s"], params["conv3_b"])
    feat = jnp.max(y, axis=(1, 2))
    hid = jnp.maximum(jnp.dot(feat, params["mlp1_w"], precision=HI) + params["mlp1_b"], 0.0)
    logits = jnp.dot(hid, params["mlp2_w"], precision=HI) + params["mlp2_b"]
    probs = jax.nn.softmax(logits, axis=-1)
    return jnp.sum(probs * params["support"], axis=-1) / support_size


# ---------------------------------------------------------------------------
# demo
# ---------------------------------------------------------------------------

if __name__ == "__main__":
    key = jax.random.PRNGKey(0)
    k_name, k_inv, k_params = jax.random.split(key, 3)

    # small demo env: vocab=32, name obs (8, 8, 2, 3), inv obs (4,), emb_dim=10
    B, Wd, Hd, d2, d3, inv_len = 2, 8, 8, 2, 3, 4
    vocab_size, emb_dim, support_size = 32, 10, 10
    n_channels = (d2 * d3 + inv_len) * emb_dim        # = 100, as in the module

    name_ids = jax.random.randint(k_name, (B, Wd, Hd, d2, d3), 0, vocab_size,
                                  dtype=jnp.int32)
    inv_ids = jax.random.randint(k_inv, (B, inv_len), 0, vocab_size, dtype=jnp.int32)
    params = init_params(k_params, vocab_size=vocab_size, emb_dim=emb_dim,
                         n_channels=n_channels, support_size=support_size)

    v = discrete_support_value_forward(params, name_ids, inv_ids,
                                       support_size=support_size)
    v = jax.block_until_ready(v)

    ref = reference_forward(params, name_ids, inv_ids, support_size)
    assert v.shape == (B,)
    assert jnp.allclose(v, ref, atol=1e-3, rtol=1e-3), (v, ref)

    print("KERNEL_OK")
</pallas_src>

<mosaic_0001>
module attributes {stable_mosaic.version = 11 : i64} {
  func.func @_matmul_bias_kernel(%arg0: i32, %arg1: memref<128x100xf32, #tpu.memory_space<vmem>>, %arg2: memref<100x64xf32, #tpu.memory_space<vmem>>, %arg3: memref<1x64xf32, #tpu.memory_space<vmem>>, %arg4: memref<128x64xf32, #tpu.memory_space<vmem>>) attributes {dimension_semantics = [#tpu.dimension_semantics<parallel>], iteration_bounds = array<i64: 1>, scalar_prefetch = 0 : i64, scratch_operands = 0 : i64, tpu.core_type = #tpu.core_type<tc>, window_params = [{transform_indices = @transform_0, window_bounds = array<i64: 128, 100>}, {pipeline_mode = #tpu.pipeline_mode<synchronous>, transform_indices = @transform_1, window_bounds = array<i64: 100, 64>}, {pipeline_mode = #tpu.pipeline_mode<synchronous>, transform_indices = @transform_2, window_bounds = array<i64: 1, 64>}, {transform_indices = @transform_3, window_bounds = array<i64: 128, 64>}]} {
    %c0 = arith.constant 0 : index
    %c0_0 = arith.constant 0 : index
    %0 = vector.load %arg1[%c0, %c0_0] : memref<128x100xf32, #tpu.memory_space<vmem>>, vector<128x100xf32>
    %c0_1 = arith.constant 0 : index
    %c0_2 = arith.constant 0 : index
    %1 = vector.load %arg2[%c0_1, %c0_2] : memref<100x64xf32, #tpu.memory_space<vmem>>, vector<100x64xf32>
    %cst = arith.constant dense<0.000000e+00> : vector<128x64xf32>
    %2 = tpu.matmul %0, %1, %cst {dimension_numbers = #tpu.dot_dimension_numbers<[1], [0], [0], [1], [0, 0, 1, 1], [], []>} : vector<128x100xf32>, vector<100x64xf32>, vector<128x64xf32> -> vector<128x64xf32>
    %c0_3 = arith.constant 0 : index
    %c0_4 = arith.constant 0 : index
    %3 = vector.load %arg3[%c0_3, %c0_4] : memref<1x64xf32, #tpu.memory_space<vmem>>, vector<1x64xf32>
    %4 = vector.broadcast %3 : vector<1x64xf32> to vector<128x64xf32>
    %5 = arith.addf %2, %4 : vector<128x64xf32>
    %c0_5 = arith.constant 0 : index
    %c0_6 = arith.constant 0 : index
    %6 = vector.load %arg4[%c0_5, %c0_6] : memref<128x64xf32, #tpu.memory_space<vmem>>, vector<128x64xf32>
    tpu.vector_store %arg4[%c0_5, %c0_6], %5 {strides = array<i32>} : memref<128x64xf32, #tpu.memory_space<vmem>>, vector<128x64xf32>,
    return
  }
  func.func @transform_0(%arg0: i32) -> (i32, i32) {
    %c0_i32 = arith.constant 0 : i32
    %c0_i32_0 = arith.constant 0 : i32
    return %arg0, %c0_i32 : i32, i32
  }
  func.func @transform_1(%arg0: i32) -> (i32, i32) {
    %c0_i32 = arith.constant 0 : i32
    %c0_i32_0 = arith.constant 0 : i32
    %c0_i32_1 = arith.constant 0 : i32
    return %c0_i32, %c0_i32_0 : i32, i32
  }
  func.func @transform_2(%arg0: i32) -> (i32, i32) {
    %c0_i32 = arith.constant 0 : i32
    %c0_i32_0 = arith.constant 0 : i32
    %c0_i32_1 = arith.constant 0 : i32
    return %c0_i32, %c0_i32_0 : i32, i32
  }
  func.func @transform_3(%arg0: i32) -> (i32, i32) {
    %c0_i32 = arith.constant 0 : i32
    %c0_i32_0 = arith.constant 0 : i32
    return %arg0, %c0_i32 : i32, i32
  }
}

module attributes {stable_mosaic.version = 11 : i64} {
  func.func @_conv3x3_kernel(%arg0: i32, %arg1: memref<1x10x10x64xf32, #tpu.memory_space<vmem>>, %arg2: memref<9x64x64xf32, #tpu.memory_space<vmem>>, %arg3: memref<1x64xf32, #tpu.memory_space<vmem>>, %arg4: memref<1x64xf32, #tpu.memory_space<vmem>>, %arg5: memref<1x8x8x64xf32, #tpu.memory_space<vmem>>) attributes {dimension_semantics = [#tpu.dimension_semantics<parallel>], iteration_bounds = array<i64: 2>, scalar_prefetch = 0 : i64, scratch_operands = 0 : i64, tpu.core_type = #tpu.core_type<tc>, window_params = [{transform_indices = @transform_0, window_bounds = array<i64: 1, 10, 10, 64>}, {pipeline_mode = #tpu.pipeline_mode<synchronous>, transform_indices = @transform_1, window_bounds = array<i64: 9, 64, 64>}, {pipeline_mode = #tpu.pipeline_mode<synchronous>, transform_indices = @transform_2, window_bounds = array<i64: 1, 64>}, {pipeline_mode = #tpu.pipeline_mode<synchronous>, transform_indices = @transform_3, window_bounds = array<i64: 1, 64>}, {transform_indices = @transform_4, window_bounds = array<i64: 1, 8, 8, 64>}]} {
    %c0 = arith.constant 0 : index
    %c0_0 = arith.constant 0 : index
    %c0_1 = arith.constant 0 : index
    %c0_2 = arith.constant 0 : index
    %0 = vector.load %arg1[%c0, %c0_0, %c0_1, %c0_2] : memref<1x10x10x64xf32, #tpu.memory_space<vmem>>, vector<1x10x10x64xf32>
    %1 = vector.shape_cast %0 : vector<1x10x10x64xf32> to vector<10x10x64xf32>
    %cst = arith.constant 0.000000e+00 : f32
    %2 = vector.broadcast %cst : f32 to vector<64x64xf32>
    %3 = vector.extract_strided_slice %1 {offsets = [0, 0, 0], sizes = [8, 8, 64], strides = [1, 1, 1]} : vector<10x10x64xf32> to vector<8x8x64xf32>
    %4 = vector.shape_cast %3 : vector<8x8x64xf32> to vector<64x64xf32>
    %c0_3 = arith.constant 0 : index
    %c0_4 = arith.constant 0 : index
    %c0_5 = arith.constant 0 : index
    %5 = vector.load %arg2[%c0_3, %c0_4, %c0_5] : memref<9x64x64xf32, #tpu.memory_space<vmem>>, vector<1x64x64xf32>
    %6 = vector.shape_cast %5 : vector<1x64x64xf32> to vector<64x64xf32>
    %cst_6 = arith.constant dense<0.000000e+00> : vector<64x64xf32>
    %7 = tpu.matmul %4, %6, %cst_6 {dimension_numbers = #tpu.dot_dimension_numbers<[1], [0], [0], [1], [0, 0, 1, 1], [], []>} : vector<64x64xf32>, vector<64x64xf32>, vector<64x64xf32> -> vector<64x64xf32>
    %8 = arith.addf %2, %7 : vector<64x64xf32>
    %9 = vector.extract_strided_slice %1 {offsets = [0, 1, 0], sizes = [8, 8, 64], strides = [1, 1, 1]} : vector<10x10x64xf32> to vector<8x8x64xf32>
    %10 = vector.shape_cast %9 : vector<8x8x64xf32> to vector<64x64xf32>
    %c1 = arith.constant 1 : index
    %c0_7 = arith.constant 0 : index
    %c0_8 = arith.constant 0 : index
    %11 = vector.load %arg2[%c1, %c0_7, %c0_8] : memref<9x64x64xf32, #tpu.memory_space<vmem>>, vector<1x64x64xf32>
    %12 = vector.shape_cast %11 : vector<1x64x64xf32> to vector<64x64xf32>
    %cst_9 = arith.constant dense<0.000000e+00> : vector<64x64xf32>
    %13 = tpu.matmul %10, %12, %cst_9 {dimension_numbers = #tpu.dot_dimension_numbers<[1], [0], [0], [1], [0, 0, 1, 1], [], []>} : vector<64x64xf32>, vector<64x64xf32>, vector<64x64xf32> -> vector<64x64xf32>
    %14 = arith.addf %8, %13 : vector<64x64xf32>
    %15 = vector.extract_strided_slice %1 {offsets = [0, 2, 0], sizes = [8, 8, 64], strides = [1, 1, 1]} : vector<10x10x64xf32> to vector<8x8x64xf32>
    %16 = vector.shape_cast %15 : vector<8x8x64xf32> to vector<64x64xf32>
    %c2 = arith.constant 2 : index
    %c0_10 = arith.constant 0 : index
    %c0_11 = arith.constant 0 : index
    %17 = vector.load %arg2[%c2, %c0_10, %c0_11] : memref<9x64x64xf32, #tpu.memory_space<vmem>>, vector<1x64x64xf32>
    %18 = vector.shape_cast %17 : vector<1x64x64xf32> to vector<64x64xf32>
    %cst_12 = arith.constant dense<0.000000e+00> : vector<64x64xf32>
    %19 = tpu.matmul %16, %18, %cst_12 {dimension_numbers = #tpu.dot_dimension_numbers<[1], [0], [0], [1], [0, 0, 1, 1], [], []>} : vector<64x64xf32>, vector<64x64xf32>, vector<64x64xf32> -> vector<64x64xf32>
    %20 = arith.addf %14, %19 : vector<64x64xf32>
    %21 = vector.extract_strided_slice %1 {offsets = [1, 0, 0], sizes = [8, 8, 64], strides = [1, 1, 1]} : vector<10x10x64xf32> to vector<8x8x64xf32>
    %22 = vector.shape_cast %21 : vector<8x8x64xf32> to vector<64x64xf32>
    %c3 = arith.constant 3 : index
    %c0_13 = arith.constant 0 : index
    %c0_14 = arith.constant 0 : index
    %23 = vector.load %arg2[%c3, %c0_13, %c0_14] : memref<9x64x64xf32, #tpu.memory_space<vmem>>, vector<1x64x64xf32>
    %24 = vector.shape_cast %23 : vector<1x64x64xf32> to vector<64x64xf32>
    %cst_15 = arith.constant dense<0.000000e+00> : vector<64x64xf32>
    %25 = tpu.matmul %22, %24, %cst_15 {dimension_numbers = #tpu.dot_dimension_numbers<[1], [0], [0], [1], [0, 0, 1, 1], [], []>} : vector<64x64xf32>, vector<64x64xf32>, vector<64x64xf32> -> vector<64x64xf32>
    %26 = arith.addf %20, %25 : vector<64x64xf32>
    %27 = vector.extract_strided_slice %1 {offsets = [1, 1, 0], sizes = [8, 8, 64], strides = [1, 1, 1]} : vector<10x10x64xf32> to vector<8x8x64xf32>
    %28 = vector.shape_cast %27 : vector<8x8x64xf32> to vector<64x64xf32>
    %c4 = arith.constant 4 : index
    %c0_16 = arith.constant 0 : index
    %c0_17 = arith.constant 0 : index
    %29 = vector.load %arg2[%c4, %c0_16, %c0_17] : memref<9x64x64xf32, #tpu.memory_space<vmem>>, vector<1x64x64xf32>
    %30 = vector.shape_cast %29 : vector<1x64x64xf32> to vector<64x64xf32>
    %cst_18 = arith.constant dense<0.000000e+00> : vector<64x64xf32>
    %31 = tpu.matmul %28, %30, %cst_18 {dimension_numbers = #tpu.dot_dimension_numbers<[1], [0], [0], [1], [0, 0, 1, 1], [], []>} : vector<64x64xf32>, vector<64x64xf32>, vector<64x64xf32> -> vector<64x64xf32>
    %32 = arith.addf %26, %31 : vector<64x64xf32>
    %33 = vector.extract_strided_slice %1 {offsets = [1, 2, 0], sizes = [8, 8, 64], strides = [1, 1, 1]} : vector<10x10x64xf32> to vector<8x8x64xf32>
    %34 = vector.shape_cast %33 : vector<8x8x64xf32> to vector<64x64xf32>
    %c5 = arith.constant 5 : index
    %c0_19 = arith.constant 0 : index
    %c0_20 = arith.constant 0 : index
    %35 = vector.load %arg2[%c5, %c0_19, %c0_20] : memref<9x64x64xf32, #tpu.memory_space<vmem>>, vector<1x64x64xf32>
    %36 = vector.shape_cast %35 : vector<1x64x64xf32> to vector<64x64xf32>
    %cst_21 = arith.constant dense<0.000000e+00> : vector<64x64xf32>
    %37 = tpu.matmul %34, %36, %cst_21 {dimension_numbers = #tpu.dot_dimension_numbers<[1], [0], [0], [1], [0, 0, 1, 1], [], []>} : vector<64x64xf32>, vector<64x64xf32>, vector<64x64xf32> -> vector<64x64xf32>
    %38 = arith.addf %32, %37 : vector<64x64xf32>
    %39 = vector.extract_strided_slice %1 {offsets = [2, 0, 0], sizes = [8, 8, 64], strides = [1, 1, 1]} : vector<10x10x64xf32> to vector<8x8x64xf32>
    %40 = vector.shape_cast %39 : vector<8x8x64xf32> to vector<64x64xf32>
    %c6 = arith.constant 6 : index
    %c0_22 = arith.constant 0 : index
    %c0_23 = arith.constant 0 : index
    %41 = vector.load %arg2[%c6, %c0_22, %c0_23] : memref<9x64x64xf32, #tpu.memory_space<vmem>>, vector<1x64x64xf32>
    %42 = vector.shape_cast %41 : vector<1x64x64xf32> to vector<64x64xf32>
    %cst_24 = arith.constant dense<0.000000e+00> : vector<64x64xf32>
    %43 = tpu.matmul %40, %42, %cst_24 {dimension_numbers = #tpu.dot_dimension_numbers<[1], [0], [0], [1], [0, 0, 1, 1], [], []>} : vector<64x64xf32>, vector<64x64xf32>, vector<64x64xf32> -> vector<64x64xf32>
    %44 = arith.addf %38, %43 : vector<64x64xf32>
    %45 = vector.extract_strided_slice %1 {offsets = [2, 1, 0], sizes = [8, 8, 64], strides = [1, 1, 1]} : vector<10x10x64xf32> to vector<8x8x64xf32>
    %46 = vector.shape_cast %45 : vector<8x8x64xf32> to vector<64x64xf32>
    %c7 = arith.constant 7 : index
    %c0_25 = arith.constant 0 : index
    %c0_26 = arith.constant 0 : index
    %47 = vector.load %arg2[%c7, %c0_25, %c0_26] : memref<9x64x64xf32, #tpu.memory_space<vmem>>, vector<1x64x64xf32>
    %48 = vector.shape_cast %47 : vector<1x64x64xf32> to vector<64x64xf32>
    %cst_27 = arith.constant dense<0.000000e+00> : vector<64x64xf32>
    %49 = tpu.matmul %46, %48, %cst_27 {dimension_numbers = #tpu.dot_dimension_numbers<[1], [0], [0], [1], [0, 0, 1, 1], [], []>} : vector<64x64xf32>, vector<64x64xf32>, vector<64x64xf32> -> vector<64x64xf32>
    %50 = arith.addf %44, %49 : vector<64x64xf32>
    %51 = vector.extract_strided_slice %1 {offsets = [2, 2, 0], sizes = [8, 8, 64], strides = [1, 1, 1]} : vector<10x10x64xf32> to vector<8x8x64xf32>
    %52 = vector.shape_cast %51 : vector<8x8x64xf32> to vector<64x64xf32>
    %c8 = arith.constant 8 : index
    %c0_28 = arith.constant 0 : index
    %c0_29 = arith.constant 0 : index
    %53 = vector.load %arg2[%c8, %c0_28, %c0_29] : memref<9x64x64xf32, #tpu.memory_space<vmem>>, vector<1x64x64xf32>
    %54 = vector.shape_cast %53 : vector<1x64x64xf32> to vector<64x64xf32>
    %cst_30 = arith.constant dense<0.000000e+00> : vector<64x64xf32>
    %55 = tpu.matmul %52, %54, %cst_30 {dimension_numbers = #tpu.dot_dimension_numbers<[1], [0], [0], [1], [0, 0, 1, 1], [], []>} : vector<64x64xf32>, vector<64x64xf32>, vector<64x64xf32> -> vector<64x64xf32>
    %56 = arith.addf %50, %55 : vector<64x64xf32>
    %c0_31 = arith.constant 0 : index
    %c0_32 = arith.constant 0 : index
    %57 = vector.load %arg3[%c0_31, %c0_32] : memref<1x64xf32, #tpu.memory_space<vmem>>, vector<1x64xf32>
    %58 = vector.broadcast %57 : vector<1x64xf32> to vector<64x64xf32>
    %59 = arith.mulf %56, %58 : vector<64x64xf32>
    %c0_33 = arith.constant 0 : index
    %c0_34 = arith.constant 0 : index
    %60 = vector.load %arg4[%c0_33, %c0_34] : memref<1x64xf32, #tpu.memory_space<vmem>>, vector<1x64xf32>
    %61 = vector.broadcast %60 : vector<1x64xf32> to vector<64x64xf32>
    %62 = arith.addf %59, %61 : vector<64x64xf32>
    %cst_35 = arith.constant 0.000000e+00 : f32
    %63 = vector.broadcast %cst_35 : f32 to vector<64x64xf32>
    %64 = arith.maximumf %62, %63 : vector<64x64xf32>
    %65 = vector.shape_cast %64 : vector<64x64xf32> to vector<1x8x8x64xf32>
    %c0_36 = arith.constant 0 : index
    %c0_37 = arith.constant 0 : index
    %c0_38 = arith.constant 0 : index
    %c0_39 = arith.constant 0 : index
    %66 = vector.load %arg5[%c0_36, %c0_37, %c0_38, %c0_39] : memref<1x8x8x64xf32, #tpu.memory_space<vmem>>, vector<1x8x8x64xf32>
    tpu.vector_store %arg5[%c0_36, %c0_37, %c0_38, %c0_39], %65 {strides = array<i32>} : memref<1x8x8x64xf32, #tpu.memory_space<vmem>>, vector<1x8x8x64xf32>,
    return
  }
  func.func @transform_0(%arg0: i32) -> (i32, i32, i32, i32) {
    %c0_i32 = arith.constant 0 : i32
    %c0_i32_0 = arith.constant 0 : i32
    %c0_i32_1 = arith.constant 0 : i32
    %c0_i32_2 = arith.constant 0 : i32
    return %arg0, %c0_i32, %c0_i32_0, %c0_i32_1 : i32, i32, i32, i32
  }
  func.func @transform_1(%arg0: i32) -> (i32, i32, i32) {
    %c0_i32 = arith.constant 0 : i32
    %c0_i32_0 = arith.constant 0 : i32
    %c0_i32_1 = arith.constant 0 : i32
    %c0_i32_2 = arith.constant 0 : i32
    return %c0_i32, %c0_i32_0, %c0_i32_1 : i32, i32, i32
  }
  func.func @transform_2(%arg0: i32) -> (i32, i32) {
    %c0_i32 = arith.constant 0 : i32
    %c0_i32_0 = arith.constant 0 : i32
    %c0_i32_1 = arith.constant 0 : i32
    return %c0_i32, %c0_i32_0 : i32, i32
  }
  func.func @transform_3(%arg0: i32) -> (i32, i32) {
    %c0_i32 = arith.constant 0 : i32
    %c0_i32_0 = arith.constant 0 : i32
    %c0_i32_1 = arith.constant 0 : i32
    return %c0_i32, %c0_i32_0 : i32, i32
  }
  func.func @transform_4(%arg0: i32) -> (i32, i32, i32, i32) {
    %c0_i32 = arith.constant 0 : i32
    %c0_i32_0 = arith.constant 0 : i32
    %c0_i32_1 = arith.constant 0 : i32
    %c0_i32_2 = arith.constant 0 : i32
    return %arg0, %c0_i32, %c0_i32_0, %c0_i32_1 : i32, i32, i32, i32
  }
}

module attributes {stable_mosaic.version = 11 : i64} {
  func.func @_conv3x3_kernel(%arg0: i32, %arg1: memref<1x10x10x64xf32, #tpu.memory_space<vmem>>, %arg2: memref<9x64x64xf32, #tpu.memory_space<vmem>>, %arg3: memref<1x64xf32, #tpu.memory_space<vmem>>, %arg4: memref<1x64xf32, #tpu.memory_space<vmem>>, %arg5: memref<1x8x8x64xf32, #tpu.memory_space<vmem>>, %arg6: memref<1x8x8x64xf32, #tpu.memory_space<vmem>>) attributes {dimension_semantics = [#tpu.dimension_semantics<parallel>], iteration_bounds = array<i64: 2>, scalar_prefetch = 0 : i64, scratch_operands = 0 : i64, tpu.core_type = #tpu.core_type<tc>, window_params = [{transform_indices = @transform_0, window_bounds = array<i64: 1, 10, 10, 64>}, {pipeline_mode = #tpu.pipeline_mode<synchronous>, transform_indices = @transform_1, window_bounds = array<i64: 9, 64, 64>}, {pipeline_mode = #tpu.pipeline_mode<synchronous>, transform_indices = @transform_2, window_bounds = array<i64: 1, 64>}, {pipeline_mode = #tpu.pipeline_mode<synchronous>, transform_indices = @transform_3, window_bounds = array<i64: 1, 64>}, {transform_indices = @transform_4, window_bounds = array<i64: 1, 8, 8, 64>}, {transform_indices = @transform_5, window_bounds = array<i64: 1, 8, 8, 64>}]} {
    %c0 = arith.constant 0 : index
    %c0_0 = arith.constant 0 : index
    %c0_1 = arith.constant 0 : index
    %c0_2 = arith.constant 0 : index
    %0 = vector.load %arg1[%c0, %c0_0, %c0_1, %c0_2] : memref<1x10x10x64xf32, #tpu.memory_space<vmem>>, vector<1x10x10x64xf32>
    %1 = vector.shape_cast %0 : vector<1x10x10x64xf32> to vector<10x10x64xf32>
    %cst = arith.constant 0.000000e+00 : f32
    %2 = vector.broadcast %cst : f32 to vector<64x64xf32>
    %3 = vector.extract_strided_slice %1 {offsets = [0, 0, 0], sizes = [8, 8, 64], strides = [1, 1, 1]} : vector<10x10x64xf32> to vector<8x8x64xf32>
    %4 = vector.shape_cast %3 : vector<8x8x64xf32> to vector<64x64xf32>
    %c0_3 = arith.constant 0 : index
    %c0_4 = arith.constant 0 : index
    %c0_5 = arith.constant 0 : index
    %5 = vector.load %arg2[%c0_3, %c0_4, %c0_5] : memref<9x64x64xf32, #tpu.memory_space<vmem>>, vector<1x64x64xf32>
    %6 = vector.shape_cast %5 : vector<1x64x64xf32> to vector<64x64xf32>
    %cst_6 = arith.constant dense<0.000000e+00> : vector<64x64xf32>
    %7 = tpu.matmul %4, %6, %cst_6 {dimension_numbers = #tpu.dot_dimension_numbers<[1], [0], [0], [1], [0, 0, 1, 1], [], []>} : vector<64x64xf32>, vector<64x64xf32>, vector<64x64xf32> -> vector<64x64xf32>
    %8 = arith.addf %2, %7 : vector<64x64xf32>
    %9 = vector.extract_strided_slice %1 {offsets = [0, 1, 0], sizes = [8, 8, 64], strides = [1, 1, 1]} : vector<10x10x64xf32> to vector<8x8x64xf32>
    %10 = vector.shape_cast %9 : vector<8x8x64xf32> to vector<64x64xf32>
    %c1 = arith.constant 1 : index
    %c0_7 = arith.constant 0 : index
    %c0_8 = arith.constant 0 : index
    %11 = vector.load %arg2[%c1, %c0_7, %c0_8] : memref<9x64x64xf32, #tpu.memory_space<vmem>>, vector<1x64x64xf32>
    %12 = vector.shape_cast %11 : vector<1x64x64xf32> to vector<64x64xf32>
    %cst_9 = arith.constant dense<0.000000e+00> : vector<64x64xf32>
    %13 = tpu.matmul %10, %12, %cst_9 {dimension_numbers = #tpu.dot_dimension_numbers<[1], [0], [0], [1], [0, 0, 1, 1], [], []>} : vector<64x64xf32>, vector<64x64xf32>, vector<64x64xf32> -> vector<64x64xf32>
    %14 = arith.addf %8, %13 : vector<64x64xf32>
    %15 = vector.extract_strided_slice %1 {offsets = [0, 2, 0], sizes = [8, 8, 64], strides = [1, 1, 1]} : vector<10x10x64xf32> to vector<8x8x64xf32>
    %16 = vector.shape_cast %15 : vector<8x8x64xf32> to vector<64x64xf32>
    %c2 = arith.constant 2 : index
    %c0_10 = arith.constant 0 : index
    %c0_11 = arith.constant 0 : index
    %17 = vector.load %arg2[%c2, %c0_10, %c0_11] : memref<9x64x64xf32, #tpu.memory_space<vmem>>, vector<1x64x64xf32>
    %18 = vector.shape_cast %17 : vector<1x64x64xf32> to vector<64x64xf32>
    %cst_12 = arith.constant dense<0.000000e+00> : vector<64x64xf32>
    %19 = tpu.matmul %16, %18, %cst_12 {dimension_numbers = #tpu.dot_dimension_numbers<[1], [0], [0], [1], [0, 0, 1, 1], [], []>} : vector<64x64xf32>, vector<64x64xf32>, vector<64x64xf32> -> vector<64x64xf32>
    %20 = arith.addf %14, %19 : vector<64x64xf32>
    %21 = vector.extract_strided_slice %1 {offsets = [1, 0, 0], sizes = [8, 8, 64], strides = [1, 1, 1]} : vector<10x10x64xf32> to vector<8x8x64xf32>
    %22 = vector.shape_cast %21 : vector<8x8x64xf32> to vector<64x64xf32>
    %c3 = arith.constant 3 : index
    %c0_13 = arith.constant 0 : index
    %c0_14 = arith.constant 0 : index
    %23 = vector.load %arg2[%c3, %c0_13, %c0_14] : memref<9x64x64xf32, #tpu.memory_space<vmem>>, vector<1x64x64xf32>
    %24 = vector.shape_cast %23 : vector<1x64x64xf32> to vector<64x64xf32>
    %cst_15 = arith.constant dense<0.000000e+00> : vector<64x64xf32>
    %25 = tpu.matmul %22, %24, %cst_15 {dimension_numbers = #tpu.dot_dimension_numbers<[1], [0], [0], [1], [0, 0, 1, 1], [], []>} : vector<64x64xf32>, vector<64x64xf32>, vector<64x64xf32> -> vector<64x64xf32>
    %26 = arith.addf %20, %25 : vector<64x64xf32>
    %27 = vector.extract_strided_slice %1 {offsets = [1, 1, 0], sizes = [8, 8, 64], strides = [1, 1, 1]} : vector<10x10x64xf32> to vector<8x8x64xf32>
    %28 = vector.shape_cast %27 : vector<8x8x64xf32> to vector<64x64xf32>
    %c4 = arith.constant 4 : index
    %c0_16 = arith.constant 0 : index
    %c0_17 = arith.constant 0 : index
    %29 = vector.load %arg2[%c4, %c0_16, %c0_17] : memref<9x64x64xf32, #tpu.memory_space<vmem>>, vector<1x64x64xf32>
    %30 = vector.shape_cast %29 : vector<1x64x64xf32> to vector<64x64xf32>
    %cst_18 = arith.constant dense<0.000000e+00> : vector<64x64xf32>
    %31 = tpu.matmul %28, %30, %cst_18 {dimension_numbers = #tpu.dot_dimension_numbers<[1], [0], [0], [1], [0, 0, 1, 1], [], []>} : vector<64x64xf32>, vector<64x64xf32>, vector<64x64xf32> -> vector<64x64xf32>
    %32 = arith.addf %26, %31 : vector<64x64xf32>
    %33 = vector.extract_strided_slice %1 {offsets = [1, 2, 0], sizes = [8, 8, 64], strides = [1, 1, 1]} : vector<10x10x64xf32> to vector<8x8x64xf32>
    %34 = vector.shape_cast %33 : vector<8x8x64xf32> to vector<64x64xf32>
    %c5 = arith.constant 5 : index
    %c0_19 = arith.constant 0 : index
    %c0_20 = arith.constant 0 : index
    %35 = vector.load %arg2[%c5, %c0_19, %c0_20] : memref<9x64x64xf32, #tpu.memory_space<vmem>>, vector<1x64x64xf32>
    %36 = vector.shape_cast %35 : vector<1x64x64xf32> to vector<64x64xf32>
    %cst_21 = arith.constant dense<0.000000e+00> : vector<64x64xf32>
    %37 = tpu.matmul %34, %36, %cst_21 {dimension_numbers = #tpu.dot_dimension_numbers<[1], [0], [0], [1], [0, 0, 1, 1], [], []>} : vector<64x64xf32>, vector<64x64xf32>, vector<64x64xf32> -> vector<64x64xf32>
    %38 = arith.addf %32, %37 : vector<64x64xf32>
    %39 = vector.extract_strided_slice %1 {offsets = [2, 0, 0], sizes = [8, 8, 64], strides = [1, 1, 1]} : vector<10x10x64xf32> to vector<8x8x64xf32>
    %40 = vector.shape_cast %39 : vector<8x8x64xf32> to vector<64x64xf32>
    %c6 = arith.constant 6 : index
    %c0_22 = arith.constant 0 : index
    %c0_23 = arith.constant 0 : index
    %41 = vector.load %arg2[%c6, %c0_22, %c0_23] : memref<9x64x64xf32, #tpu.memory_space<vmem>>, vector<1x64x64xf32>
    %42 = vector.shape_cast %41 : vector<1x64x64xf32> to vector<64x64xf32>
    %cst_24 = arith.constant dense<0.000000e+00> : vector<64x64xf32>
    %43 = tpu.matmul %40, %42, %cst_24 {dimension_numbers = #tpu.dot_dimension_numbers<[1], [0], [0], [1], [0, 0, 1, 1], [], []>} : vector<64x64xf32>, vector<64x64xf32>, vector<64x64xf32> -> vector<64x64xf32>
    %44 = arith.addf %38, %43 : vector<64x64xf32>
    %45 = vector.extract_strided_slice %1 {offsets = [2, 1, 0], sizes = [8, 8, 64], strides = [1, 1, 1]} : vector<10x10x64xf32> to vector<8x8x64xf32>
    %46 = vector.shape_cast %45 : vector<8x8x64xf32> to vector<64x64xf32>
    %c7 = arith.constant 7 : index
    %c0_25 = arith.constant 0 : index
    %c0_26 = arith.constant 0 : index
    %47 = vector.load %arg2[%c7, %c0_25, %c0_26] : memref<9x64x64xf32, #tpu.memory_space<vmem>>, vector<1x64x64xf32>
    %48 = vector.shape_cast %47 : vector<1x64x64xf32> to vector<64x64xf32>
    %cst_27 = arith.constant dense<0.000000e+00> : vector<64x64xf32>
    %49 = tpu.matmul %46, %48, %cst_27 {dimension_numbers = #tpu.dot_dimension_numbers<[1], [0], [0], [1], [0, 0, 1, 1], [], []>} : vector<64x64xf32>, vector<64x64xf32>, vector<64x64xf32> -> vector<64x64xf32>
    %50 = arith.addf %44, %49 : vector<64x64xf32>
    %51 = vector.extract_strided_slice %1 {offsets = [2, 2, 0], sizes = [8, 8, 64], strides = [1, 1, 1]} : vector<10x10x64xf32> to vector<8x8x64xf32>
    %52 = vector.shape_cast %51 : vector<8x8x64xf32> to vector<64x64xf32>
    %c8 = arith.constant 8 : index
    %c0_28 = arith.constant 0 : index
    %c0_29 = arith.constant 0 : index
    %53 = vector.load %arg2[%c8, %c0_28, %c0_29] : memref<9x64x64xf32, #tpu.memory_space<vmem>>, vector<1x64x64xf32>
    %54 = vector.shape_cast %53 : vector<1x64x64xf32> to vector<64x64xf32>
    %cst_30 = arith.constant dense<0.000000e+00> : vector<64x64xf32>
    %55 = tpu.matmul %52, %54, %cst_30 {dimension_numbers = #tpu.dot_dimension_numbers<[1], [0], [0], [1], [0, 0, 1, 1], [], []>} : vector<64x64xf32>, vector<64x64xf32>, vector<64x64xf32> -> vector<64x64xf32>
    %56 = arith.addf %50, %55 : vector<64x64xf32>
    %c0_31 = arith.constant 0 : index
    %c0_32 = arith.constant 0 : index
    %57 = vector.load %arg3[%c0_31, %c0_32] : memref<1x64xf32, #tpu.memory_space<vmem>>, vector<1x64xf32>
    %58 = vector.broadcast %57 : vector<1x64xf32> to vector<64x64xf32>
    %59 = arith.mulf %56, %58 : vector<64x64xf32>
    %c0_33 = arith.constant 0 : index
    %c0_34 = arith.constant 0 : index
    %60 = vector.load %arg4[%c0_33, %c0_34] : memref<1x64xf32, #tpu.memory_space<vmem>>, vector<1x64xf32>
    %61 = vector.broadcast %60 : vector<1x64xf32> to vector<64x64xf32>
    %62 = arith.addf %59, %61 : vector<64x64xf32>
    %cst_35 = arith.constant 0.000000e+00 : f32
    %63 = vector.broadcast %cst_35 : f32 to vector<64x64xf32>
    %64 = arith.maximumf %62, %63 : vector<64x64xf32>
    %c0_36 = arith.constant 0 : index
    %c0_37 = arith.constant 0 : index
    %c0_38 = arith.constant 0 : index
    %c0_39 = arith.constant 0 : index
    %65 = vector.load %arg5[%c0_36, %c0_37, %c0_38, %c0_39] : memref<1x8x8x64xf32, #tpu.memory_space<vmem>>, vector<1x8x8x64xf32>
    %66 = vector.shape_cast %65 : vector<1x8x8x64xf32> to vector<8x8x64xf32>
    %67 = vector.shape_cast %66 : vector<8x8x64xf32> to vector<64x64xf32>
    %68 = arith.addf %64, %67 : vector<64x64xf32>
    %cst_40 = arith.constant 0.000000e+00 : f32
    %69 = vector.broadcast %cst_40 : f32 to vector<64x64xf32>
    %70 = arith.maximumf %68, %69 : vector<64x64xf32>
    %71 = vector.shape_cast %70 : vector<64x64xf32> to vector<1x8x8x64xf32>
    %c0_41 = arith.constant 0 : index
    %c0_42 = arith.constant 0 : index
    %c0_43 = arith.constant 0 : index
    %c0_44 = arith.constant 0 : index
    %72 = vector.load %arg6[%c0_41, %c0_42, %c0_43, %c0_44] : memref<1x8x8x64xf32, #tpu.memory_space<vmem>>, vector<1x8x8x64xf32>
    tpu.vector_store %arg6[%c0_41, %c0_42, %c0_43, %c0_44], %71 {strides = array<i32>} : memref<1x8x8x64xf32, #tpu.memory_space<vmem>>, vector<1x8x8x64xf32>,
    return
  }
  func.func @transform_0(%arg0: i32) -> (i32, i32, i32, i32) {
    %c0_i32 = arith.constant 0 : i32
    %c0_i32_0 = arith.constant 0 : i32
    %c0_i32_1 = arith.constant 0 : i32
    %c0_i32_2 = arith.constant 0 : i32
    return %arg0, %c0_i32, %c0_i32_0, %c0_i32_1 : i32, i32, i32, i32
  }
  func.func @transform_1(%arg0: i32) -> (i32, i32, i32) {
    %c0_i32 = arith.constant 0 : i32
    %c0_i32_0 = arith.constant 0 : i32
    %c0_i32_1 = arith.constant 0 : i32
    %c0_i32_2 = arith.constant 0 : i32
    return %c0_i32, %c0_i32_0, %c0_i32_1 : i32, i32, i32
  }
  func.func @transform_2(%arg0: i32) -> (i32, i32) {
    %c0_i32 = arith.constant 0 : i32
    %c0_i32_0 = arith.constant 0 : i32
    %c0_i32_1 = arith.constant 0 : i32
    return %c0_i32, %c0_i32_0 : i32, i32
  }
  func.func @transform_3(%arg0: i32) -> (i32, i32) {
    %c0_i32 = arith.constant 0 : i32
    %c0_i32_0 = arith.constant 0 : i32
    %c0_i32_1 = arith.constant 0 : i32
    return %c0_i32, %c0_i32_0 : i32, i32
  }
  func.func @transform_4(%arg0: i32) -> (i32, i32, i32, i32) {
    %c0_i32 = arith.constant 0 : i32
    %c0_i32_0 = arith.constant 0 : i32
    %c0_i32_1 = arith.constant 0 : i32
    %c0_i32_2 = arith.constant 0 : i32
    return %arg0, %c0_i32, %c0_i32_0, %c0_i32_1 : i32, i32, i32, i32
  }
  func.func @transform_5(%arg0: i32) -> (i32, i32, i32, i32) {
    %c0_i32 = arith.constant 0 : i32
    %c0_i32_0 = arith.constant 0 : i32
    %c0_i32_1 = arith.constant 0 : i32
    %c0_i32_2 = arith.constant 0 : i32
    return %arg0, %c0_i32, %c0_i32_0, %c0_i32_1 : i32, i32, i32, i32
  }
}

module attributes {stable_mosaic.version = 11 : i64} {
  func.func @_conv3x3_kernel(%arg0: i32, %arg1: memref<1x10x10x64xf32, #tpu.memory_space<vmem>>, %arg2: memref<9x64x128xf32, #tpu.memory_space<vmem>>, %arg3: memref<1x128xf32, #tpu.memory_space<vmem>>, %arg4: memref<1x128xf32, #tpu.memory_space<vmem>>, %arg5: memref<1x1x128xf32, #tpu.memory_space<vmem>>) attributes {dimension_semantics = [#tpu.dimension_semantics<parallel>], iteration_bounds = array<i64: 2>, scalar_prefetch = 0 : i64, scratch_operands = 0 : i64, tpu.core_type = #tpu.core_type<tc>, window_params = [{transform_indices = @transform_0, window_bounds = array<i64: 1, 10, 10, 64>}, {pipeline_mode = #tpu.pipeline_mode<synchronous>, transform_indices = @transform_1, window_bounds = array<i64: 9, 64, 128>}, {pipeline_mode = #tpu.pipeline_mode<synchronous>, transform_indices = @transform_2, window_bounds = array<i64: 1, 128>}, {pipeline_mode = #tpu.pipeline_mode<synchronous>, transform_indices = @transform_3, window_bounds = array<i64: 1, 128>}, {transform_indices = @transform_4, window_bounds = array<i64: 1, 1, 128>}]} {
    %c0 = arith.constant 0 : index
    %c0_0 = arith.constant 0 : index
    %c0_1 = arith.constant 0 : index
    %c0_2 = arith.constant 0 : index
    %0 = vector.load %arg1[%c0, %c0_0, %c0_1, %c0_2] : memref<1x10x10x64xf32, #tpu.memory_space<vmem>>, vector<1x10x10x64xf32>
    %1 = vector.shape_cast %0 : vector<1x10x10x64xf32> to vector<10x10x64xf32>
    %cst = arith.constant 0.000000e+00 : f32
    %2 = vector.broadcast %cst : f32 to vector<64x128xf32>
    %3 = vector.extract_strided_slice %1 {offsets = [0, 0, 0], sizes = [8, 8, 64], strides = [1, 1, 1]} : vector<10x10x64xf32> to vector<8x8x64xf32>
    %4 = vector.shape_cast %3 : vector<8x8x64xf32> to vector<64x64xf32>
    %c0_3 = arith.constant 0 : index
    %c0_4 = arith.constant 0 : index
    %c0_5 = arith.constant 0 : index
    %5 = vector.load %arg2[%c0_3, %c0_4, %c0_5] : memref<9x64x128xf32, #tpu.memory_space<vmem>>, vector<1x64x128xf32>
    %6 = vector.shape_cast %5 : vector<1x64x128xf32> to vector<64x128xf32>
    %cst_6 = arith.constant dense<0.000000e+00> : vector<64x128xf32>
    %7 = tpu.matmul %4, %6, %cst_6 {dimension_numbers = #tpu.dot_dimension_numbers<[1], [0], [0], [1], [0, 0, 1, 1], [], []>} : vector<64x64xf32>, vector<64x128xf32>, vector<64x128xf32> -> vector<64x128xf32>
    %8 = arith.addf %2, %7 : vector<64x128xf32>
    %9 = vector.extract_strided_slice %1 {offsets = [0, 1, 0], sizes = [8, 8, 64], strides = [1, 1, 1]} : vector<10x10x64xf32> to vector<8x8x64xf32>
    %10 = vector.shape_cast %9 : vector<8x8x64xf32> to vector<64x64xf32>
    %c1 = arith.constant 1 : index
    %c0_7 = arith.constant 0 : index
    %c0_8 = arith.constant 0 : index
    %11 = vector.load %arg2[%c1, %c0_7, %c0_8] : memref<9x64x128xf32, #tpu.memory_space<vmem>>, vector<1x64x128xf32>
    %12 = vector.shape_cast %11 : vector<1x64x128xf32> to vector<64x128xf32>
    %cst_9 = arith.constant dense<0.000000e+00> : vector<64x128xf32>
    %13 = tpu.matmul %10, %12, %cst_9 {dimension_numbers = #tpu.dot_dimension_numbers<[1], [0], [0], [1], [0, 0, 1, 1], [], []>} : vector<64x64xf32>, vector<64x128xf32>, vector<64x128xf32> -> vector<64x128xf32>
    %14 = arith.addf %8, %13 : vector<64x128xf32>
    %15 = vector.extract_strided_slice %1 {offsets = [0, 2, 0], sizes = [8, 8, 64], strides = [1, 1, 1]} : vector<10x10x64xf32> to vector<8x8x64xf32>
    %16 = vector.shape_cast %15 : vector<8x8x64xf32> to vector<64x64xf32>
    %c2 = arith.constant 2 : index
    %c0_10 = arith.constant 0 : index
    %c0_11 = arith.constant 0 : index
    %17 = vector.load %arg2[%c2, %c0_10, %c0_11] : memref<9x64x128xf32, #tpu.memory_space<vmem>>, vector<1x64x128xf32>
    %18 = vector.shape_cast %17 : vector<1x64x128xf32> to vector<64x128xf32>
    %cst_12 = arith.constant dense<0.000000e+00> : vector<64x128xf32>
    %19 = tpu.matmul %16, %18, %cst_12 {dimension_numbers = #tpu.dot_dimension_numbers<[1], [0], [0], [1], [0, 0, 1, 1], [], []>} : vector<64x64xf32>, vector<64x128xf32>, vector<64x128xf32> -> vector<64x128xf32>
    %20 = arith.addf %14, %19 : vector<64x128xf32>
    %21 = vector.extract_strided_slice %1 {offsets = [1, 0, 0], sizes = [8, 8, 64], strides = [1, 1, 1]} : vector<10x10x64xf32> to vector<8x8x64xf32>
    %22 = vector.shape_cast %21 : vector<8x8x64xf32> to vector<64x64xf32>
    %c3 = arith.constant 3 : index
    %c0_13 = arith.constant 0 : index
    %c0_14 = arith.constant 0 : index
    %23 = vector.load %arg2[%c3, %c0_13, %c0_14] : memref<9x64x128xf32, #tpu.memory_space<vmem>>, vector<1x64x128xf32>
    %24 = vector.shape_cast %23 : vector<1x64x128xf32> to vector<64x128xf32>
    %cst_15 = arith.constant dense<0.000000e+00> : vector<64x128xf32>
    %25 = tpu.matmul %22, %24, %cst_15 {dimension_numbers = #tpu.dot_dimension_numbers<[1], [0], [0], [1], [0, 0, 1, 1], [], []>} : vector<64x64xf32>, vector<64x128xf32>, vector<64x128xf32> -> vector<64x128xf32>
    %26 = arith.addf %20, %25 : vector<64x128xf32>
    %27 = vector.extract_strided_slice %1 {offsets = [1, 1, 0], sizes = [8, 8, 64], strides = [1, 1, 1]} : vector<10x10x64xf32> to vector<8x8x64xf32>
    %28 = vector.shape_cast %27 : vector<8x8x64xf32> to vector<64x64xf32>
    %c4 = arith.constant 4 : index
    %c0_16 = arith.constant 0 : index
    %c0_17 = arith.constant 0 : index
    %29 = vector.load %arg2[%c4, %c0_16, %c0_17] : memref<9x64x128xf32, #tpu.memory_space<vmem>>, vector<1x64x128xf32>
    %30 = vector.shape_cast %29 : vector<1x64x128xf32> to vector<64x128xf32>
    %cst_18 = arith.constant dense<0.000000e+00> : vector<64x128xf32>
    %31 = tpu.matmul %28, %30, %cst_18 {dimension_numbers = #tpu.dot_dimension_numbers<[1], [0], [0], [1], [0, 0, 1, 1], [], []>} : vector<64x64xf32>, vector<64x128xf32>, vector<64x128xf32> -> vector<64x128xf32>
    %32 = arith.addf %26, %31 : vector<64x128xf32>
    %33 = vector.extract_strided_slice %1 {offsets = [1, 2, 0], sizes = [8, 8, 64], strides = [1, 1, 1]} : vector<10x10x64xf32> to vector<8x8x64xf32>
    %34 = vector.shape_cast %33 : vector<8x8x64xf32> to vector<64x64xf32>
    %c5 = arith.constant 5 : index
    %c0_19 = arith.constant 0 : index
    %c0_20 = arith.constant 0 : index
    %35 = vector.load %arg2[%c5, %c0_19, %c0_20] : memref<9x64x128xf32, #tpu.memory_space<vmem>>, vector<1x64x128xf32>
    %36 = vector.shape_cast %35 : vector<1x64x128xf32> to vector<64x128xf32>
    %cst_21 = arith.constant dense<0.000000e+00> : vector<64x128xf32>
    %37 = tpu.matmul %34, %36, %cst_21 {dimension_numbers = #tpu.dot_dimension_numbers<[1], [0], [0], [1], [0, 0, 1, 1], [], []>} : vector<64x64xf32>, vector<64x128xf32>, vector<64x128xf32> -> vector<64x128xf32>
    %38 = arith.addf %32, %37 : vector<64x128xf32>
    %39 = vector.extract_strided_slice %1 {offsets = [2, 0, 0], sizes = [8, 8, 64], strides = [1, 1, 1]} : vector<10x10x64xf32> to vector<8x8x64xf32>
    %40 = vector.shape_cast %39 : vector<8x8x64xf32> to vector<64x64xf32>
    %c6 = arith.constant 6 : index
    %c0_22 = arith.constant 0 : index
    %c0_23 = arith.constant 0 : index
    %41 = vector.load %arg2[%c6, %c0_22, %c0_23] : memref<9x64x128xf32, #tpu.memory_space<vmem>>, vector<1x64x128xf32>
    %42 = vector.shape_cast %41 : vector<1x64x128xf32> to vector<64x128xf32>
    %cst_24 = arith.constant dense<0.000000e+00> : vector<64x128xf32>
    %43 = tpu.matmul %40, %42, %cst_24 {dimension_numbers = #tpu.dot_dimension_numbers<[1], [0], [0], [1], [0, 0, 1, 1], [], []>} : vector<64x64xf32>, vector<64x128xf32>, vector<64x128xf32> -> vector<64x128xf32>
    %44 = arith.addf %38, %43 : vector<64x128xf32>
    %45 = vector.extract_strided_slice %1 {offsets = [2, 1, 0], sizes = [8, 8, 64], strides = [1, 1, 1]} : vector<10x10x64xf32> to vector<8x8x64xf32>
    %46 = vector.shape_cast %45 : vector<8x8x64xf32> to vector<64x64xf32>
    %c7 = arith.constant 7 : index
    %c0_25 = arith.constant 0 : index
    %c0_26 = arith.constant 0 : index
    %47 = vector.load %arg2[%c7, %c0_25, %c0_26] : memref<9x64x128xf32, #tpu.memory_space<vmem>>, vector<1x64x128xf32>
    %48 = vector.shape_cast %47 : vector<1x64x128xf32> to vector<64x128xf32>
    %cst_27 = arith.constant dense<0.000000e+00> : vector<64x128xf32>
    %49 = tpu.matmul %46, %48, %cst_27 {dimension_numbers = #tpu.dot_dimension_numbers<[1], [0], [0], [1], [0, 0, 1, 1], [], []>} : vector<64x64xf32>, vector<64x128xf32>, vector<64x128xf32> -> vector<64x128xf32>
    %50 = arith.addf %44, %49 : vector<64x128xf32>
    %51 = vector.extract_strided_slice %1 {offsets = [2, 2, 0], sizes = [8, 8, 64], strides = [1, 1, 1]} : vector<10x10x64xf32> to vector<8x8x64xf32>
    %52 = vector.shape_cast %51 : vector<8x8x64xf32> to vector<64x64xf32>
    %c8 = arith.constant 8 : index
    %c0_28 = arith.constant 0 : index
    %c0_29 = arith.constant 0 : index
    %53 = vector.load %arg2[%c8, %c0_28, %c0_29] : memref<9x64x128xf32, #tpu.memory_space<vmem>>, vector<1x64x128xf32>
    %54 = vector.shape_cast %53 : vector<1x64x128xf32> to vector<64x128xf32>
    %cst_30 = arith.constant dense<0.000000e+00> : vector<64x128xf32>
    %55 = tpu.matmul %52, %54, %cst_30 {dimension_numbers = #tpu.dot_dimension_numbers<[1], [0], [0], [1], [0, 0, 1, 1], [], []>} : vector<64x64xf32>, vector<64x128xf32>, vector<64x128xf32> -> vector<64x128xf32>
    %56 = arith.addf %50, %55 : vector<64x128xf32>
    %c0_31 = arith.constant 0 : index
    %c0_32 = arith.constant 0 : index
    %57 = vector.load %arg3[%c0_31, %c0_32] : memref<1x128xf32, #tpu.memory_space<vmem>>, vector<1x128xf32>
    %58 = vector.broadcast %57 : vector<1x128xf32> to vector<64x128xf32>
    %59 = arith.mulf %56, %58 : vector<64x128xf32>
    %c0_33 = arith.constant 0 : index
    %c0_34 = arith.constant 0 : index
    %60 = vector.load %arg4[%c0_33, %c0_34] : memref<1x128xf32, #tpu.memory_space<vmem>>, vector<1x128xf32>
    %61 = vector.broadcast %60 : vector<1x128xf32> to vector<64x128xf32>
    %62 = arith.addf %59, %61 : vector<64x128xf32>
    %cst_35 = arith.constant dense<0xFF800000> : vector<128xf32>
    %63 = vector.multi_reduction <maximumf>, %62, %cst_35 [0] : vector<64x128xf32> to vector<128xf32>
    %64 = vector.shape_cast %63 : vector<128xf32> to vector<1x128xf32>
    %65 = vector.shape_cast %64 : vector<1x128xf32> to vector<1x1x128xf32>
    %c0_36 = arith.constant 0 : index
    %c0_37 = arith.constant 0 : index
    %c0_38 = arith.constant 0 : index
    %66 = vector.load %arg5[%c0_36, %c0_37, %c0_38] : memref<1x1x128xf32, #tpu.memory_space<vmem>>, vector<1x1x128xf32>
    tpu.vector_store %arg5[%c0_36, %c0_37, %c0_38], %65 {strides = array<i32>} : memref<1x1x128xf32, #tpu.memory_space<vmem>>, vector<1x1x128xf32>,
    return
  }
  func.func @transform_0(%arg0: i32) -> (i32, i32, i32, i32) {
    %c0_i32 = arith.constant 0 : i32
    %c0_i32_0 = arith.constant 0 : i32
    %c0_i32_1 = arith.constant 0 : i32
    %c0_i32_2 = arith.constant 0 : i32
    return %arg0, %c0_i32, %c0_i32_0, %c0_i32_1 : i32, i32, i32, i32
  }
  func.func @transform_1(%arg0: i32) -> (i32, i32, i32) {
    %c0_i32 = arith.constant 0 : i32
    %c0_i32_0 = arith.constant 0 : i32
    %c0_i32_1 = arith.constant 0 : i32
    %c0_i32_2 = arith.constant 0 : i32
    return %c0_i32, %c0_i32_0, %c0_i32_1 : i32, i32, i32
  }
  func.func @transform_2(%arg0: i32) -> (i32, i32) {
    %c0_i32 = arith.constant 0 : i32
    %c0_i32_0 = arith.constant 0 : i32
    %c0_i32_1 = arith.constant 0 : i32
    return %c0_i32, %c0_i32_0 : i32, i32
  }
  func.func @transform_3(%arg0: i32) -> (i32, i32) {
    %c0_i32 = arith.constant 0 : i32
    %c0_i32_0 = arith.constant 0 : i32
    %c0_i32_1 = arith.constant 0 : i32
    return %c0_i32, %c0_i32_0 : i32, i32
  }
  func.func @transform_4(%arg0: i32) -> (i32, i32, i32) {
    %c0_i32 = arith.constant 0 : i32
    %c0_i32_0 = arith.constant 0 : i32
    %c0_i32_1 = arith.constant 0 : i32
    return %arg0, %c0_i32, %c0_i32_0 : i32, i32, i32
  }
}

module attributes {stable_mosaic.version = 11 : i64} {
  func.func @_value_head_kernel(%arg0: i32, %arg1: memref<8x128xf32, #tpu.memory_space<vmem>>, %arg2: memref<128x128xf32, #tpu.memory_space<vmem>>, %arg3: memref<1x128xf32, #tpu.memory_space<vmem>>, %arg4: memref<128x21xf32, #tpu.memory_space<vmem>>, %arg5: memref<1x21xf32, #tpu.memory_space<vmem>>, %arg6: memref<1x21xf32, #tpu.memory_space<vmem>>, %arg7: memref<8x1xf32, #tpu.memory_space<vmem>>) attributes {dimension_semantics = [#tpu.dimension_semantics<parallel>], iteration_bounds = array<i64: 1>, scalar_prefetch = 0 : i64, scratch_operands = 0 : i64, tpu.core_type = #tpu.core_type<tc>, window_params = [{transform_indices = @transform_0, window_bounds = array<i64: 8, 128>}, {pipeline_mode = #tpu.pipeline_mode<synchronous>, transform_indices = @transform_1, window_bounds = array<i64: 128, 128>}, {pipeline_mode = #tpu.pipeline_mode<synchronous>, transform_indices = @transform_2, window_bounds = array<i64: 1, 128>}, {pipeline_mode = #tpu.pipeline_mode<synchronous>, transform_indices = @transform_3, window_bounds = array<i64: 128, 21>}, {pipeline_mode = #tpu.pipeline_mode<synchronous>, transform_indices = @transform_4, window_bounds = array<i64: 1, 21>}, {pipeline_mode = #tpu.pipeline_mode<synchronous>, transform_indices = @transform_5, window_bounds = array<i64: 1, 21>}, {transform_indices = @transform_6, window_bounds = array<i64: 8, 1>}]} {
    %c0 = arith.constant 0 : index
    %c0_0 = arith.constant 0 : index
    %0 = vector.load %arg1[%c0, %c0_0] : memref<8x128xf32, #tpu.memory_space<vmem>>, vector<8x128xf32>
    %c0_1 = arith.constant 0 : index
    %c0_2 = arith.constant 0 : index
    %1 = vector.load %arg2[%c0_1, %c0_2] : memref<128x128xf32, #tpu.memory_space<vmem>>, vector<128x128xf32>
    %cst = arith.constant dense<0.000000e+00> : vector<8x128xf32>
    %2 = tpu.matmul %0, %1, %cst {dimension_numbers = #tpu.dot_dimension_numbers<[1], [0], [0], [1], [0, 0, 1, 1], [], []>} : vector<8x128xf32>, vector<128x128xf32>, vector<8x128xf32> -> vector<8x128xf32>
    %c0_3 = arith.constant 0 : index
    %c0_4 = arith.constant 0 : index
    %3 = vector.load %arg3[%c0_3, %c0_4] : memref<1x128xf32, #tpu.memory_space<vmem>>, vector<1x128xf32>
    %4 = vector.broadcast %3 : vector<1x128xf32> to vector<8x128xf32>
    %5 = arith.addf %2, %4 : vector<8x128xf32>
    %cst_5 = arith.constant 0.000000e+00 : f32
    %6 = vector.broadcast %cst_5 : f32 to vector<8x128xf32>
    %7 = arith.maximumf %5, %6 : vector<8x128xf32>
    %c0_6 = arith.constant 0 : index
    %c0_7 = arith.constant 0 : index
    %8 = vector.load %arg4[%c0_6, %c0_7] : memref<128x21xf32, #tpu.memory_space<vmem>>, vector<128x21xf32>
    %cst_8 = arith.constant dense<0.000000e+00> : vector<8x21xf32>
    %9 = tpu.matmul %7, %8, %cst_8 {dimension_numbers = #tpu.dot_dimension_numbers<[1], [0], [0], [1], [0, 0, 1, 1], [], []>} : vector<8x128xf32>, vector<128x21xf32>, vector<8x21xf32> -> vector<8x21xf32>
    %c0_9 = arith.constant 0 : index
    %c0_10 = arith.constant 0 : index
    %10 = vector.load %arg5[%c0_9, %c0_10] : memref<1x21xf32, #tpu.memory_space<vmem>>, vector<1x21xf32>
    %11 = vector.broadcast %10 : vector<1x21xf32> to vector<8x21xf32>
    %12 = arith.addf %9, %11 : vector<8x21xf32>
    %cst_11 = arith.constant dense<0xFF800000> : vector<8xf32>
    %13 = vector.multi_reduction <maximumf>, %12, %cst_11 [1] : vector<8x21xf32> to vector<8xf32>
    %14 = vector.shape_cast %13 : vector<8xf32> to vector<8x1xf32>
    %15 = vector.broadcast %14 : vector<8x1xf32> to vector<8x21xf32>
    %16 = arith.subf %12, %15 : vector<8x21xf32>
    %17 = math.exp %16 : vector<8x21xf32>
    %cst_12 = arith.constant dense<0.000000e+00> : vector<8xf32>
    %18 = vector.multi_reduction <add>, %17, %cst_12 [1] : vector<8x21xf32> to vector<8xf32>
    %19 = vector.shape_cast %18 : vector<8xf32> to vector<8x1xf32>
    %20 = vector.broadcast %19 : vector<8x1xf32> to vector<8x21xf32>
    %21 = arith.divf %17, %20 : vector<8x21xf32>
    %c0_13 = arith.constant 0 : index
    %c0_14 = arith.constant 0 : index
    %22 = vector.load %arg6[%c0_13, %c0_14] : memref<1x21xf32, #tpu.memory_space<vmem>>, vector<1x21xf32>
    %23 = vector.broadcast %22 : vector<1x21xf32> to vector<8x21xf32>
    %24 = arith.mulf %21, %23 : vector<8x21xf32>
    %cst_15 = arith.constant dense<0.000000e+00> : vector<8xf32>
    %25 = vector.multi_reduction <add>, %24, %cst_15 [1] : vector<8x21xf32> to vector<8xf32>
    %26 = vector.shape_cast %25 : vector<8xf32> to vector<8x1xf32>
    %cst_16 = arith.constant 1.000000e-01 : f32
    %27 = vector.broadcast %cst_16 : f32 to vector<8x1xf32>
    %28 = arith.mulf %26, %27 : vector<8x1xf32>
    %c0_17 = arith.constant 0 : index
    %c0_18 = arith.constant 0 : index
    %29 = vector.load %arg7[%c0_17, %c0_18] : memref<8x1xf32, #tpu.memory_space<vmem>>, vector<8x1xf32>
    tpu.vector_store %arg7[%c0_17, %c0_18], %28 {strides = array<i32>} : memref<8x1xf32, #tpu.memory_space<vmem>>, vector<8x1xf32>,
    return
  }
  func.func @transform_0(%arg0: i32) -> (i32, i32) {
    %c0_i32 = arith.constant 0 : i32
    %c0_i32_0 = arith.constant 0 : i32
    return %arg0, %c0_i32 : i32, i32
  }
  func.func @transform_1(%arg0: i32) -> (i32, i32) {
    %c0_i32 = arith.constant 0 : i32
    %c0_i32_0 = arith.constant 0 : i32
    %c0_i32_1 = arith.constant 0 : i32
    return %c0_i32, %c0_i32_0 : i32, i32
  }
  func.func @transform_2(%arg0: i32) -> (i32, i32) {
    %c0_i32 = arith.constant 0 : i32
    %c0_i32_0 = arith.constant 0 : i32
    %c0_i32_1 = arith.constant 0 : i32
    return %c0_i32, %c0_i32_0 : i32, i32
  }
  func.func @transform_3(%arg0: i32) -> (i32, i32) {
    %c0_i32 = arith.constant 0 : i32
    %c0_i32_0 = arith.constant 0 : i32
    %c0_i32_1 = arith.constant 0 : i32
    return %c0_i32, %c0_i32_0 : i32, i32
  }
  func.func @transform_4(%arg0: i32) -> (i32, i32) {
    %c0_i32 = arith.constant 0 : i32
    %c0_i32_0 = arith.constant 0 : i32
    %c0_i32_1 = arith.constant 0 : i32
    return %c0_i32, %c0_i32_0 : i32, i32
  }
  func.func @transform_5(%arg0: i32) -> (i32, i32) {
    %c0_i32 = arith.constant 0 : i32
    %c0_i32_0 = arith.constant 0 : i32
    %c0_i32_1 = arith.constant 0 : i32
    return %c0_i32, %c0_i32_0 : i32, i32
  }
  func.func @transform_6(%arg0: i32) -> (i32, i32) {
    %c0_i32 = arith.constant 0 : i32
    %c0_i32_0 = arith.constant 0 : i32
    return %arg0, %c0_i32 : i32, i32
  }
}

</mosaic_0001>

<bundles_post_ra>
// kernel: discrete_support_value_forward.7
= control target key start
LH: loop header
LB: loop body
LE: loop exit
PB: predicated region body
PF: predicated region fallthrough
CT: control target
= control target key end

     0   :  { %vm99_vm0 = vcmask 1043456   ;;  %vm50_vm1 = vcmask 818176   ;;  %vm248_vm2 = vcmask 523264   ;;  %s582_s1 = inlined_call_operand.vmem [shape: f32[100,64], index: 1, kind: input, shape index: {}]   ;;  %s583_s0 = inlined_call_operand.vmem [shape: f32[128,100], index: 0, kind: input, shape index: {}]   ;;  %s584_s2 = inlined_call_operand.vmem [shape: f32[1,64], index: 2, kind: input, shape index: {}]   ;;  %s585_s3 = inlined_call_operand.vmem [shape: f32[128,64], index: 3, kind: output, shape index: {}]  }
   0x1   :  { %v42_v0 = vld [vmem:[%s582_s1 + $0x60] sm:$0xf]  ;;  %v41_v1 = vld [vmem:[%s582_s1 + $0x58] sm:$0xff]  ;;  %v40_v2 = vld [vmem:[%s582_s1 + $0x50] sm:$0xff] }
   0x2   :  { %316 = vmatprep.subr.msk.mxu0 %vm99_vm0, %v42_v0  ;;  %366 = vmatprep.subr.msk.mxu1 %vm99_vm0, %v42_v0  ;;  %v39_v3 = vld [vmem:[%s582_s1 + $0x48] sm:$0xff]  ;;  %v38_v4 = vld [vmem:[%s582_s1 + $0x40] sm:$0xff]  ;;  %v37_v5 = vld [vmem:[%s582_s1 + $0x38] sm:$0xff] }
   0x3   :  { %317 = vmatpush3.msk.msra.mxu0 %vm99_vm0, %v42_v0  ;;  %379 = vmatpush3.msk.msra.mxu1 %vm99_vm0, %v42_v0  ;;  %v36_v6 = vld [vmem:[%s582_s1 + $0x30] sm:$0xff]  ;;  %v35_v7 = vld [vmem:[%s582_s1 + $0x28] sm:$0xff]  ;;  %v34_v8 = vld [vmem:[%s582_s1 + $0x20] sm:$0xff] }
   0x4   :  { %318 = vmatprep.subr.mxu0 %v41_v1  ;;  %367 = vmatprep.subr.mxu1 %v41_v1  ;;  %v33_v9 = vld [vmem:[%s582_s1 + $0x18] sm:$0xff]  ;;  %v32_v10 = vld [vmem:[%s582_s1 + $0x10] sm:$0xff]  ;;  %v31_v11 = vld [vmem:[%s582_s1 + $0x8] sm:$0xff] }
   0x5   :  { %319 = vmatpush3.msra.mxu0 %v41_v1  ;;  %380 = vmatpush3.msra.mxu1 %v41_v1  ;;  %v30_v12 = vld [vmem:[%s582_s1] sm:$0xff]  ;;  %v15_v15 = vld [vmem:[%s583_s0 + $0x8] sm:$0xff]  ;;  %v16_v17 = vld [vmem:[%s583_s0 + $0x10] sm:$0xff] }
   0x6   :  { %320 = vmatprep.subr.mxu0 %v40_v2  ;;  %368 = vmatprep.subr.mxu1 %v40_v2  ;;  %v14_v13 = vld [vmem:[%s583_s0] sm:$0xff]  ;;  %v23_v16 = vld [vmem:[%s583_s0 + $0x48] sm:$0xff]  ;;  %v24_v18 = vld [vmem:[%s583_s0 + $0x50] sm:$0xff] }
   0x7   :  { %321 = vmatpush3.msra.mxu0 %v40_v2  ;;  %381 = vmatpush3.msra.mxu1 %v40_v2  ;;  %v22_v14 = vld [vmem:[%s583_s0 + $0x40] sm:$0xff]  ;;  %v17_v19 = vld [vmem:[%s583_s0 + $0x18] sm:$0xff]  ;;  %v19_v23 = vld [vmem:[%s583_s0 + $0x28] sm:$0xff] }
   0x8   :  { %322 = vmatprep.subr.mxu0 %v39_v3  ;;  %369 = vmatprep.subr.mxu1 %v39_v3  ;;  %v25_v20 = vld [vmem:[%s583_s0 + $0x58] sm:$0xff]  ;;  %v18_v21 = vld [vmem:[%s583_s0 + $0x20] sm:$0xff]  ;;  %v27_v24 = vld [vmem:[%s583_s0 + $0x68] sm:$0xff] }
   0x9   :  { %323 = vmatpush3.msra.mxu0 %v39_v3  ;;  %382 = vmatpush3.msra.mxu1 %v39_v3  ;;  %v26_v22 = vld [vmem:[%s583_s0 + $0x60] sm:$0xff]  ;;  %v20_v25 = vld [vmem:[%s583_s0 + $0x30] sm:$0xff]  ;;  %v21_v27 = vld [vmem:[%s583_s0 + $0x38] sm:$0xff] }
   0xa   :  { %324 = vmatprep.subr.mxu0 %v38_v4  ;;  %370 = vmatprep.subr.mxu1 %v38_v4  ;;  %v28_v26 = vld [vmem:[%s583_s0 + $0x70] sm:$0xff]  ;;  %v29_v28 = vld [vmem:[%s583_s0 + $0x78] sm:$0xff]  ;;  %v269_v29 = vld [vmem:[%s584_s2] ss:$0 sm:$0xff] }
   0xb   :  { %325 = vmatpush3.msra.mxu0 %v38_v4  ;;  %383 = vmatpush3.msra.mxu1 %v38_v4 }
   0xc   :  { %326 = vmatprep.subr.mxu0 %v37_v5  ;;  %371 = vmatprep.subr.mxu1 %v37_v5 }
   0xd   :  { %327 = vmatpush3.msra.mxu0 %v37_v5  ;;  %384 = vmatpush3.msra.mxu1 %v37_v5 }
   0xe   :  { %328 = vmatprep.subr.mxu0 %v36_v6  ;;  %372 = vmatprep.subr.mxu1 %v36_v6 }
   0xf   :  { %329 = vmatpush3.msra.mxu0 %v36_v6  ;;  %385 = vmatpush3.msra.mxu1 %v36_v6 }
  0x10   :  { %330 = vmatprep.subr.mxu0 %v35_v7  ;;  %373 = vmatprep.subr.mxu1 %v35_v7 }
  0x11   :  { %331 = vmatpush3.msra.mxu0 %v35_v7  ;;  %386 = vmatpush3.msra.mxu1 %v35_v7 }
  0x12   :  { %332 = vmatprep.subr.mxu0 %v34_v8  ;;  %374 = vmatprep.subr.mxu1 %v34_v8 }
  0x13   :  { %333 = vmatpush3.msra.mxu0 %v34_v8  ;;  %387 = vmatpush3.msra.mxu1 %v34_v8 }
  0x14   :  { %334 = vmatprep.subr.mxu0 %v33_v9  ;;  %375 = vmatprep.subr.mxu1 %v33_v9 }
  0x15   :  { %335 = vmatpush3.msra.mxu0 %v33_v9  ;;  %388 = vmatpush3.msra.mxu1 %v33_v9 }
  0x16   :  { %336 = vmatprep.subr.mxu0 %v32_v10  ;;  %376 = vmatprep.subr.mxu1 %v32_v10 }
  0x17   :  { %337 = vmatpush3.msra.mxu0 %v32_v10  ;;  %389 = vmatpush3.msra.mxu1 %v32_v10 }
  0x18   :  { %338 = vmatprep.subr.mxu0 %v31_v11  ;;  %377 = vmatprep.subr.mxu1 %v31_v11 }
  0x19   :  { %339 = vmatpush3.msra.mxu0 %v31_v11  ;;  %390 = vmatpush3.msra.mxu1 %v31_v11 }
  0x1a   :  { %340 = vmatprep.subr.mxu0 %v30_v12  ;;  %378 = vmatprep.subr.mxu1 %v30_v12 }
  0x1b   :  { %341 = vmatpush3.msra.mxu0 %v30_v12  ;;  %391 = vmatpush3.msra.mxu1 %v30_v12 }
  0x1c   :  { %342 = vmatprep.mubr.msk.f32.mxu0 %vm50_vm1, %v14_v13  ;;  %354 = vmatprep.mubr.msk.f32.mxu1 %vm50_vm1, %v22_v14 }
  0x1d   :  { %343 = vmatmul.mubr.msk.f32.vlgmr.msra.gmra.mxu0 %vm50_vm1, %v15_v15  ;;  %355 = vmatmul.mubr.msk.f32.vlgmr.msra.gmra.mxu1 %vm50_vm1, %v23_v16 }
  0x1e   :  { %345 = vmatprep.mubr.msk.f32.mxu0 %vm50_vm1, %v16_v17  ;;  %357 = vmatprep.mubr.msk.f32.mxu1 %vm50_vm1, %v24_v18 }
  0x21   :  { %346 = vmatmul.mubr.msk.f32.gmra.mxu0 %vm50_vm1, %v17_v19  ;;  %358 = vmatmul.mubr.msk.f32.gmra.mxu1 %vm50_vm1, %v25_v20 }
  0x22   :  { %348 = vmatprep.mubr.msk.f32.mxu0 %vm50_vm1, %v18_v21  ;;  %360 = vmatprep.mubr.msk.f32.mxu1 %vm50_vm1, %v26_v22 }
  0x25   :  { %349 = vmatmul.mubr.msk.f32.gmra.mxu0 %vm50_vm1, %v19_v23  ;;  %361 = vmatmul.mubr.msk.f32.gmra.mxu1 %vm50_vm1, %v27_v24 }
  0x26   :  { %351 = vmatprep.mubr.msk.f32.mxu0 %vm50_vm1, %v20_v25  ;;  %363 = vmatprep.mubr.msk.f32.mxu1 %vm50_vm1, %v28_v26 }
  0x29   :  { %352 = vmatmul.mubr.msk.f32.gmra.mxu0 %vm50_vm1, %v21_v27  ;;  %364 = vmatmul.mubr.msk.f32.gmra.mxu1 %vm50_vm1, %v29_v28 }
  0xdd   :  { %v344_v30 = vpop.f32.mrf.mxu0  ;;  %v356_v31 = vpop.f32.mrf.mxu1 }
  0xde   :  { %v175_v32 = vadd.f32 %v344_v30, %v269_v29  ;;  %v215_v33 = vadd.f32 %v356_v31, %v269_v29 }
  0xdf   :  { %v169_v34 = vpop.f32.mrf.mxu0  ;;  %v209_v35 = vpop.f32.mrf.mxu1 }
  0xe0   :  { %250 = vst.msk [vmem:[%s585_s3 + $0x8] sm:$0xff] %vm248_vm2, %v175_v32  ;;  %258 = vst.msk [vmem:[%s585_s3 + $0x48] sm:$0xff] %vm248_vm2, %v215_v33  ;;  %v170_v36 = vadd.f32 %v269_v29, %v169_v34  ;;  %v210_v37 = vadd.f32 %v269_v29, %v209_v35 }
  0xe1   :  { %v347_v38 = vpop.f32.mrf.mxu0  ;;  %v359_v39 = vpop.f32.mrf.mxu1 }
  0xe2   :  { %249 = vst.msk [vmem:[%s585_s3] sm:$0xff] %vm248_vm2, %v170_v36  ;;  %257 = vst.msk [vmem:[%s585_s3 + $0x40] sm:$0xff] %vm248_vm2, %v210_v37  ;;  %v185_v40 = vadd.f32 %v347_v38, %v269_v29  ;;  %v225_v41 = vadd.f32 %v359_v39, %v269_v29 }
  0xe3   :  { %v179_v42 = vpop.f32.mrf.mxu0  ;;  %v219_v43 = vpop.f32.mrf.mxu1 }
  0xe4   :  { %252 = vst.msk [vmem:[%s585_s3 + $0x18] sm:$0xff] %vm248_vm2, %v185_v40  ;;  %260 = vst.msk [vmem:[%s585_s3 + $0x58] sm:$0xff] %vm248_vm2, %v225_v41  ;;  %v180_v44 = vadd.f32 %v269_v29, %v179_v42  ;;  %v220_v45 = vadd.f32 %v269_v29, %v219_v43 }
  0xe5   :  { %v350_v46 = vpop.f32.mrf.mxu0  ;;  %v362_v47 = vpop.f32.mrf.mxu1 }
  0xe6   :  { %251 = vst.msk [vmem:[%s585_s3 + $0x10] sm:$0xff] %vm248_vm2, %v180_v44  ;;  %259 = vst.msk [vmem:[%s585_s3 + $0x50] sm:$0xff] %vm248_vm2, %v220_v45  ;;  %v195_v48 = vadd.f32 %v350_v46, %v269_v29  ;;  %v235_v49 = vadd.f32 %v362_v47, %v269_v29 }
  0xe7   :  { %v189_v50 = vpop.f32.mrf.mxu0  ;;  %v229_v51 = vpop.f32.mrf.mxu1 }
  0xe8   :  { %254 = vst.msk [vmem:[%s585_s3 + $0x28] sm:$0xff] %vm248_vm2, %v195_v48  ;;  %262 = vst.msk [vmem:[%s585_s3 + $0x68] sm:$0xff] %vm248_vm2, %v235_v49  ;;  %v190_v52 = vadd.f32 %v269_v29, %v189_v50  ;;  %v230_v53 = vadd.f32 %v269_v29, %v229_v51 }
  0xe9   :  { %v353_v54 = vpop.f32.mrf.mxu0  ;;  %v365_v55 = vpop.f32.mrf.mxu1 }
  0xea   :  { %253 = vst.msk [vmem:[%s585_s3 + $0x20] sm:$0xff] %vm248_vm2, %v190_v52  ;;  %261 = vst.msk [vmem:[%s585_s3 + $0x60] sm:$0xff] %vm248_vm2, %v230_v53  ;;  %v205_v56 = vadd.f32 %v353_v54, %v269_v29  ;;  %v245_v57 = vadd.f32 %v365_v55, %v269_v29 }
  0xeb   :  { %v199_v58 = vpop.f32.mrf.mxu0  ;;  %v239_v59 = vpop.f32.mrf.mxu1 }
  0xec   :  { %256 = vst.msk [vmem:[%s585_s3 + $0x38] sm:$0xff] %vm248_vm2, %v205_v56  ;;  %264 = vst.msk [vmem:[%s585_s3 + $0x78] sm:$0xff] %vm248_vm2, %v245_v57  ;;  %v200_v60 = vadd.f32 %v269_v29, %v199_v58  ;;  %v240_v61 = vadd.f32 %v269_v29, %v239_v59 }
  0xee   :  { %255 = vst.msk [vmem:[%s585_s3 + $0x30] sm:$0xff] %vm248_vm2, %v200_v60  ;;  %263 = vst.msk [vmem:[%s585_s3 + $0x70] sm:$0xff] %vm248_vm2, %v240_v61 }

// kernel: discrete_support_value_forward.12
= control target key start
LH: loop header
LB: loop body
LE: loop exit
PB: predicated region body
PF: predicated region fallthrough
CT: control target
= control target key end

     0   :  { %s2129_s15 = smov 0   ;;  %s2689_s0 = inlined_call_operand.vmem [shape: f32[2,10,10,64], index: 0, kind: input, shape index: {}]   ;;  %s2690_s1 = inlined_call_operand.vmem [shape: f32[9,64,128], index: 1, kind: input, shape index: {}]   ;;  %s2691_s2 = inlined_call_operand.vmem [shape: f32[1,128], index: 2, kind: input, shape index: {}]   ;;  %s2692_s3 = inlined_call_operand.vmem [shape: f32[1,128], index: 3, kind: input, shape index: {}]   ;;  %s2693_s4 = inlined_call_operand.vmem [shape: f32[2,1,128], index: 4, kind: output, shape index: {}]  }
   0x1 LB: > { %s1529_s16 = sadd.s32 4294967295, %s2102_s15   ;;  %p1533_p0 = scmp.ge.s32.totalorder %s2102_s15, 1  ;;  %s2102_s15 = sphi %s2129_s15, %s14_s15  }
   0x2   : > { %p162_p1 = scmp.lt.s32.totalorder %s2102_s15, 3 }
   0x4   : > { %p163_p2 = pnand %p1533_p0, %p162_p1 }
   0x6   : > { %166 = sbr.rel (%p163_p2) target bundleno = 350 (0x15e), region = 36 }
   0xb   : > { %v1542_v0 = vld [vmem:[%s2690_s1 + $0x78] sm:$0xff]  ;;  %v1541_v2 = vld [vmem:[%s2690_s1 + $0x70] sm:$0xff]  ;;  %p186_p3 = scmp.lt.s32.totalorder %s1529_s16, 1  ;;  %v1540_v4 = vld [vmem:[%s2690_s1 + $0x68] sm:$0xff]  ;;  %vm238_vm0 = vcmask 1046528   ;;  %vm272_vm1 = vcmask 523264  }
   0xc   : > { %v221_v1 = vld [vmem:[%s2690_s1 + $0x38] sm:$0xff]  ;;  %1819 = vmatprep.subr.mxu0 %v1542_v0  ;;  %v220_v3 = vld [vmem:[%s2690_s1 + $0x30] sm:$0xff]  ;;  %v219_v5 = vld [vmem:[%s2690_s1 + $0x28] sm:$0xff]  ;;  %vm515_vm2 = vcmask 1045504  }
   0xd   : > { %1847 = vmatprep.subr.mxu1 %v221_v1  ;;  %1820 = vmatpush3.msra.mxu0 %v1542_v0  ;;  %s2707_s16 = smov (!%p186_p3, %s1529_s16), 1  ;;  %v1539_v6 = vld [vmem:[%s2690_s1 + $0x60] sm:$0xff]  ;;  %v1538_v8 = vld [vmem:[%s2690_s1 + $0x58] sm:$0xff]  ;;  %v1537_v10 = vld [vmem:[%s2690_s1 + $0x50] sm:$0xff] }
   0xe   : > { %1848 = vmatpush3.msra.mxu1 %v221_v1  ;;  %1821 = vmatprep.subr.mxu0 %v1541_v2  ;;  %v218_v7 = vld [vmem:[%s2690_s1 + $0x20] sm:$0xff]  ;;  %s2087_s7 = smul.u32 160, %s2707_s16  ;;  %v217_v9 = vld [vmem:[%s2690_s1 + $0x18] sm:$0xff]  ;;  %v216_v13 = vld [vmem:[%s2690_s1 + $0x10] sm:$0xff]  ;;  %s193_s28 = scalar_lea.vmem %s2693_s4, %s2707_s16 }
   0xf   : > { %1849 = vmatprep.subr.mxu1 %v220_v3  ;;  %1822 = vmatpush3.msra.mxu0 %v1541_v2  ;;  %v1536_v18 = vld [vmem:[%s2690_s1 + $0x48] sm:$0xff]  ;;  %v1535_v20 = vld [vmem:[%s2690_s1 + $0x40] sm:$0xff]  ;;  %v1566_v32 = vld [vmem:[%s2690_s1 + $0xb8] sm:$0xff] }
  0x10   : > { %1850 = vmatpush3.msra.mxu1 %v220_v3  ;;  %1823 = vmatprep.subr.mxu0 %v1540_v4  ;;  %s2173_s14 = scalar_lea.vmem %s2689_s0, %s2087_s7  ;;  %v215_v19 = vld [vmem:[%s2690_s1 + $0x8] sm:$0xff]  ;;  %v214_v23 = vld [vmem:[%s2690_s1] sm:$0xff]  ;;  %v1582_v33 = vld [vmem:[%s2690_s1 + $0xf8] sm:$0xff] }
  0x11   : > { %1851 = vmatprep.subr.mxu1 %v219_v5  ;;  %1824 = vmatpush3.msra.mxu0 %v1540_v4  ;;  %v2179_v11 = vld [vmem:[%s2173_s14] sm:$0xff]  ;;  %v2182_v12 = vld [vmem:[%s2173_s14 + $0x8] sm:$0x3]  ;;  %v2188_v14 = vld [vmem:[%s2173_s14 + $0x10] sm:$0xff] }
  0x12   : > { %1852 = vmatpush3.msra.mxu1 %v219_v5  ;;  %1825 = vmatprep.subr.mxu0 %v1539_v6  ;;  %v2191_v15 = vld [vmem:[%s2173_s14 + $0x18] sm:$0x3]  ;;  %v239_v16 = vrot.slane %v2179_v11, 1  ;;  %v240_v17 = vrot.slane %v2182_v12, 1  ;;  %v242_v21 = vrot.slane %v2188_v14, 1  ;;  %v2210_v24 = vld [vmem:[%s2173_s14 + $0x20] sm:$0xff] }
  0x13   : > { %1853 = vmatprep.subr.mxu1 %v218_v7  ;;  %1826 = vmatpush3.msra.mxu0 %v1539_v6  ;;  %v243_v22 = vrot.slane %v2191_v15, 1  ;;  %v2213_v25 = vld [vmem:[%s2173_s14 + $0x28] sm:$0x3]  ;;  %v2217_v27 = vld [vmem:[%s2173_s14 + $0x30] sm:$0xff]  ;;  %v2220_v28 = vld [vmem:[%s2173_s14 + $0x38] sm:$0x3] }
  0x14   : > { %1854 = vmatpush3.msra.mxu1 %v218_v7  ;;  %1827 = vmatprep.subr.mxu0 %v1538_v8  ;;  %v241_v26 = vsel %vm238_vm0, %v239_v16, %v240_v17  ;;  %v245_v30 = vrot.slane %v2210_v24, 1  ;;  %v246_v31 = vrot.slane %v2213_v25, 1  ;;  %v1565_v34 = vld [vmem:[%s2690_s1 + $0xb0] sm:$0xff]  ;;  %v248_v35 = vrot.slane %v2217_v27, 1  ;;  %v2249_v38 = vld [vmem:[%s2173_s14 + $0x40] sm:$0xff]  ;;  %v1564_v46 = vld [vmem:[%s2690_s1 + $0xa8] sm:$0xff] }
  0x15   : > { %1855 = vmatprep.subr.mxu1 %v217_v9  ;;  %1828 = vmatpush3.msra.mxu0 %v1538_v8  ;;  %v2223_v29 = vsel %vm238_vm0, %v242_v21, %v243_v22  ;;  %v249_v36 = vrot.slane %v2220_v28, 1  ;;  %v1581_v37 = vld [vmem:[%s2690_s1 + $0xf0] sm:$0xff]  ;;  %v2252_v39 = vld [vmem:[%s2173_s14 + $0x48] sm:$0x3]  ;;  %v2261_v42 = vld [vmem:[%s2173_s14 + $0x58] sm:$0x3] }
  0x16   : > { %1856 = vmatpush3.msra.mxu1 %v217_v9  ;;  %1829 = vmatprep.subr.mxu0 %v1537_v10  ;;  %v2255_v40 = vsel %vm238_vm0, %v245_v30, %v246_v31  ;;  %v2258_v41 = vld [vmem:[%s2173_s14 + $0x50] sm:$0xff]  ;;  %v251_v44 = vrot.slane %v2249_v38, 1  ;;  %v252_v45 = vrot.slane %v2252_v39, 1  ;;  %v1580_v47 = vld [vmem:[%s2690_s1 + $0xe8] sm:$0xff]  ;;  %v2279_v48 = vld [vmem:[%s2173_s14 + $0x60] sm:$0xff]  ;;  %v255_v50 = vrot.slane %v2261_v42, 1 }
  0x17   : > { %1857 = vmatprep.subr.mxu1 %v216_v13  ;;  %1830 = vmatpush3.msra.mxu0 %v1537_v10  ;;  %v2264_v43 = vsel %vm238_vm0, %v248_v35, %v249_v36  ;;  %v254_v49 = vrot.slane %v2258_v41, 1  ;;  %v2284_v51 = vld [vmem:[%s2173_s14 + $0x68] sm:$0x3]  ;;  %v1563_v52 = vld [vmem:[%s2690_s1 + $0xa0] sm:$0xff]  ;;  %v257_v56 = vrot.slane %v2279_v48, 1  ;;  %v2306_v59 = vld [vmem:[%s2173_s14 + $0x70] sm:$0xff] }
  0x18   : > { %1858 = vmatpush3.msra.mxu1 %v216_v13  ;;  %1831 = vmatprep.subr.mxu0 %v1536_v18  ;;  %v1579_v53 = vld [vmem:[%s2690_s1 + $0xe0] sm:$0xff]  ;;  %v2300_v55 = vsel %vm238_vm0, %v251_v44, %v252_v45  ;;  %v258_v58 = vrot.slane %v2284_v51, 1  ;;  %v2309_v60 = vld [vmem:[%s2173_s14 + $0x78] sm:$0x3]  ;;  %v2312_v61 = vld [vmem:[%s2173_s14 + $0x88] sm:$0x3] }
  0x19   : > { %1859 = vmatprep.subr.mxu1 %v215_v19  ;;  %1832 = vmatpush3.msra.mxu0 %v1536_v18  ;;  %v2297_v54 = vld [vmem:[%s2173_s14 + $0x80] sm:$0xff]  ;;  %v2315_v62 = vsel %vm238_vm0, %v254_v49, %v255_v50  ;;  %v805_v63 = vrot.slane %v2312_v61, 1  ;;  %v1562_v0 = vld [vmem:[%s2690_s1 + $0x98] sm:$0xff]  ;;  %v1561_v2 = vld [vmem:[%s2690_s1 + $0x90] sm:$0xff]  ;;  %v260_v3 = vrot.slane %v2306_v59, 1  ;;  %v261_v4 = vrot.slane %v2309_v60, 1 }
  0x1a   : > { %1860 = vmatpush3.msra.mxu1 %v215_v19  ;;  %1833 = vmatprep.subr.mxu0 %v1535_v20  ;;  %v804_v57 = vrot.slane %v2297_v54, 1  ;;  %v1578_v1 = vld [vmem:[%s2690_s1 + $0xd8] sm:$0xff]  ;;  %v1577_v6 = vld [vmem:[%s2690_s1 + $0xd0] sm:$0xff]  ;;  %v2344_v7 = vsel %vm238_vm0, %v257_v56, %v258_v58  ;;  %v517_v18 = vrot.slane %v2182_v12, 2  ;;  %v1560_v12 = vld [vmem:[%s2690_s1 + $0x88] sm:$0xff]  ;;  %v526_v44 = vrot.slane %v2220_v28, 2 }
  0x1b   : > { %1861 = vmatprep.subr.mxu1 %v214_v23  ;;  %1834 = vmatpush3.msra.mxu0 %v1535_v20  ;;  %v2347_v8 = vld [vmem:[%s2173_s14 + $0x90] sm:$0xff]  ;;  %v213_v9 = vld [vmem:[%s2173_s14 + $0x98] sm:$0x3]  ;;  %v2354_v19 = vsel %vm238_vm0, %v260_v3, %v261_v4  ;;  %v516_v20 = vrot.slane %v2179_v11, 2  ;;  %v1559_v30 = vld [vmem:[%s2690_s1 + $0x80] sm:$0xff]  ;;  %v534_v58 = vrot.slane %v2279_v48, 2 }
  0x1c   : > { %1835 = vmatprep.mubr.msk.f32.mxu0 %vm272_vm1, %v241_v26  ;;  %1862 = vmatpush3.msra.mxu1 %v214_v23  ;;  %v2334_v5 = vsel %vm238_vm0, %v804_v57, %v805_v63  ;;  %v1184_v10 = vrot.slane %v2347_v8, 1  ;;  %v1311_v13 = vrot.slane %v2347_v8, 2  ;;  %v1185_v16 = vrot.slane %v213_v9, 1  ;;  %v1575_v31 = vld [vmem:[%s2690_s1 + $0xc0] sm:$0xff]  ;;  %v1598_v35 = vld [vmem:[%s2690_s1 + $0x138] sm:$0xff]  ;;  %v1613_v45 = vld [vmem:[%s2690_s1 + $0x170] sm:$0xff] }
  0x1d   : > { %1863 = vmatprep.mubr.msk.f32.mxu1 %vm272_vm1, %v2179_v11  ;;  %1836 = vmatmul.mubr.msk.f32.vlgmr.msra.gmra.mxu0 %vm272_vm1, %v2223_v29  ;;  %v1312_v17 = vrot.slane %v213_v9, 2  ;;  %v1576_v11 = vld [vmem:[%s2690_s1 + $0xc8] sm:$0xff]  ;;  %v520_v23 = vrot.slane %v2191_v15, 2  ;;  %v519_v26 = vrot.slane %v2188_v14, 2  ;;  %v518_v15 = vsel %vm515_vm2, %v516_v20, %v517_v18  ;;  %v1614_v36 = vld [vmem:[%s2690_s1 + $0x178] sm:$0xff]  ;;  %v1611_v56 = vld [vmem:[%s2690_s1 + $0x160] sm:$0xff] }
  0x1e   : > { %1864 = vmatmul.mubr.msk.f32.vlgmr.msra.gmra.mxu1 %vm272_vm1, %v2188_v14  ;;  %1875 = vmatprep.subr.mxu0 %v1566_v32  ;;  %v2358_v21 = vsel %vm238_vm0, %v1184_v10, %v1185_v16  ;;  %v1596_v49 = vld [vmem:[%s2690_s1 + $0x128] sm:$0xff]  ;;  %v535_v63 = vrot.slane %v2284_v51, 2  ;;  %v538_v51 = vrot.slane %v2309_v60, 2  ;;  %v1593_v3 = vld [vmem:[%s2690_s1 + $0x110] sm:$0xff]  ;;  %v1607_v16 = vld [vmem:[%s2690_s1 + $0x140] sm:$0xff] }
  0x1f   : > { %1903 = vmatprep.subr.mxu1 %v1582_v33  ;;  %1876 = vmatpush3.msra.mxu0 %v1566_v32  ;;  %v2361_v22 = vsel %vm515_vm2, %v1311_v13, %v1312_v17  ;;  %v2387_v32 = vsel %vm515_vm2, %v519_v26, %v520_v23  ;;  %v1612_v50 = vld [vmem:[%s2690_s1 + $0x168] sm:$0xff]  ;;  %v1609_v4 = vld [vmem:[%s2690_s1 + $0x150] sm:$0xff]  ;;  %v1591_v13 = vld [vmem:[%s2690_s1 + $0x100] sm:$0xff] }
  0x20   : > { %1904 = vmatpush3.msra.mxu1 %v1582_v33  ;;  %1877 = vmatprep.subr.mxu0 %v1565_v34  ;;  %v522_v33 = vrot.slane %v2210_v24, 2  ;;  %v1592_v9 = vld [vmem:[%s2690_s1 + $0x108] sm:$0xff]  ;;  %v1630_v17 = vld [vmem:[%s2690_s1 + $0x1b8] sm:$0xff]  ;;  %v1645_v20 = vld [vmem:[%s2690_s1 + $0x1f0] sm:$0xff] }
  0x21   : > { %1905 = vmatprep.subr.mxu1 %v1581_v37  ;;  %1838 = vmatprep.mubr.msk.f32.mxu0 %vm272_vm1, %v2255_v40  ;;  %v1608_v10 = vld [vmem:[%s2690_s1 + $0x148] sm:$0xff]  ;;  %v1646_v18 = vld [vmem:[%s2690_s1 + $0x1f8] sm:$0xff]  ;;  %v1627_v23 = vld [vmem:[%s2690_s1 + $0x1a0] sm:$0xff] }
  0x22   : > { %1866 = vmatprep.mubr.msk.f32.mxu1 %vm272_vm1, %v2210_v24  ;;  %1878 = vmatpush3.msra.mxu0 %v1565_v34  ;;  %v523_v34 = vrot.slane %v2213_v25, 2  ;;  %v1597_v25 = vld [vmem:[%s2690_s1 + $0x130] sm:$0xff]  ;;  %v1643_v26 = vld [vmem:[%s2690_s1 + $0x1e0] sm:$0xff] }
  0x23   : > { %1906 = vmatpush3.msra.mxu1 %v1581_v37  ;;  %1839 = vmatmul.mubr.msk.f32.gmra.mxu0 %vm272_vm1, %v2264_v43  ;;  %v525_v37 = vrot.slane %v2217_v27, 2 }
  0x24   : > { %1867 = vmatmul.mubr.msk.f32.gmra.mxu1 %vm272_vm1, %v2217_v27  ;;  %1879 = vmatprep.subr.mxu0 %v1564_v46 }
  0x25   : > { %1907 = vmatprep.subr.mxu1 %v1580_v47  ;;  %1880 = vmatpush3.msra.mxu0 %v1564_v46  ;;  %v2416_v28 = vsel %vm515_vm2, %v525_v37, %v526_v44  ;;  %v528_v46 = vrot.slane %v2249_v38, 2  ;;  %v1623_v37 = vld [vmem:[%s2690_s1 + $0x180] sm:$0xff] }
  0x26   : > { %1908 = vmatpush3.msra.mxu1 %v1580_v47  ;;  %1881 = vmatprep.subr.mxu0 %v1563_v52  ;;  %v529_v47 = vrot.slane %v2252_v39, 2  ;;  %v532_v39 = vrot.slane %v2261_v42, 2  ;;  %v1639_v44 = vld [vmem:[%s2690_s1 + $0x1c0] sm:$0xff] }
  0x27   : > { %1909 = vmatprep.subr.mxu1 %v1579_v53  ;;  %1841 = vmatprep.mubr.msk.f32.mxu0 %vm272_vm1, %v2300_v55 }
  0x28   : > { %1869 = vmatprep.mubr.msk.f32.mxu1 %vm272_vm1, %v2249_v38  ;;  %1882 = vmatpush3.msra.mxu0 %v1563_v52  ;;  %v531_v52 = vrot.slane %v2258_v41, 2  ;;  %v2443_v57 = vsel %vm515_vm2, %v528_v46, %v529_v47 }
  0x29   : > { %1910 = vmatpush3.msra.mxu1 %v1579_v53  ;;  %1842 = vmatmul.mubr.msk.f32.gmra.mxu0 %vm272_vm1, %v2315_v62  ;;  %v1595_v53 = vld [vmem:[%s2690_s1 + $0x120] sm:$0xff] }
  0x2a   : > { %1870 = vmatmul.mubr.msk.f32.gmra.mxu1 %vm272_vm1, %v2258_v41  ;;  %1883 = vmatprep.subr.mxu0 %v1562_v0  ;;  %v2446_v42 = vsel %vm515_vm2, %v531_v52, %v532_v39 }
  0x2b   : > { %1911 = vmatprep.subr.mxu1 %v1578_v1  ;;  %1884 = vmatpush3.msra.mxu0 %v1562_v0  ;;  %v1594_v0 = vld [vmem:[%s2690_s1 + $0x118] sm:$0xff] }
  0x2c   : > { %1912 = vmatpush3.msra.mxu1 %v1578_v1  ;;  %1885 = vmatprep.subr.mxu0 %v1561_v2  ;;  %v1610_v1 = vld [vmem:[%s2690_s1 + $0x158] sm:$0xff] }
  0x2d   : > { %1913 = vmatprep.subr.mxu1 %v1577_v6  ;;  %1844 = vmatprep.mubr.msk.f32.mxu0 %vm272_vm1, %v2344_v7 }
  0x2e   : > { %1872 = vmatprep.mubr.msk.f32.mxu1 %vm272_vm1, %v2279_v48  ;;  %1886 = vmatpush3.msra.mxu0 %v1561_v2  ;;  %v537_v2 = vrot.slane %v2306_v59, 2 }
  0x2f   : > { %1914 = vmatpush3.msra.mxu1 %v1577_v6  ;;  %1845 = vmatmul.mubr.msk.f32.gmra.mxu0 %vm272_vm1, %v2354_v19  ;;  %v2473_v6 = vsel %vm515_vm2, %v534_v58, %v535_v63 }
  0x30   : > { %1873 = vmatmul.mubr.msk.f32.gmra.mxu1 %vm272_vm1, %v2306_v59  ;;  %1887 = vmatprep.subr.mxu0 %v1560_v12  ;;  %v2476_v60 = vsel %vm515_vm2, %v537_v2, %v538_v51 }
  0x31   : > { %1915 = vmatprep.subr.mxu1 %v1576_v11  ;;  %1888 = vmatpush3.msra.mxu0 %v1560_v12  ;;  %v1628_v12 = vld [vmem:[%s2690_s1 + $0x1a8] sm:$0xff] }
  0x32   : > { %1916 = vmatpush3.msra.mxu1 %v1576_v11  ;;  %1889 = vmatprep.subr.mxu0 %v1559_v30  ;;  %v1644_v11 = vld [vmem:[%s2690_s1 + $0x1e8] sm:$0xff] }
  0x33   : > { %1917 = vmatprep.subr.mxu1 %v1575_v31  ;;  %1890 = vmatpush3.msra.mxu0 %v1559_v30  ;;  %v1626_v30 = vld [vmem:[%s2690_s1 + $0x198] sm:$0xff] }
  0x34   : > { %1891 = vmatprep.mubr.msk.f32.mxu0 %vm272_vm1, %v518_v15  ;;  %1918 = vmatpush3.msra.mxu1 %v1575_v31  ;;  %v1642_v31 = vld [vmem:[%s2690_s1 + $0x1d8] sm:$0xff]  ;;  %v931_v15 = vrot.slane %v2297_v54, 2 }
  0x35   : > { %1919 = vmatprep.mubr.msk.f32.mxu1 %vm272_vm1, %v2188_v14  ;;  %1892 = vmatmul.mubr.msk.f32.vlgmr.msra.gmra.mxu0 %vm272_vm1, %v2387_v32  ;;  %v2413_v14 = vsel %vm515_vm2, %v522_v33, %v523_v34  ;;  %v1625_v33 = vld [vmem:[%s2690_s1 + $0x190] sm:$0xff] }
  0x36   : > { %1920 = vmatmul.mubr.msk.f32.vlgmr.msra.gmra.mxu1 %vm272_vm1, %v2210_v24  ;;  %1931 = vmatprep.subr.mxu0 %v1598_v35  ;;  %v1641_v34 = vld [vmem:[%s2690_s1 + $0x1d0] sm:$0xff] }
  0x37   : > { %1959 = vmatprep.subr.mxu1 %v1614_v36  ;;  %1932 = vmatpush3.msra.mxu0 %v1598_v35  ;;  %v1624_v35 = vld [vmem:[%s2690_s1 + $0x188] sm:$0xff] }
  0x38   : > { %1960 = vmatpush3.msra.mxu1 %v1614_v36  ;;  %1933 = vmatprep.subr.mxu0 %v1597_v25  ;;  %v1640_v36 = vld [vmem:[%s2690_s1 + $0x1c8] sm:$0xff] }
  0x39   : > { %1961 = vmatprep.subr.mxu1 %v1613_v45  ;;  %1894 = vmatprep.mubr.msk.f32.mxu0 %vm272_vm1, %v2413_v14 }
  0x3a   : > { %1922 = vmatprep.mubr.msk.f32.mxu1 %vm272_vm1, %v2217_v27  ;;  %1934 = vmatpush3.msra.mxu0 %v1597_v25  ;;  %v1662_v25 = vld [vmem:[%s2690_s1 + $0x238] sm:$0xff] }
  0x3b   : > { %1962 = vmatpush3.msra.mxu1 %v1613_v45  ;;  %1895 = vmatmul.mubr.msk.f32.gmra.mxu0 %vm272_vm1, %v2416_v28  ;;  %v1661_v45 = vld [vmem:[%s2690_s1 + $0x230] sm:$0xff] }
  0x3c   : > { %1923 = vmatmul.mubr.msk.f32.gmra.mxu1 %vm272_vm1, %v2249_v38  ;;  %1935 = vmatprep.subr.mxu0 %v1596_v49 }
  0x3d   : > { %1963 = vmatprep.subr.mxu1 %v1612_v50  ;;  %1936 = vmatpush3.msra.mxu0 %v1596_v49 }
  0x3e   : > { %1964 = vmatpush3.msra.mxu1 %v1612_v50  ;;  %1937 = vmatprep.subr.mxu0 %v1595_v53 }
  0x3f   : > { %1965 = vmatprep.subr.mxu1 %v1611_v56  ;;  %1897 = vmatprep.mubr.msk.f32.mxu0 %vm272_vm1, %v2443_v57 }
  0x40   : > { %1925 = vmatprep.mubr.msk.f32.mxu1 %vm272_vm1, %v2258_v41  ;;  %1938 = vmatpush3.msra.mxu0 %v1595_v53 }
  0x41   : > { %1966 = vmatpush3.msra.mxu1 %v1611_v56  ;;  %1898 = vmatmul.mubr.msk.f32.gmra.mxu0 %vm272_vm1, %v2446_v42 }
  0x42   : > { %1926 = vmatmul.mubr.msk.f32.gmra.mxu1 %vm272_vm1, %v2279_v48  ;;  %1939 = vmatprep.subr.mxu0 %v1594_v0 }
  0x43   : > { %1967 = vmatprep.subr.mxu1 %v1610_v1  ;;  %1940 = vmatpush3.msra.mxu0 %v1594_v0 }
  0x44   : > { %1968 = vmatpush3.msra.mxu1 %v1610_v1  ;;  %1941 = vmatprep.subr.mxu0 %v1593_v3 }
  0x45   : > { %1969 = vmatprep.subr.mxu1 %v1609_v4  ;;  %1900 = vmatprep.mubr.msk.f32.mxu0 %vm272_vm1, %v2473_v6 }
  0x46   : > { %1928 = vmatprep.mubr.msk.f32.mxu1 %vm272_vm1, %v2306_v59  ;;  %1942 = vmatpush3.msra.mxu0 %v1593_v3 }
  0x47   : > { %1970 = vmatpush3.msra.mxu1 %v1609_v4  ;;  %1901 = vmatmul.mubr.msk.f32.gmra.mxu0 %vm272_vm1, %v2476_v60 }
  0x48   : > { %1929 = vmatmul.mubr.msk.f32.gmra.mxu1 %vm272_vm1, %v2297_v54  ;;  %1943 = vmatprep.subr.mxu0 %v1592_v9 }
  0x49   : > { %1971 = vmatprep.subr.mxu1 %v1608_v10  ;;  %1944 = vmatpush3.msra.mxu0 %v1592_v9 }
  0x4a   : > { %1972 = vmatpush3.msra.mxu1 %v1608_v10  ;;  %1945 = vmatprep.subr.mxu0 %v1591_v13 }
  0x4b   : > { %1973 = vmatprep.subr.mxu1 %v1607_v16  ;;  %1946 = vmatpush3.msra.mxu0 %v1591_v13 }
  0x4c   : > { %1947 = vmatprep.mubr.msk.f32.mxu0 %vm272_vm1, %v2223_v29  ;;  %1974 = vmatpush3.msra.mxu1 %v1607_v16  ;;  %v1629_v29 = vld [vmem:[%s2690_s1 + $0x1b0] sm:$0xff] }
  0x4d   : > { %1975 = vmatprep.mubr.msk.f32.mxu1 %vm272_vm1, %v2387_v32  ;;  %1948 = vmatmul.mubr.msk.f32.vlgmr.msra.gmra.mxu0 %vm272_vm1, %v2255_v40  ;;  %v932_v32 = vrot.slane %v2312_v61, 2 }
  0x4e   : > { %1976 = vmatmul.mubr.msk.f32.vlgmr.msra.gmra.mxu1 %vm272_vm1, %v2413_v14  ;;  %1987 = vmatprep.subr.mxu0 %v1630_v17 }
  0x4f   : > { %2015 = vmatprep.subr.mxu1 %v1646_v18  ;;  %1988 = vmatpush3.msra.mxu0 %v1630_v17  ;;  %v2561_v61 = vsel %vm515_vm2, %v931_v15, %v932_v32 }
  0x50   : > { %2016 = vmatpush3.msra.mxu1 %v1646_v18  ;;  %1989 = vmatprep.subr.mxu0 %v1629_v29 }
  0x51   : > { %2017 = vmatprep.subr.mxu1 %v1645_v20  ;;  %1950 = vmatprep.mubr.msk.f32.mxu0 %vm272_vm1, %v2264_v43 }
  0x52   : > { %1978 = vmatprep.mubr.msk.f32.mxu1 %vm272_vm1, %v2416_v28  ;;  %1990 = vmatpush3.msra.mxu0 %v1629_v29 }
  0x53   : > { %2018 = vmatpush3.msra.mxu1 %v1645_v20  ;;  %1951 = vmatmul.mubr.msk.f32.gmra.mxu0 %vm272_vm1, %v2300_v55 }
  0x54   : > { %1979 = vmatmul.mubr.msk.f32.gmra.mxu1 %vm272_vm1, %v2443_v57  ;;  %1991 = vmatprep.subr.mxu0 %v1628_v12 }
  0x55   : > { %2019 = vmatprep.subr.mxu1 %v1644_v11  ;;  %1992 = vmatpush3.msra.mxu0 %v1628_v12 }
  0x56   : > { %2020 = vmatpush3.msra.mxu1 %v1644_v11  ;;  %1993 = vmatprep.subr.mxu0 %v1627_v23 }
  0x57   : > { %2021 = vmatprep.subr.mxu1 %v1643_v26  ;;  %1953 = vmatprep.mubr.msk.f32.mxu0 %vm272_vm1, %v2315_v62 }
  0x58   : > { %1981 = vmatprep.mubr.msk.f32.mxu1 %vm272_vm1, %v2446_v42  ;;  %1994 = vmatpush3.msra.mxu0 %v1627_v23 }
  0x59   : > { %2022 = vmatpush3.msra.mxu1 %v1643_v26  ;;  %1954 = vmatmul.mubr.msk.f32.gmra.mxu0 %vm272_vm1, %v2344_v7 }
  0x5a   : > { %1982 = vmatmul.mubr.msk.f32.gmra.mxu1 %vm272_vm1, %v2473_v6  ;;  %1995 = vmatprep.subr.mxu0 %v1626_v30 }
  0x5b   : > { %2023 = vmatprep.subr.mxu1 %v1642_v31  ;;  %1996 = vmatpush3.msra.mxu0 %v1626_v30 }
  0x5c   : > { %2024 = vmatpush3.msra.mxu1 %v1642_v31  ;;  %1997 = vmatprep.subr.mxu0 %v1625_v33 }
  0x5d   : > { %2025 = vmatprep.subr.mxu1 %v1641_v34  ;;  %1956 = vmatprep.mubr.msk.f32.mxu0 %vm272_vm1, %v2354_v19 }
  0x5e   : > { %1984 = vmatprep.mubr.msk.f32.mxu1 %vm272_vm1, %v2476_v60  ;;  %1998 = vmatpush3.msra.mxu0 %v1625_v33 }
  0x5f   : > { %2026 = vmatpush3.msra.mxu1 %v1641_v34  ;;  %1957 = vmatmul.mubr.msk.f32.gmra.mxu0 %vm272_vm1, %v2334_v5 }
  0x60   : > { %1985 = vmatmul.mubr.msk.f32.gmra.mxu1 %vm272_vm1, %v2561_v61  ;;  %1999 = vmatprep.subr.mxu0 %v1624_v35 }
  0x61   : > { %2027 = vmatprep.subr.mxu1 %v1640_v36  ;;  %2000 = vmatpush3.msra.mxu0 %v1624_v35 }
  0x62   : > { %2028 = vmatpush3.msra.mxu1 %v1640_v36  ;;  %2001 = vmatprep.subr.mxu0 %v1623_v37 }
  0x63   : > { %2029 = vmatprep.subr.mxu1 %v1639_v44  ;;  %2002 = vmatpush3.msra.mxu0 %v1623_v37 }
  0x64   : > { %2003 = vmatprep.mubr.msk.f32.mxu0 %vm272_vm1, %v2210_v24  ;;  %2030 = vmatpush3.msra.mxu1 %v1639_v44  ;;  %v1660_v24 = vld [vmem:[%s2690_s1 + $0x228] sm:$0xff] }
  0x65   : > { %2031 = vmatprep.mubr.msk.f32.mxu1 %vm272_vm1, %v2255_v40  ;;  %2004 = vmatmul.mubr.msk.f32.vlgmr.msra.gmra.mxu0 %vm272_vm1, %v2217_v27  ;;  %v1659_v27 = vld [vmem:[%s2690_s1 + $0x220] sm:$0xff]  ;;  %v1657_v40 = vld [vmem:[%s2690_s1 + $0x210] sm:$0xff] }
  0x66   : > { %2032 = vmatmul.mubr.msk.f32.vlgmr.msra.gmra.mxu1 %vm272_vm1, %v2264_v43  ;;  %2043 = vmatprep.subr.mxu0 %v1662_v25  ;;  %v1655_v43 = vld [vmem:[%s2690_s1 + $0x200] sm:$0xff] }
  0x67   : > { %2071 = vmatprep.subr.mxu1 %v1662_v25  ;;  %2044 = vmatpush3.msra.mxu0 %v1662_v25 }
  0x68   : > { %2079 = vmatpush3.msra.mxu1 %v1662_v25  ;;  %2045 = vmatprep.subr.mxu0 %v1661_v45 }
  0x69   : > { %2072 = vmatprep.subr.mxu1 %v1661_v45  ;;  %2006 = vmatprep.mubr.msk.f32.mxu0 %vm272_vm1, %v2249_v38  ;;  %v1658_v38 = vld [vmem:[%s2690_s1 + $0x218] sm:$0xff] }
  0x6a   : > { %2034 = vmatprep.mubr.msk.f32.mxu1 %vm272_vm1, %v2300_v55  ;;  %2046 = vmatpush3.msra.mxu0 %v1661_v45 }
  0x6b   : > { %2080 = vmatpush3.msra.mxu1 %v1661_v45  ;;  %2007 = vmatmul.mubr.msk.f32.gmra.mxu0 %vm272_vm1, %v2258_v41  ;;  %v1656_v41 = vld [vmem:[%s2690_s1 + $0x208] sm:$0xff] }
  0x6c   : > { %2035 = vmatmul.mubr.msk.f32.gmra.mxu1 %vm272_vm1, %v2315_v62  ;;  %2047 = vmatprep.subr.mxu0 %v1660_v24 }
  0x6d   : > { %2073 = vmatprep.subr.mxu1 %v1660_v24  ;;  %2048 = vmatpush3.msra.mxu0 %v1660_v24 }
  0x6e   : > { %2081 = vmatpush3.msra.mxu1 %v1660_v24  ;;  %2049 = vmatprep.subr.mxu0 %v1659_v27 }
  0x6f   : > { %2074 = vmatprep.subr.mxu1 %v1659_v27  ;;  %2009 = vmatprep.mubr.msk.f32.mxu0 %vm272_vm1, %v2279_v48 }
  0x70   : > { %2037 = vmatprep.mubr.msk.f32.mxu1 %vm272_vm1, %v2344_v7  ;;  %2050 = vmatpush3.msra.mxu0 %v1659_v27 }
  0x71   : > { %2082 = vmatpush3.msra.mxu1 %v1659_v27  ;;  %2010 = vmatmul.mubr.msk.f32.gmra.mxu0 %vm272_vm1, %v2306_v59 }
  0x72   : > { %2038 = vmatmul.mubr.msk.f32.gmra.mxu1 %vm272_vm1, %v2354_v19  ;;  %2051 = vmatprep.subr.mxu0 %v1658_v38 }
  0x73   : > { %2075 = vmatprep.subr.mxu1 %v1658_v38  ;;  %2052 = vmatpush3.msra.mxu0 %v1658_v38 }
  0x74   : > { %2083 = vmatpush3.msra.mxu1 %v1658_v38  ;;  %2053 = vmatprep.subr.mxu0 %v1657_v40 }
  0x75   : > { %2076 = vmatprep.subr.mxu1 %v1657_v40  ;;  %2012 = vmatprep.mubr.msk.f32.mxu0 %vm272_vm1, %v2297_v54 }
  0x76   : > { %2040 = vmatprep.mubr.msk.f32.mxu1 %vm272_vm1, %v2334_v5  ;;  %2054 = vmatpush3.msra.mxu0 %v1657_v40 }
  0x77   : > { %2084 = vmatpush3.msra.mxu1 %v1657_v40  ;;  %2013 = vmatmul.mubr.msk.f32.gmra.mxu0 %vm272_vm1, %v2347_v8 }
  0x78   : > { %2041 = vmatmul.mubr.msk.f32.gmra.mxu1 %vm272_vm1, %v2358_v21  ;;  %2055 = vmatprep.subr.mxu0 %v1656_v41 }
  0x79   : > { %2077 = vmatprep.subr.mxu1 %v1656_v41  ;;  %2056 = vmatpush3.msra.mxu0 %v1656_v41 }
  0x7a   : > { %2085 = vmatpush3.msra.mxu1 %v1656_v41  ;;  %2057 = vmatprep.subr.mxu0 %v1655_v43 }
  0x7b   : > { %2078 = vmatprep.subr.mxu1 %v1655_v43  ;;  %2058 = vmatpush3.msra.mxu0 %v1655_v43 }
  0x7c   : > { %2086 = vmatpush3.msra.mxu1 %v1655_v43  ;;  %2059 = vmatprep.mubr.msk.f32.mxu0 %vm272_vm1, %v2413_v14 }
  0x7d   : > { %2065 = vmatprep.mubr.msk.f32.mxu1 %vm272_vm1, %v2473_v6  ;;  %2060 = vmatmul.mubr.msk.f32.vlgmr.msra.gmra.mxu0 %vm272_vm1, %v2416_v28 }
  0x7e   : > { %2066 = vmatmul.mubr.msk.f32.vlgmr.msra.gmra.mxu1 %vm272_vm1, %v2476_v60  ;;  %2062 = vmatprep.mubr.msk.f32.mxu0 %vm272_vm1, %v2443_v57 }
  0x7f   : > { %2068 = vmatprep.mubr.msk.f32.mxu1 %vm272_vm1, %v2561_v61 }
  0x81   : > { %2063 = vmatmul.mubr.msk.f32.gmra.mxu0 %vm272_vm1, %v2446_v42 }
  0x82   : > { %2069 = vmatmul.mubr.msk.f32.gmra.mxu1 %vm272_vm1, %v2361_v22 }
  0xdd   : > { %v1837_v48 = vpop.f32.mrf.mxu0 }
  0xde   : > { %v1865_v54 = vpop.f32.mrf.mxu1 }
  0xdf   : > { %v355_v55 = vpop.f32.mrf.mxu0  ;;  %v482_v35 = vadd.f32 %v1865_v54, %v1837_v48 }
  0xe0   : > { %v476_v59 = vpop.f32.mrf.mxu1 }
  0xe1   : > { %v477_v25 = vadd.f32 %v476_v59, %v355_v55 }
  0xe3   : > { %v1840_v62 = vpop.f32.mrf.mxu0 }
  0xe4   : > { %v1868_v5 = vpop.f32.mrf.mxu1 }
  0xe5   : > { %v365_v7 = vpop.f32.mrf.mxu0 }
  0xe6   : > { %v486_v8 = vpop.f32.mrf.mxu1 }
  0xe9   : > { %v1843_v19 = vpop.f32.mrf.mxu0 }
  0xea   : > { %v1871_v21 = vpop.f32.mrf.mxu1 }
  0xeb   : > { %v375_v14 = vpop.f32.mrf.mxu0  ;;  %v502_v36 = vadd.f32 %v1871_v21, %v1843_v19 }
  0xec   : > { %v496_v28 = vpop.f32.mrf.mxu1 }
  0xed   : > { %v497_v45 = vadd.f32 %v496_v28, %v375_v14 }
  0xef   : > { %v1846_v46 = vpop.f32.mrf.mxu0 }
  0xf0   : > { %v1874_v47 = vpop.f32.mrf.mxu1 }
  0xf1   : > { %v385_v49 = vpop.f32.mrf.mxu0 }
  0xf2   : > { %v506_v50 = vpop.f32.mrf.mxu1 }
  0xf5   : > { %v1893_v52 = vpop.f32.mrf.mxu0 }
  0xf6   : > { %v1921_v39 = vpop.f32.mrf.mxu1  ;;  %v671_v24 = vadd.f32 %v1893_v52, %v482_v35 }
  0xf7   : > { %v631_v53 = vpop.f32.mrf.mxu0 }
  0xf8   : > { %v756_v22 = vpop.f32.mrf.mxu1  ;;  %v670_v41 = vadd.f32 %v631_v53, %v477_v25 }
  0xfa   : > { %v795_v55 = vadd.f32 %v756_v22, %v670_v41 }
  0xfb   : > { %v1896_v56 = vpop.f32.mrf.mxu0 }
  0xfc   : > { %v2655_v57 = vpop.f32.mrf.mxu1 }
  0xfd   : > { %2694 = vst [vmem:[#allocation2_spill] sm:$0xff] %v2655_v57  ;;  %v641_v42 = vpop.f32.mrf.mxu0  ;;  %v796_v57 = vadd.f32 %v1921_v39, %v671_v24 }
  0xfe   : > { %v2657_v58 = vpop.f32.mrf.mxu1 }
  0xff   : > { %2695 = vst [vmem:[#allocation3_spill] sm:$0xff] %v2657_v58  ;;  %v487_v58 = vadd.f32 %v486_v8, %v365_v7 }
 0x101   : > { %v1899_v63 = vpop.f32.mrf.mxu0  ;;  %v672_v59 = vadd.f32 %v641_v42, %v487_v58 }
 0x102   : > { %v1927_v0 = vpop.f32.mrf.mxu1  ;;  %v675_v27 = vadd.f32 %v1899_v63, %v502_v36 }
 0x103   : > { %v651_v1 = vpop.f32.mrf.mxu0 }
 0x104   : > { %v776_v2 = vpop.f32.mrf.mxu1  ;;  %v674_v43 = vadd.f32 %v651_v1, %v497_v45  ;;  %v800_v54 = vadd.f32 %v1927_v0, %v675_v27 }
 0x106   : > { %v799_v14 = vadd.f32 %v776_v2, %v674_v43  ;;  %v2701_v8 = vld [vmem:[#allocation3_spill] sm:$0xff] }
 0x107   : > { %v1902_v51 = vpop.f32.mrf.mxu0 }
 0x108   : > { %v1930_v3 = vpop.f32.mrf.mxu1 }
 0x109   : > { %v661_v4 = vpop.f32.mrf.mxu0 }
 0x10a   : > { %v786_v6 = vpop.f32.mrf.mxu1 }
 0x10d   : > { %v1949_v60 = vpop.f32.mrf.mxu0 }
 0x10e   : > { %v1977_v9 = vpop.f32.mrf.mxu1  ;;  %v924_v28 = vadd.f32 %v1949_v60, %v796_v57 }
 0x10f   : > { %v884_v10 = vpop.f32.mrf.mxu0 }
 0x110   : > { %v1011_v13 = vpop.f32.mrf.mxu1  ;;  %v923_v53 = vadd.f32 %v884_v10, %v795_v55 }
 0x112   : > { %v1050_v58 = vadd.f32 %v1011_v13, %v923_v53 }
 0x113   : > { %v1952_v16 = vpop.f32.mrf.mxu0 }
 0x114   : > { %v2659_v17 = vpop.f32.mrf.mxu1 }
 0x115   : > { %2696 = vst [vmem:[#allocation4_spill] sm:$0xff] %v2659_v17  ;;  %v894_v18 = vpop.f32.mrf.mxu0  ;;  %v512_v17 = vadd.f32 %v1874_v47, %v1846_v46  ;;  %v797_v46 = vadd.f32 %v2701_v8, %v672_v59  ;;  %v1051_v47 = vadd.f32 %v1977_v9, %v924_v28  ;;  %v1672_v28 = vld [vmem:[%s2692_s3] ss:$0 sm:$0xff] }
 0x116   : > { %v2661_v29 = vpop.f32.mrf.mxu1 }
 0x117   : > { %2697 = vst [vmem:[#allocation5_spill] sm:$0xff] %v2661_v29  ;;  %v492_v29 = vadd.f32 %v1868_v5, %v1840_v62  ;;  %v677_v19 = vadd.f32 %v1902_v51, %v512_v17  ;;  %v2700_v62 = vld [vmem:[#allocation2_spill] sm:$0xff]  ;;  %v925_v57 = vadd.f32 %v894_v18, %v797_v46 }
 0x119   : > { %v1955_v20 = vpop.f32.mrf.mxu0  ;;  %v673_v48 = vadd.f32 %v1896_v56, %v492_v29  ;;  %v802_v7 = vadd.f32 %v1930_v3, %v677_v19 }
 0x11a   : > { %v1983_v12 = vpop.f32.mrf.mxu1  ;;  %v928_v63 = vadd.f32 %v1955_v20, %v800_v54 }
 0x11b   : > { %v904_v11 = vpop.f32.mrf.mxu0  ;;  %v798_v5 = vadd.f32 %v2700_v62, %v673_v48 }
 0x11c   : > { %v1031_v23 = vpop.f32.mrf.mxu1  ;;  %v927_v1 = vadd.f32 %v904_v11, %v799_v14  ;;  %v1055_v39 = vadd.f32 %v1983_v12, %v928_v63  ;;  %v2702_v3 = vld [vmem:[#allocation4_spill] sm:$0xff] }
 0x11e   : > { %v1054_v0 = vadd.f32 %v1031_v23, %v927_v1  ;;  %v2703_v9 = vld [vmem:[#allocation5_spill] sm:$0xff] }
 0x11f   : > { %v1958_v26 = vpop.f32.mrf.mxu0 }
 0x120   : > { %v1986_v30 = vpop.f32.mrf.mxu1  ;;  %v930_v56 = vadd.f32 %v1958_v26, %v802_v7 }
 0x121   : > { %v914_v31 = vpop.f32.mrf.mxu0 }
 0x122   : > { %v1041_v15 = vpop.f32.mrf.mxu1  ;;  %v1057_v11 = vadd.f32 %v1986_v30, %v930_v56 }
 0x125   : > { %v2005_v32 = vpop.f32.mrf.mxu0 }
 0x126   : > { %v2033_v33 = vpop.f32.mrf.mxu1  ;;  %v1176_v2 = vadd.f32 %v2005_v32, %v1051_v47 }
 0x127   : > { %v1136_v34 = vpop.f32.mrf.mxu0 }
 0x128   : > { %v2663_v61 = vpop.f32.mrf.mxu1  ;;  %v1175_v17 = vadd.f32 %v1136_v34, %v1050_v58  ;;  %v1671_v34 = vld [vmem:[%s2691_s2] ss:$0 sm:$0xff] }
 0x129   : > { %2698 = vst [vmem:[#allocation6_spill] sm:$0xff] %v2663_v61  ;;  %v507_v61 = vadd.f32 %v506_v50, %v385_v49  ;;  %v926_v50 = vadd.f32 %v1952_v16, %v798_v5  ;;  %v1304_v16 = vadd.f32 %v2033_v33, %v1176_v2 }
 0x12b   : > { %v2008_v37 = vpop.f32.mrf.mxu0  ;;  %v676_v52 = vadd.f32 %v661_v4, %v507_v61  ;;  %v1053_v20 = vadd.f32 %v2702_v3, %v926_v50 }
 0x12c   : > { %v2665_v44 = vpop.f32.mrf.mxu1 }
 0x12d   : > { %2699 = vst [vmem:[#allocation7_spill] sm:$0xff] %v2665_v44  ;;  %v1146_v38 = vpop.f32.mrf.mxu0  ;;  %v801_v49 = vadd.f32 %v786_v6, %v676_v52  ;;  %v1052_v6 = vadd.f32 %v2703_v9, %v925_v57  ;;  %v1178_v26 = vadd.f32 %v2008_v37, %v1053_v20 }
 0x12e   : > { %v2667_v40 = vpop.f32.mrf.mxu1 }
 0x12f   : > { %v929_v51 = vadd.f32 %v914_v31, %v801_v49  ;;  %v1177_v31 = vadd.f32 %v1146_v38, %v1052_v6 }
 0x130   : > { %v2704_v23 = vld [vmem:[#allocation6_spill] sm:$0xff] }
 0x131   : > { %v2011_v21 = vpop.f32.mrf.mxu0  ;;  %v1056_v12 = vadd.f32 %v1041_v15, %v929_v51  ;;  %v1303_v32 = vadd.f32 %v2704_v23, %v1175_v17 }
 0x132   : > { %v2039_v44 = vpop.f32.mrf.mxu1  ;;  %v1180_v4 = vadd.f32 %v2011_v21, %v1055_v39  ;;  %v1305_v21 = vadd.f32 %v2667_v40, %v1177_v31 }
 0x133   : > { %v1156_v35 = vpop.f32.mrf.mxu0 }
 0x134   : > { %v1284_v36 = vpop.f32.mrf.mxu1  ;;  %v1179_v29 = vadd.f32 %v1156_v35, %v1054_v0  ;;  %v1308_v61 = vadd.f32 %v2039_v44, %v1180_v4  ;;  %v2705_v37 = vld [vmem:[#allocation7_spill] sm:$0xff] }
 0x135   : > { %v1306_v44 = vadd.f32 %v2705_v37, %v1178_v26 }
 0x136   : > { %v1307_v45 = vadd.f32 %v1284_v36, %v1179_v29 }
 0x137   : > { %v2014_v22 = vpop.f32.mrf.mxu0 }
 0x138   : > { %v2042_v42 = vpop.f32.mrf.mxu1  ;;  %v1182_v25 = vadd.f32 %v2014_v22, %v1057_v11 }
 0x139   : > { %v1166_v60 = vpop.f32.mrf.mxu0 }
 0x13a   : > { %v1294_v10 = vpop.f32.mrf.mxu1  ;;  %v1181_v27 = vadd.f32 %v1166_v60, %v1056_v12  ;;  %v1310_v48 = vadd.f32 %v2042_v42, %v1182_v25 }
 0x13c   : > { %v1309_v14 = vadd.f32 %v1294_v10, %v1181_v27 }
 0x13d   : > { %v2061_v13 = vpop.f32.mrf.mxu0 }
 0x13e   : > { %v2067_v18 = vpop.f32.mrf.mxu1  ;;  %v1431_v24 = vadd.f32 %v2061_v13, %v1304_v16 }
 0x13f   : > { %v1435_v30 = vadd.f32 %v2067_v18, %v1308_v61  ;;  %v1391_v41 = vpop.f32.mrf.mxu0 }
 0x140   : > { %v1411_v43 = vpop.f32.mrf.mxu1  ;;  %v1430_v33 = vadd.f32 %v1391_v41, %v1303_v32  ;;  %v1446_v38 = vmul.f32 %v1671_v34, %v1431_v24 }
 0x141   : > { %v1434_v15 = vadd.f32 %v1411_v43, %v1307_v45  ;;  %v2064_v54 = vpop.f32.mrf.mxu0  ;;  %v1450_v52 = vmul.f32 %v1671_v34, %v1435_v30 }
 0x142   : > { %v2070_v19 = vpop.f32.mrf.mxu1  ;;  %v1445_v55 = vmul.f32 %v1671_v34, %v1430_v33  ;;  %v1433_v63 = vadd.f32 %v2064_v54, %v1306_v44  ;;  %v1461_v40 = vadd.f32 %v1672_v28, %v1446_v38 }
 0x143   : > { %v1449_v59 = vmul.f32 %v1671_v34, %v1434_v15  ;;  %v1437_v35 = vadd.f32 %v2070_v19, %v1310_v48  ;;  %v1401_v36 = vpop.f32.mrf.mxu0  ;;  %v1465_v49 = vadd.f32 %v1672_v28, %v1450_v52 }
 0x144   : > { %v1421_v53 = vpop.f32.mrf.mxu1  ;;  %v1460_v1 = vadd.f32 %v1672_v28, %v1445_v55  ;;  %v1432_v62 = vadd.f32 %v1401_v36, %v1305_v21  ;;  %v1448_v7 = vmul.f32 %v1671_v34, %v1433_v63 }
 0x145   : > { %v1464_v5 = vadd.f32 %v1672_v28, %v1449_v59  ;;  %v1452_v8 = vmul.f32 %v1671_v34, %v1437_v35  ;;  %v1436_v46 = vadd.f32 %v1421_v53, %v1309_v14  ;;  %v1469_v57 = vmax.f32 %v1461_v40, %v1465_v49 }
 0x146   : > { %v1447_v47 = vmul.f32 %v1671_v34, %v1432_v62  ;;  %v1463_v50 = vadd.f32 %v1672_v28, %v1448_v7 }
 0x147   : > { %v1467_v39 = vadd.f32 %v1672_v28, %v1452_v8  ;;  %v1451_v56 = vmul.f32 %v1671_v34, %v1436_v46  ;;  %v1468_v42 = vmax.f32 %v1460_v1, %v1464_v5 }
 0x148   : > { %v1462_v22 = vadd.f32 %v1672_v28, %v1447_v47 }
 0x149   : > { %v1466_v58 = vadd.f32 %v1672_v28, %v1451_v56  ;;  %v1471_v0 = vmax.f32 %v1463_v50, %v1467_v39  ;;  %v1472_v51 = vmax.f32 %v1468_v42, %v1469_v57 }
 0x14b   : > { %v1470_v2 = vmax.f32 %v1462_v22, %v1466_v58 }
 0x14d   : > { %v1473_v4 = vmax.f32 %v1470_v2, %v1471_v0 }
 0x14f   : > { %v1474_v60 = vmax.f32 %v1472_v51, %v1473_v4 }
 0x151   : > { %v1475_v10 = vrot.slane %v1474_v60, 4 }
 0x153   : > { %v1476_v17 = vmax.f32 %v1474_v60, %v1475_v10 }
 0x155   : > { %v1477_v29 = vrot.slane %v1476_v17, 2 }
 0x157   : > { %v1478_v3 = vmax.f32 %v1476_v17, %v1477_v29 }
 0x159   : > { %v1479_v20 = vrot.slane %v1478_v3, 1 }
 0x15b   : > { %v1480_v11 = vmax.f32 %v1478_v3, %v1479_v20 }
 0x15d   : > { %1481 = vst [vmem:[%s193_s28] sm:$0x1] %v1480_v11 }
 0x15e PF: > { %s14_s15 = sadd.s32 1, %s2102_s15  }
 0x15f   : > { %p11_p4 = scmp.ge.s32.totalorder %s14_s15, 4  }
 0x161   :  { %13 = sbr.rel (!%p11_p4) target bundleno = 1 (0x1), region = 74 }

// kernel: discrete_support_value_forward.8
= control target key start
LH: loop header
LB: loop body
LE: loop exit
PB: predicated region body
PF: predicated region fallthrough
CT: control target
= control target key end

     0   :  { %s2146_s15 = smov 0   ;;  %s2724_s0 = inlined_call_operand.vmem [shape: f32[2,10,10,64], index: 0, kind: input, shape index: {}]   ;;  %s2725_s1 = inlined_call_operand.vmem [shape: f32[9,64,64], index: 1, kind: input, shape index: {}]   ;;  %s2726_s2 = inlined_call_operand.vmem [shape: f32[1,64], index: 2, kind: input, shape index: {}]   ;;  %s2727_s3 = inlined_call_operand.vmem [shape: f32[1,64], index: 3, kind: input, shape index: {}]   ;;  %s2728_s4 = inlined_call_operand.vmem [shape: f32[2,8,8,64], index: 4, kind: output, shape index: {}]  }
   0x1 LB: > { %s1543_s16 = sadd.s32 4294967295, %s2119_s15   ;;  %p1547_p0 = scmp.ge.s32.totalorder %s2119_s15, 1  ;;  %s2119_s15 = sphi %s2146_s15, %s14_s15  }
   0x2   : > { %p162_p1 = scmp.lt.s32.totalorder %s2119_s15, 3 }
   0x4   : > { %p163_p2 = pnand %p1547_p0, %p162_p1 }
   0x6   : > { %166 = sbr.rel (%p163_p2) target bundleno = 334 (0x14e), region = 36 }
   0xb   : > { %v1558_v0 = vld [vmem:[%s2725_s1 + $0x78] sm:$0xff]  ;;  %v1557_v2 = vld [vmem:[%s2725_s1 + $0x70] sm:$0xff]  ;;  %p188_p3 = scmp.lt.s32.totalorder %s1543_s16, 1  ;;  %v1556_v4 = vld [vmem:[%s2725_s1 + $0x68] sm:$0xff]  ;;  %vm242_vm0 = vcmask 1046528   ;;  %vm276_vm1 = vcmask 523264  }
   0xc   : > { %v225_v1 = vld [vmem:[%s2725_s1 + $0x38] sm:$0xff]  ;;  %1836 = vmatprep.subr.mxu0 %v1558_v0  ;;  %v224_v3 = vld [vmem:[%s2725_s1 + $0x30] sm:$0xff]  ;;  %v223_v5 = vld [vmem:[%s2725_s1 + $0x28] sm:$0xff]  ;;  %vm519_vm2 = vcmask 1045504  }
   0xd   : > { %1864 = vmatprep.subr.mxu1 %v225_v1  ;;  %1837 = vmatpush3.msra.mxu0 %v1558_v0  ;;  %s2742_s16 = smov (!%p188_p3, %s1543_s16), 1  ;;  %v1555_v6 = vld [vmem:[%s2725_s1 + $0x60] sm:$0xff]  ;;  %v1554_v8 = vld [vmem:[%s2725_s1 + $0x58] sm:$0xff]  ;;  %v1553_v10 = vld [vmem:[%s2725_s1 + $0x50] sm:$0xff] }
   0xe   : > { %1865 = vmatpush3.msra.mxu1 %v225_v1  ;;  %1838 = vmatprep.subr.mxu0 %v1557_v2  ;;  %v222_v7 = vld [vmem:[%s2725_s1 + $0x20] sm:$0xff]  ;;  %s2104_s7 = smul.u32 160, %s2742_s16  ;;  %v221_v9 = vld [vmem:[%s2725_s1 + $0x18] sm:$0xff]  ;;  %v220_v13 = vld [vmem:[%s2725_s1 + $0x10] sm:$0xff]  ;;  %s1691_s26 = sshll.u32 %s2742_s16, 6 }
   0xf   : > { %1866 = vmatprep.subr.mxu1 %v224_v3  ;;  %1839 = vmatpush3.msra.mxu0 %v1557_v2  ;;  %v1552_v18 = vld [vmem:[%s2725_s1 + $0x48] sm:$0xff]  ;;  %v1551_v20 = vld [vmem:[%s2725_s1 + $0x40] sm:$0xff]  ;;  %v1582_v32 = vld [vmem:[%s2725_s1 + $0xb8] sm:$0xff]  ;;  %s2703_s16 = scalar_lea.vmem %s2728_s4, %s1691_s26 }
  0x10   : > { %1867 = vmatpush3.msra.mxu1 %v224_v3  ;;  %1840 = vmatprep.subr.mxu0 %v1556_v4  ;;  %s2190_s14 = scalar_lea.vmem %s2724_s0, %s2104_s7  ;;  %v219_v19 = vld [vmem:[%s2725_s1 + $0x8] sm:$0xff]  ;;  %v218_v23 = vld [vmem:[%s2725_s1] sm:$0xff]  ;;  %v1598_v33 = vld [vmem:[%s2725_s1 + $0xf8] sm:$0xff] }
  0x11   : > { %1868 = vmatprep.subr.mxu1 %v223_v5  ;;  %1841 = vmatpush3.msra.mxu0 %v1556_v4  ;;  %v2196_v11 = vld [vmem:[%s2190_s14] sm:$0xff]  ;;  %v2199_v12 = vld [vmem:[%s2190_s14 + $0x8] sm:$0x3]  ;;  %v2205_v14 = vld [vmem:[%s2190_s14 + $0x10] sm:$0xff] }
  0x12   : > { %1869 = vmatpush3.msra.mxu1 %v223_v5  ;;  %1842 = vmatprep.subr.mxu0 %v1555_v6  ;;  %v2208_v15 = vld [vmem:[%s2190_s14 + $0x18] sm:$0x3]  ;;  %v243_v16 = vrot.slane %v2196_v11, 1  ;;  %v244_v17 = vrot.slane %v2199_v12, 1  ;;  %v246_v21 = vrot.slane %v2205_v14, 1  ;;  %v2227_v24 = vld [vmem:[%s2190_s14 + $0x20] sm:$0xff] }
  0x13   : > { %1870 = vmatprep.subr.mxu1 %v222_v7  ;;  %1843 = vmatpush3.msra.mxu0 %v1555_v6  ;;  %v247_v22 = vrot.slane %v2208_v15, 1  ;;  %v2230_v25 = vld [vmem:[%s2190_s14 + $0x28] sm:$0x3]  ;;  %v2234_v27 = vld [vmem:[%s2190_s14 + $0x30] sm:$0xff]  ;;  %v2237_v28 = vld [vmem:[%s2190_s14 + $0x38] sm:$0x3] }
  0x14   : > { %1871 = vmatpush3.msra.mxu1 %v222_v7  ;;  %1844 = vmatprep.subr.mxu0 %v1554_v8  ;;  %v245_v26 = vsel %vm242_vm0, %v243_v16, %v244_v17  ;;  %v249_v30 = vrot.slane %v2227_v24, 1  ;;  %v250_v31 = vrot.slane %v2230_v25, 1  ;;  %v1581_v34 = vld [vmem:[%s2725_s1 + $0xb0] sm:$0xff]  ;;  %v252_v35 = vrot.slane %v2234_v27, 1  ;;  %v2266_v38 = vld [vmem:[%s2190_s14 + $0x40] sm:$0xff]  ;;  %v1580_v46 = vld [vmem:[%s2725_s1 + $0xa8] sm:$0xff] }
  0x15   : > { %1872 = vmatprep.subr.mxu1 %v221_v9  ;;  %1845 = vmatpush3.msra.mxu0 %v1554_v8  ;;  %v2240_v29 = vsel %vm242_vm0, %v246_v21, %v247_v22  ;;  %v253_v36 = vrot.slane %v2237_v28, 1  ;;  %v1597_v37 = vld [vmem:[%s2725_s1 + $0xf0] sm:$0xff]  ;;  %v2269_v39 = vld [vmem:[%s2190_s14 + $0x48] sm:$0x3]  ;;  %v2278_v42 = vld [vmem:[%s2190_s14 + $0x58] sm:$0x3] }
  0x16   : > { %1873 = vmatpush3.msra.mxu1 %v221_v9  ;;  %1846 = vmatprep.subr.mxu0 %v1553_v10  ;;  %v2272_v40 = vsel %vm242_vm0, %v249_v30, %v250_v31  ;;  %v2275_v41 = vld [vmem:[%s2190_s14 + $0x50] sm:$0xff]  ;;  %v255_v44 = vrot.slane %v2266_v38, 1  ;;  %v256_v45 = vrot.slane %v2269_v39, 1  ;;  %v1596_v47 = vld [vmem:[%s2725_s1 + $0xe8] sm:$0xff]  ;;  %v2296_v48 = vld [vmem:[%s2190_s14 + $0x60] sm:$0xff]  ;;  %v259_v50 = vrot.slane %v2278_v42, 1 }
  0x17   : > { %1874 = vmatprep.subr.mxu1 %v220_v13  ;;  %1847 = vmatpush3.msra.mxu0 %v1553_v10  ;;  %v2281_v43 = vsel %vm242_vm0, %v252_v35, %v253_v36  ;;  %v258_v49 = vrot.slane %v2275_v41, 1  ;;  %v2301_v51 = vld [vmem:[%s2190_s14 + $0x68] sm:$0x3]  ;;  %v1579_v52 = vld [vmem:[%s2725_s1 + $0xa0] sm:$0xff]  ;;  %v261_v56 = vrot.slane %v2296_v48, 1  ;;  %v2323_v59 = vld [vmem:[%s2190_s14 + $0x70] sm:$0xff] }
  0x18   : > { %1875 = vmatpush3.msra.mxu1 %v220_v13  ;;  %1848 = vmatprep.subr.mxu0 %v1552_v18  ;;  %v1595_v53 = vld [vmem:[%s2725_s1 + $0xe0] sm:$0xff]  ;;  %v2317_v55 = vsel %vm242_vm0, %v255_v44, %v256_v45  ;;  %v262_v58 = vrot.slane %v2301_v51, 1  ;;  %v2326_v60 = vld [vmem:[%s2190_s14 + $0x78] sm:$0x3]  ;;  %v2329_v61 = vld [vmem:[%s2190_s14 + $0x88] sm:$0x3] }
  0x19   : > { %1876 = vmatprep.subr.mxu1 %v219_v19  ;;  %1849 = vmatpush3.msra.mxu0 %v1552_v18  ;;  %v2314_v54 = vld [vmem:[%s2190_s14 + $0x80] sm:$0xff]  ;;  %v2332_v62 = vsel %vm242_vm0, %v258_v49, %v259_v50  ;;  %v809_v63 = vrot.slane %v2329_v61, 1  ;;  %v1578_v0 = vld [vmem:[%s2725_s1 + $0x98] sm:$0xff]  ;;  %v1577_v2 = vld [vmem:[%s2725_s1 + $0x90] sm:$0xff]  ;;  %v264_v3 = vrot.slane %v2323_v59, 1  ;;  %v265_v4 = vrot.slane %v2326_v60, 1 }
  0x1a   : > { %1877 = vmatpush3.msra.mxu1 %v219_v19  ;;  %1850 = vmatprep.subr.mxu0 %v1551_v20  ;;  %v808_v57 = vrot.slane %v2314_v54, 1  ;;  %v1594_v1 = vld [vmem:[%s2725_s1 + $0xd8] sm:$0xff]  ;;  %v1593_v6 = vld [vmem:[%s2725_s1 + $0xd0] sm:$0xff]  ;;  %v2361_v7 = vsel %vm242_vm0, %v261_v56, %v262_v58  ;;  %v521_v18 = vrot.slane %v2199_v12, 2  ;;  %v1576_v12 = vld [vmem:[%s2725_s1 + $0x88] sm:$0xff]  ;;  %v530_v44 = vrot.slane %v2237_v28, 2 }
  0x1b   : > { %1878 = vmatprep.subr.mxu1 %v218_v23  ;;  %1851 = vmatpush3.msra.mxu0 %v1551_v20  ;;  %v2364_v8 = vld [vmem:[%s2190_s14 + $0x90] sm:$0xff]  ;;  %v217_v9 = vld [vmem:[%s2190_s14 + $0x98] sm:$0x3]  ;;  %v2371_v19 = vsel %vm242_vm0, %v264_v3, %v265_v4  ;;  %v520_v20 = vrot.slane %v2196_v11, 2  ;;  %v1575_v30 = vld [vmem:[%s2725_s1 + $0x80] sm:$0xff]  ;;  %v538_v58 = vrot.slane %v2296_v48, 2 }
  0x1c   : > { %1852 = vmatprep.mubr.msk.f32.mxu0 %vm276_vm1, %v245_v26  ;;  %1879 = vmatpush3.msra.mxu1 %v218_v23  ;;  %v2351_v5 = vsel %vm242_vm0, %v808_v57, %v809_v63  ;;  %v1188_v10 = vrot.slane %v2364_v8, 1  ;;  %v1315_v13 = vrot.slane %v2364_v8, 2  ;;  %v1189_v16 = vrot.slane %v217_v9, 1  ;;  %v1591_v31 = vld [vmem:[%s2725_s1 + $0xc0] sm:$0xff]  ;;  %v1614_v35 = vld [vmem:[%s2725_s1 + $0x138] sm:$0xff]  ;;  %v1629_v45 = vld [vmem:[%s2725_s1 + $0x170] sm:$0xff] }
  0x1d   : > { %1880 = vmatprep.mubr.msk.f32.mxu1 %vm276_vm1, %v2196_v11  ;;  %1853 = vmatmul.mubr.msk.f32.vlgmr.msra.gmra.mxu0 %vm276_vm1, %v2240_v29  ;;  %v1316_v17 = vrot.slane %v217_v9, 2  ;;  %v1592_v11 = vld [vmem:[%s2725_s1 + $0xc8] sm:$0xff]  ;;  %v524_v23 = vrot.slane %v2208_v15, 2  ;;  %v523_v26 = vrot.slane %v2205_v14, 2  ;;  %v522_v15 = vsel %vm519_vm2, %v520_v20, %v521_v18  ;;  %v1630_v36 = vld [vmem:[%s2725_s1 + $0x178] sm:$0xff]  ;;  %v1627_v56 = vld [vmem:[%s2725_s1 + $0x160] sm:$0xff] }
  0x1e   : > { %1881 = vmatmul.mubr.msk.f32.vlgmr.msra.gmra.mxu1 %vm276_vm1, %v2205_v14  ;;  %1892 = vmatprep.subr.mxu0 %v1582_v32  ;;  %v2375_v21 = vsel %vm242_vm0, %v1188_v10, %v1189_v16  ;;  %v1612_v49 = vld [vmem:[%s2725_s1 + $0x128] sm:$0xff]  ;;  %v539_v63 = vrot.slane %v2301_v51, 2  ;;  %v542_v51 = vrot.slane %v2326_v60, 2  ;;  %v1609_v3 = vld [vmem:[%s2725_s1 + $0x110] sm:$0xff]  ;;  %v1623_v16 = vld [vmem:[%s2725_s1 + $0x140] sm:$0xff] }
  0x1f   : > { %1920 = vmatprep.subr.mxu1 %v1598_v33  ;;  %1893 = vmatpush3.msra.mxu0 %v1582_v32  ;;  %v2378_v22 = vsel %vm519_vm2, %v1315_v13, %v1316_v17  ;;  %v2404_v32 = vsel %vm519_vm2, %v523_v26, %v524_v23  ;;  %v1628_v50 = vld [vmem:[%s2725_s1 + $0x168] sm:$0xff]  ;;  %v1625_v4 = vld [vmem:[%s2725_s1 + $0x150] sm:$0xff]  ;;  %v1607_v13 = vld [vmem:[%s2725_s1 + $0x100] sm:$0xff] }
  0x20   : > { %1921 = vmatpush3.msra.mxu1 %v1598_v33  ;;  %1894 = vmatprep.subr.mxu0 %v1581_v34  ;;  %v526_v33 = vrot.slane %v2227_v24, 2  ;;  %v1608_v9 = vld [vmem:[%s2725_s1 + $0x108] sm:$0xff]  ;;  %v1646_v17 = vld [vmem:[%s2725_s1 + $0x1b8] sm:$0xff]  ;;  %v1661_v20 = vld [vmem:[%s2725_s1 + $0x1f0] sm:$0xff] }
  0x21   : > { %1922 = vmatprep.subr.mxu1 %v1597_v37  ;;  %1855 = vmatprep.mubr.msk.f32.mxu0 %vm276_vm1, %v2272_v40  ;;  %v1624_v10 = vld [vmem:[%s2725_s1 + $0x148] sm:$0xff]  ;;  %v1662_v18 = vld [vmem:[%s2725_s1 + $0x1f8] sm:$0xff]  ;;  %v1643_v23 = vld [vmem:[%s2725_s1 + $0x1a0] sm:$0xff] }
  0x22   : > { %1883 = vmatprep.mubr.msk.f32.mxu1 %vm276_vm1, %v2227_v24  ;;  %1895 = vmatpush3.msra.mxu0 %v1581_v34  ;;  %v527_v34 = vrot.slane %v2230_v25, 2  ;;  %v1613_v25 = vld [vmem:[%s2725_s1 + $0x130] sm:$0xff]  ;;  %v1659_v26 = vld [vmem:[%s2725_s1 + $0x1e0] sm:$0xff] }
  0x23   : > { %1923 = vmatpush3.msra.mxu1 %v1597_v37  ;;  %1856 = vmatmul.mubr.msk.f32.gmra.mxu0 %vm276_vm1, %v2281_v43  ;;  %v529_v37 = vrot.slane %v2234_v27, 2 }
  0x24   : > { %1884 = vmatmul.mubr.msk.f32.gmra.mxu1 %vm276_vm1, %v2234_v27  ;;  %1896 = vmatprep.subr.mxu0 %v1580_v46 }
  0x25   : > { %1924 = vmatprep.subr.mxu1 %v1596_v47  ;;  %1897 = vmatpush3.msra.mxu0 %v1580_v46  ;;  %v2433_v28 = vsel %vm519_vm2, %v529_v37, %v530_v44  ;;  %v532_v46 = vrot.slane %v2266_v38, 2  ;;  %v1639_v37 = vld [vmem:[%s2725_s1 + $0x180] sm:$0xff] }
  0x26   : > { %1925 = vmatpush3.msra.mxu1 %v1596_v47  ;;  %1898 = vmatprep.subr.mxu0 %v1579_v52  ;;  %v533_v47 = vrot.slane %v2269_v39, 2  ;;  %v536_v39 = vrot.slane %v2278_v42, 2  ;;  %v1655_v44 = vld [vmem:[%s2725_s1 + $0x1c0] sm:$0xff] }
  0x27   : > { %1926 = vmatprep.subr.mxu1 %v1595_v53  ;;  %1858 = vmatprep.mubr.msk.f32.mxu0 %vm276_vm1, %v2317_v55 }
  0x28   : > { %1886 = vmatprep.mubr.msk.f32.mxu1 %vm276_vm1, %v2266_v38  ;;  %1899 = vmatpush3.msra.mxu0 %v1579_v52  ;;  %v535_v52 = vrot.slane %v2275_v41, 2  ;;  %v2460_v57 = vsel %vm519_vm2, %v532_v46, %v533_v47 }
  0x29   : > { %1927 = vmatpush3.msra.mxu1 %v1595_v53  ;;  %1859 = vmatmul.mubr.msk.f32.gmra.mxu0 %vm276_vm1, %v2332_v62  ;;  %v1611_v53 = vld [vmem:[%s2725_s1 + $0x120] sm:$0xff] }
  0x2a   : > { %1887 = vmatmul.mubr.msk.f32.gmra.mxu1 %vm276_vm1, %v2275_v41  ;;  %1900 = vmatprep.subr.mxu0 %v1578_v0  ;;  %v2463_v42 = vsel %vm519_vm2, %v535_v52, %v536_v39 }
  0x2b   : > { %1928 = vmatprep.subr.mxu1 %v1594_v1  ;;  %1901 = vmatpush3.msra.mxu0 %v1578_v0  ;;  %v1610_v0 = vld [vmem:[%s2725_s1 + $0x118] sm:$0xff] }
  0x2c   : > { %1929 = vmatpush3.msra.mxu1 %v1594_v1  ;;  %1902 = vmatprep.subr.mxu0 %v1577_v2  ;;  %v1626_v1 = vld [vmem:[%s2725_s1 + $0x158] sm:$0xff] }
  0x2d   : > { %1930 = vmatprep.subr.mxu1 %v1593_v6  ;;  %1861 = vmatprep.mubr.msk.f32.mxu0 %vm276_vm1, %v2361_v7 }
  0x2e   : > { %1889 = vmatprep.mubr.msk.f32.mxu1 %vm276_vm1, %v2296_v48  ;;  %1903 = vmatpush3.msra.mxu0 %v1577_v2  ;;  %v541_v2 = vrot.slane %v2323_v59, 2 }
  0x2f   : > { %1931 = vmatpush3.msra.mxu1 %v1593_v6  ;;  %1862 = vmatmul.mubr.msk.f32.gmra.mxu0 %vm276_vm1, %v2371_v19  ;;  %v2490_v6 = vsel %vm519_vm2, %v538_v58, %v539_v63 }
  0x30   : > { %1890 = vmatmul.mubr.msk.f32.gmra.mxu1 %vm276_vm1, %v2323_v59  ;;  %1904 = vmatprep.subr.mxu0 %v1576_v12  ;;  %v2493_v60 = vsel %vm519_vm2, %v541_v2, %v542_v51 }
  0x31   : > { %1932 = vmatprep.subr.mxu1 %v1592_v11  ;;  %1905 = vmatpush3.msra.mxu0 %v1576_v12  ;;  %v1644_v12 = vld [vmem:[%s2725_s1 + $0x1a8] sm:$0xff] }
  0x32   : > { %1933 = vmatpush3.msra.mxu1 %v1592_v11  ;;  %1906 = vmatprep.subr.mxu0 %v1575_v30  ;;  %v1660_v11 = vld [vmem:[%s2725_s1 + $0x1e8] sm:$0xff] }
  0x33   : > { %1934 = vmatprep.subr.mxu1 %v1591_v31  ;;  %1907 = vmatpush3.msra.mxu0 %v1575_v30  ;;  %v1642_v30 = vld [vmem:[%s2725_s1 + $0x198] sm:$0xff] }
  0x34   : > { %1908 = vmatprep.mubr.msk.f32.mxu0 %vm276_vm1, %v522_v15  ;;  %1935 = vmatpush3.msra.mxu1 %v1591_v31  ;;  %v1658_v31 = vld [vmem:[%s2725_s1 + $0x1d8] sm:$0xff]  ;;  %v935_v15 = vrot.slane %v2314_v54, 2 }
  0x35   : > { %1936 = vmatprep.mubr.msk.f32.mxu1 %vm276_vm1, %v2205_v14  ;;  %1909 = vmatmul.mubr.msk.f32.vlgmr.msra.gmra.mxu0 %vm276_vm1, %v2404_v32  ;;  %v2430_v14 = vsel %vm519_vm2, %v526_v33, %v527_v34  ;;  %v1641_v33 = vld [vmem:[%s2725_s1 + $0x190] sm:$0xff] }
  0x36   : > { %1937 = vmatmul.mubr.msk.f32.vlgmr.msra.gmra.mxu1 %vm276_vm1, %v2227_v24  ;;  %1948 = vmatprep.subr.mxu0 %v1614_v35  ;;  %v1657_v34 = vld [vmem:[%s2725_s1 + $0x1d0] sm:$0xff] }
  0x37   : > { %1976 = vmatprep.subr.mxu1 %v1630_v36  ;;  %1949 = vmatpush3.msra.mxu0 %v1614_v35  ;;  %v1640_v35 = vld [vmem:[%s2725_s1 + $0x188] sm:$0xff] }
  0x38   : > { %1977 = vmatpush3.msra.mxu1 %v1630_v36  ;;  %1950 = vmatprep.subr.mxu0 %v1613_v25  ;;  %v1656_v36 = vld [vmem:[%s2725_s1 + $0x1c8] sm:$0xff] }
  0x39   : > { %1978 = vmatprep.subr.mxu1 %v1629_v45  ;;  %1911 = vmatprep.mubr.msk.f32.mxu0 %vm276_vm1, %v2430_v14 }
  0x3a   : > { %1939 = vmatprep.mubr.msk.f32.mxu1 %vm276_vm1, %v2234_v27  ;;  %1951 = vmatpush3.msra.mxu0 %v1613_v25  ;;  %v1678_v25 = vld [vmem:[%s2725_s1 + $0x238] sm:$0xff] }
  0x3b   : > { %1979 = vmatpush3.msra.mxu1 %v1629_v45  ;;  %1912 = vmatmul.mubr.msk.f32.gmra.mxu0 %vm276_vm1, %v2433_v28  ;;  %v1677_v45 = vld [vmem:[%s2725_s1 + $0x230] sm:$0xff] }
  0x3c   : > { %1940 = vmatmul.mubr.msk.f32.gmra.mxu1 %vm276_vm1, %v2266_v38  ;;  %1952 = vmatprep.subr.mxu0 %v1612_v49 }
  0x3d   : > { %1980 = vmatprep.subr.mxu1 %v1628_v50  ;;  %1953 = vmatpush3.msra.mxu0 %v1612_v49 }
  0x3e   : > { %1981 = vmatpush3.msra.mxu1 %v1628_v50  ;;  %1954 = vmatprep.subr.mxu0 %v1611_v53 }
  0x3f   : > { %1982 = vmatprep.subr.mxu1 %v1627_v56  ;;  %1914 = vmatprep.mubr.msk.f32.mxu0 %vm276_vm1, %v2460_v57 }
  0x40   : > { %1942 = vmatprep.mubr.msk.f32.mxu1 %vm276_vm1, %v2275_v41  ;;  %1955 = vmatpush3.msra.mxu0 %v1611_v53 }
  0x41   : > { %1983 = vmatpush3.msra.mxu1 %v1627_v56  ;;  %1915 = vmatmul.mubr.msk.f32.gmra.mxu0 %vm276_vm1, %v2463_v42 }
  0x42   : > { %1943 = vmatmul.mubr.msk.f32.gmra.mxu1 %vm276_vm1, %v2296_v48  ;;  %1956 = vmatprep.subr.mxu0 %v1610_v0 }
  0x43   : > { %1984 = vmatprep.subr.mxu1 %v1626_v1  ;;  %1957 = vmatpush3.msra.mxu0 %v1610_v0 }
  0x44   : > { %1985 = vmatpush3.msra.mxu1 %v1626_v1  ;;  %1958 = vmatprep.subr.mxu0 %v1609_v3 }
  0x45   : > { %1986 = vmatprep.subr.mxu1 %v1625_v4  ;;  %1917 = vmatprep.mubr.msk.f32.mxu0 %vm276_vm1, %v2490_v6 }
  0x46   : > { %1945 = vmatprep.mubr.msk.f32.mxu1 %vm276_vm1, %v2323_v59  ;;  %1959 = vmatpush3.msra.mxu0 %v1609_v3 }
  0x47   : > { %1987 = vmatpush3.msra.mxu1 %v1625_v4  ;;  %1918 = vmatmul.mubr.msk.f32.gmra.mxu0 %vm276_vm1, %v2493_v60 }
  0x48   : > { %1946 = vmatmul.mubr.msk.f32.gmra.mxu1 %vm276_vm1, %v2314_v54  ;;  %1960 = vmatprep.subr.mxu0 %v1608_v9 }
  0x49   : > { %1988 = vmatprep.subr.mxu1 %v1624_v10  ;;  %1961 = vmatpush3.msra.mxu0 %v1608_v9 }
  0x4a   : > { %1989 = vmatpush3.msra.mxu1 %v1624_v10  ;;  %1962 = vmatprep.subr.mxu0 %v1607_v13 }
  0x4b   : > { %1990 = vmatprep.subr.mxu1 %v1623_v16  ;;  %1963 = vmatpush3.msra.mxu0 %v1607_v13 }
  0x4c   : > { %1964 = vmatprep.mubr.msk.f32.mxu0 %vm276_vm1, %v2240_v29  ;;  %1991 = vmatpush3.msra.mxu1 %v1623_v16  ;;  %v1645_v29 = vld [vmem:[%s2725_s1 + $0x1b0] sm:$0xff] }
  0x4d   : > { %1992 = vmatprep.mubr.msk.f32.mxu1 %vm276_vm1, %v2404_v32  ;;  %1965 = vmatmul.mubr.msk.f32.vlgmr.msra.gmra.mxu0 %vm276_vm1, %v2272_v40  ;;  %v936_v32 = vrot.slane %v2329_v61, 2 }
  0x4e   : > { %1993 = vmatmul.mubr.msk.f32.vlgmr.msra.gmra.mxu1 %vm276_vm1, %v2430_v14  ;;  %2004 = vmatprep.subr.mxu0 %v1646_v17 }
  0x4f   : > { %2032 = vmatprep.subr.mxu1 %v1662_v18  ;;  %2005 = vmatpush3.msra.mxu0 %v1646_v17  ;;  %v2578_v61 = vsel %vm519_vm2, %v935_v15, %v936_v32 }
  0x50   : > { %2033 = vmatpush3.msra.mxu1 %v1662_v18  ;;  %2006 = vmatprep.subr.mxu0 %v1645_v29 }
  0x51   : > { %2034 = vmatprep.subr.mxu1 %v1661_v20  ;;  %1967 = vmatprep.mubr.msk.f32.mxu0 %vm276_vm1, %v2281_v43 }
  0x52   : > { %1995 = vmatprep.mubr.msk.f32.mxu1 %vm276_vm1, %v2433_v28  ;;  %2007 = vmatpush3.msra.mxu0 %v1645_v29 }
  0x53   : > { %2035 = vmatpush3.msra.mxu1 %v1661_v20  ;;  %1968 = vmatmul.mubr.msk.f32.gmra.mxu0 %vm276_vm1, %v2317_v55 }
  0x54   : > { %1996 = vmatmul.mubr.msk.f32.gmra.mxu1 %vm276_vm1, %v2460_v57  ;;  %2008 = vmatprep.subr.mxu0 %v1644_v12 }
  0x55   : > { %2036 = vmatprep.subr.mxu1 %v1660_v11  ;;  %2009 = vmatpush3.msra.mxu0 %v1644_v12 }
  0x56   : > { %2037 = vmatpush3.msra.mxu1 %v1660_v11  ;;  %2010 = vmatprep.subr.mxu0 %v1643_v23 }
  0x57   : > { %2038 = vmatprep.subr.mxu1 %v1659_v26  ;;  %1970 = vmatprep.mubr.msk.f32.mxu0 %vm276_vm1, %v2332_v62 }
  0x58   : > { %1998 = vmatprep.mubr.msk.f32.mxu1 %vm276_vm1, %v2463_v42  ;;  %2011 = vmatpush3.msra.mxu0 %v1643_v23 }
  0x59   : > { %2039 = vmatpush3.msra.mxu1 %v1659_v26  ;;  %1971 = vmatmul.mubr.msk.f32.gmra.mxu0 %vm276_vm1, %v2361_v7 }
  0x5a   : > { %1999 = vmatmul.mubr.msk.f32.gmra.mxu1 %vm276_vm1, %v2490_v6  ;;  %2012 = vmatprep.subr.mxu0 %v1642_v30 }
  0x5b   : > { %2040 = vmatprep.subr.mxu1 %v1658_v31  ;;  %2013 = vmatpush3.msra.mxu0 %v1642_v30 }
  0x5c   : > { %2041 = vmatpush3.msra.mxu1 %v1658_v31  ;;  %2014 = vmatprep.subr.mxu0 %v1641_v33 }
  0x5d   : > { %2042 = vmatprep.subr.mxu1 %v1657_v34  ;;  %1973 = vmatprep.mubr.msk.f32.mxu0 %vm276_vm1, %v2371_v19 }
  0x5e   : > { %2001 = vmatprep.mubr.msk.f32.mxu1 %vm276_vm1, %v2493_v60  ;;  %2015 = vmatpush3.msra.mxu0 %v1641_v33 }
  0x5f   : > { %2043 = vmatpush3.msra.mxu1 %v1657_v34  ;;  %1974 = vmatmul.mubr.msk.f32.gmra.mxu0 %vm276_vm1, %v2351_v5 }
  0x60   : > { %2002 = vmatmul.mubr.msk.f32.gmra.mxu1 %vm276_vm1, %v2578_v61  ;;  %2016 = vmatprep.subr.mxu0 %v1640_v35 }
  0x61   : > { %2044 = vmatprep.subr.mxu1 %v1656_v36  ;;  %2017 = vmatpush3.msra.mxu0 %v1640_v35 }
  0x62   : > { %2045 = vmatpush3.msra.mxu1 %v1656_v36  ;;  %2018 = vmatprep.subr.mxu0 %v1639_v37 }
  0x63   : > { %2046 = vmatprep.subr.mxu1 %v1655_v44  ;;  %2019 = vmatpush3.msra.mxu0 %v1639_v37 }
  0x64   : > { %2020 = vmatprep.mubr.msk.f32.mxu0 %vm276_vm1, %v2227_v24  ;;  %2047 = vmatpush3.msra.mxu1 %v1655_v44  ;;  %v1676_v24 = vld [vmem:[%s2725_s1 + $0x228] sm:$0xff] }
  0x65   : > { %2048 = vmatprep.mubr.msk.f32.mxu1 %vm276_vm1, %v2272_v40  ;;  %2021 = vmatmul.mubr.msk.f32.vlgmr.msra.gmra.mxu0 %vm276_vm1, %v2234_v27  ;;  %v1675_v27 = vld [vmem:[%s2725_s1 + $0x220] sm:$0xff]  ;;  %v1673_v40 = vld [vmem:[%s2725_s1 + $0x210] sm:$0xff] }
  0x66   : > { %2049 = vmatmul.mubr.msk.f32.vlgmr.msra.gmra.mxu1 %vm276_vm1, %v2281_v43  ;;  %2060 = vmatprep.subr.mxu0 %v1678_v25  ;;  %v1671_v43 = vld [vmem:[%s2725_s1 + $0x200] sm:$0xff] }
  0x67   : > { %2088 = vmatprep.subr.mxu1 %v1678_v25  ;;  %2061 = vmatpush3.msra.mxu0 %v1678_v25 }
  0x68   : > { %2096 = vmatpush3.msra.mxu1 %v1678_v25  ;;  %2062 = vmatprep.subr.mxu0 %v1677_v45 }
  0x69   : > { %2089 = vmatprep.subr.mxu1 %v1677_v45  ;;  %2023 = vmatprep.mubr.msk.f32.mxu0 %vm276_vm1, %v2266_v38  ;;  %v1674_v38 = vld [vmem:[%s2725_s1 + $0x218] sm:$0xff] }
  0x6a   : > { %2051 = vmatprep.mubr.msk.f32.mxu1 %vm276_vm1, %v2317_v55  ;;  %2063 = vmatpush3.msra.mxu0 %v1677_v45 }
  0x6b   : > { %2097 = vmatpush3.msra.mxu1 %v1677_v45  ;;  %2024 = vmatmul.mubr.msk.f32.gmra.mxu0 %vm276_vm1, %v2275_v41  ;;  %v1672_v41 = vld [vmem:[%s2725_s1 + $0x208] sm:$0xff] }
  0x6c   : > { %2052 = vmatmul.mubr.msk.f32.gmra.mxu1 %vm276_vm1, %v2332_v62  ;;  %2064 = vmatprep.subr.mxu0 %v1676_v24 }
  0x6d   : > { %2090 = vmatprep.subr.mxu1 %v1676_v24  ;;  %2065 = vmatpush3.msra.mxu0 %v1676_v24 }
  0x6e   : > { %2098 = vmatpush3.msra.mxu1 %v1676_v24  ;;  %2066 = vmatprep.subr.mxu0 %v1675_v27 }
  0x6f   : > { %2091 = vmatprep.subr.mxu1 %v1675_v27  ;;  %2026 = vmatprep.mubr.msk.f32.mxu0 %vm276_vm1, %v2296_v48 }
  0x70   : > { %2054 = vmatprep.mubr.msk.f32.mxu1 %vm276_vm1, %v2361_v7  ;;  %2067 = vmatpush3.msra.mxu0 %v1675_v27 }
  0x71   : > { %2099 = vmatpush3.msra.mxu1 %v1675_v27  ;;  %2027 = vmatmul.mubr.msk.f32.gmra.mxu0 %vm276_vm1, %v2323_v59 }
  0x72   : > { %2055 = vmatmul.mubr.msk.f32.gmra.mxu1 %vm276_vm1, %v2371_v19  ;;  %2068 = vmatprep.subr.mxu0 %v1674_v38 }
  0x73   : > { %2092 = vmatprep.subr.mxu1 %v1674_v38  ;;  %2069 = vmatpush3.msra.mxu0 %v1674_v38 }
  0x74   : > { %2100 = vmatpush3.msra.mxu1 %v1674_v38  ;;  %2070 = vmatprep.subr.mxu0 %v1673_v40 }
  0x75   : > { %2093 = vmatprep.subr.mxu1 %v1673_v40  ;;  %2029 = vmatprep.mubr.msk.f32.mxu0 %vm276_vm1, %v2314_v54 }
  0x76   : > { %2057 = vmatprep.mubr.msk.f32.mxu1 %vm276_vm1, %v2351_v5  ;;  %2071 = vmatpush3.msra.mxu0 %v1673_v40 }
  0x77   : > { %2101 = vmatpush3.msra.mxu1 %v1673_v40  ;;  %2030 = vmatmul.mubr.msk.f32.gmra.mxu0 %vm276_vm1, %v2364_v8 }
  0x78   : > { %2058 = vmatmul.mubr.msk.f32.gmra.mxu1 %vm276_vm1, %v2375_v21  ;;  %2072 = vmatprep.subr.mxu0 %v1672_v41 }
  0x79   : > { %2094 = vmatprep.subr.mxu1 %v1672_v41  ;;  %2073 = vmatpush3.msra.mxu0 %v1672_v41 }
  0x7a   : > { %2102 = vmatpush3.msra.mxu1 %v1672_v41  ;;  %2074 = vmatprep.subr.mxu0 %v1671_v43 }
  0x7b   : > { %2095 = vmatprep.subr.mxu1 %v1671_v43  ;;  %2075 = vmatpush3.msra.mxu0 %v1671_v43 }
  0x7c   : > { %2103 = vmatpush3.msra.mxu1 %v1671_v43  ;;  %2076 = vmatprep.mubr.msk.f32.mxu0 %vm276_vm1, %v2430_v14 }
  0x7d   : > { %2082 = vmatprep.mubr.msk.f32.mxu1 %vm276_vm1, %v2490_v6  ;;  %2077 = vmatmul.mubr.msk.f32.vlgmr.msra.gmra.mxu0 %vm276_vm1, %v2433_v28 }
  0x7e   : > { %2083 = vmatmul.mubr.msk.f32.vlgmr.msra.gmra.mxu1 %vm276_vm1, %v2493_v60  ;;  %2079 = vmatprep.mubr.msk.f32.mxu0 %vm276_vm1, %v2460_v57 }
  0x7f   : > { %2085 = vmatprep.mubr.msk.f32.mxu1 %vm276_vm1, %v2578_v61 }
  0x81   : > { %2080 = vmatmul.mubr.msk.f32.gmra.mxu0 %vm276_vm1, %v2463_v42 }
  0x82   : > { %2086 = vmatmul.mubr.msk.f32.gmra.mxu1 %vm276_vm1, %v2378_v22 }
  0xdd   : > { %v1854_v48 = vpop.f32.mrf.mxu0 }
  0xde   : > { %v1882_v54 = vpop.f32.mrf.mxu1 }
  0xdf   : > { %v359_v55 = vpop.f32.mrf.mxu0  ;;  %v486_v35 = vadd.f32 %v1882_v54, %v1854_v48 }
  0xe0   : > { %v480_v59 = vpop.f32.mrf.mxu1 }
  0xe1   : > { %v481_v25 = vadd.f32 %v480_v59, %v359_v55 }
  0xe3   : > { %v1857_v62 = vpop.f32.mrf.mxu0 }
  0xe4   : > { %v1885_v5 = vpop.f32.mrf.mxu1 }
  0xe5   : > { %v369_v7 = vpop.f32.mrf.mxu0 }
  0xe6   : > { %v490_v8 = vpop.f32.mrf.mxu1 }
  0xe9   : > { %v1860_v19 = vpop.f32.mrf.mxu0 }
  0xea   : > { %v1888_v21 = vpop.f32.mrf.mxu1 }
  0xeb   : > { %v379_v14 = vpop.f32.mrf.mxu0  ;;  %v506_v36 = vadd.f32 %v1888_v21, %v1860_v19 }
  0xec   : > { %v500_v28 = vpop.f32.mrf.mxu1 }
  0xed   : > { %v501_v45 = vadd.f32 %v500_v28, %v379_v14 }
  0xef   : > { %v1863_v46 = vpop.f32.mrf.mxu0 }
  0xf0   : > { %v1891_v47 = vpop.f32.mrf.mxu1 }
  0xf1   : > { %v389_v49 = vpop.f32.mrf.mxu0 }
  0xf2   : > { %v510_v50 = vpop.f32.mrf.mxu1 }
  0xf3   : > { %v511_v48 = vadd.f32 %v510_v50, %v389_v49 }
  0xf5   : > { %v1910_v52 = vpop.f32.mrf.mxu0 }
  0xf6   : > { %v1938_v39 = vpop.f32.mrf.mxu1  ;;  %v675_v24 = vadd.f32 %v1910_v52, %v486_v35 }
  0xf7   : > { %v635_v53 = vpop.f32.mrf.mxu0 }
  0xf8   : > { %v760_v22 = vpop.f32.mrf.mxu1  ;;  %v674_v41 = vadd.f32 %v635_v53, %v481_v25 }
  0xfa   : > { %v799_v55 = vadd.f32 %v760_v22, %v674_v41 }
  0xfb   : > { %v1913_v56 = vpop.f32.mrf.mxu0 }
  0xfc   : > { %v2672_v57 = vpop.f32.mrf.mxu1 }
  0xfd   : > { %2729 = vst [vmem:[#allocation2_spill] sm:$0xff] %v2672_v57  ;;  %v645_v42 = vpop.f32.mrf.mxu0 }
  0xfe   : > { %v2674_v58 = vpop.f32.mrf.mxu1 }
  0xff   : > { %2730 = vst [vmem:[#allocation3_spill] sm:$0xff] %v2674_v58  ;;  %v800_v58 = vadd.f32 %v1938_v39, %v675_v24 }
 0x101   : > { %v1916_v63 = vpop.f32.mrf.mxu0 }
 0x102   : > { %v1944_v0 = vpop.f32.mrf.mxu1  ;;  %v679_v27 = vadd.f32 %v1916_v63, %v506_v36 }
 0x103   : > { %v655_v1 = vpop.f32.mrf.mxu0 }
 0x104   : > { %v780_v2 = vpop.f32.mrf.mxu1  ;;  %v678_v43 = vadd.f32 %v655_v1, %v501_v45  ;;  %v804_v57 = vadd.f32 %v1944_v0, %v679_v27 }
 0x106   : > { %v803_v59 = vadd.f32 %v780_v2, %v678_v43 }
 0x107   : > { %v1919_v51 = vpop.f32.mrf.mxu0 }
 0x108   : > { %v1947_v3 = vpop.f32.mrf.mxu1 }
 0x109   : > { %v665_v4 = vpop.f32.mrf.mxu0 }
 0x10a   : > { %v790_v6 = vpop.f32.mrf.mxu1  ;;  %v680_v63 = vadd.f32 %v665_v4, %v511_v48 }
 0x10c   : > { %v805_v50 = vadd.f32 %v790_v6, %v680_v63 }
 0x10d   : > { %v1966_v60 = vpop.f32.mrf.mxu0 }
 0x10e   : > { %v1994_v9 = vpop.f32.mrf.mxu1  ;;  %v928_v14 = vadd.f32 %v1966_v60, %v800_v58 }
 0x10f   : > { %v888_v10 = vpop.f32.mrf.mxu0 }
 0x110   : > { %v1015_v13 = vpop.f32.mrf.mxu1  ;;  %v927_v53 = vadd.f32 %v888_v10, %v799_v55 }
 0x112   : > { %v1054_v58 = vadd.f32 %v1015_v13, %v927_v53 }
 0x113   : > { %v1969_v16 = vpop.f32.mrf.mxu0 }
 0x114   : > { %v2676_v17 = vpop.f32.mrf.mxu1 }
 0x115   : > { %2731 = vst [vmem:[#allocation4_spill] sm:$0xff] %v2676_v17  ;;  %v898_v18 = vpop.f32.mrf.mxu0  ;;  %v516_v17 = vadd.f32 %v1891_v47, %v1863_v46  ;;  %v1055_v47 = vadd.f32 %v1994_v9, %v928_v14 }
 0x116   : > { %v2678_v29 = vpop.f32.mrf.mxu1 }
 0x117   : > { %2732 = vst [vmem:[#allocation5_spill] sm:$0xff] %v2678_v29  ;;  %v496_v29 = vadd.f32 %v1885_v5, %v1857_v62  ;;  %v681_v19 = vadd.f32 %v1919_v51, %v516_v17  ;;  %v2735_v62 = vld [vmem:[#allocation2_spill] sm:$0xff] }
 0x119   : > { %v1972_v20 = vpop.f32.mrf.mxu0  ;;  %v677_v54 = vadd.f32 %v1913_v56, %v496_v29  ;;  %v806_v46 = vadd.f32 %v1947_v3, %v681_v19 }
 0x11a   : > { %v2000_v12 = vpop.f32.mrf.mxu1  ;;  %v932_v28 = vadd.f32 %v1972_v20, %v804_v57 }
 0x11b   : > { %v908_v11 = vpop.f32.mrf.mxu0  ;;  %v802_v5 = vadd.f32 %v2735_v62, %v677_v54 }
 0x11c   : > { %v1035_v23 = vpop.f32.mrf.mxu1  ;;  %v931_v1 = vadd.f32 %v908_v11, %v803_v59  ;;  %v2737_v3 = vld [vmem:[#allocation4_spill] sm:$0xff] }
 0x11d   : > { %v930_v39 = vadd.f32 %v1969_v16, %v802_v5 }
 0x11e   : > { %v1058_v57 = vadd.f32 %v1035_v23, %v931_v1  ;;  %v2738_v6 = vld [vmem:[#allocation5_spill] sm:$0xff] }
 0x11f   : > { %v1975_v26 = vpop.f32.mrf.mxu0  ;;  %v1057_v9 = vadd.f32 %v2737_v3, %v930_v39 }
 0x120   : > { %v2003_v30 = vpop.f32.mrf.mxu1  ;;  %v934_v56 = vadd.f32 %v1975_v26, %v806_v46 }
 0x121   : > { %v918_v31 = vpop.f32.mrf.mxu0 }
 0x122   : > { %v1045_v15 = vpop.f32.mrf.mxu1  ;;  %v933_v4 = vadd.f32 %v918_v31, %v805_v50  ;;  %v1061_v20 = vadd.f32 %v2003_v30, %v934_v56 }
 0x124   : > { %v1060_v26 = vadd.f32 %v1045_v15, %v933_v4 }
 0x125   : > { %v2022_v32 = vpop.f32.mrf.mxu0 }
 0x126   : > { %v2050_v33 = vpop.f32.mrf.mxu1 }
 0x127   : > { %v1140_v34 = vpop.f32.mrf.mxu0 }
 0x128   : > { %v2680_v61 = vpop.f32.mrf.mxu1  ;;  %v1179_v17 = vadd.f32 %v1140_v34, %v1054_v58 }
 0x129   : > { %2733 = vst [vmem:[#allocation6_spill] sm:$0xff] %v2680_v61  ;;  %v491_v61 = vadd.f32 %v490_v8, %v369_v7  ;;  %v1059_v7 = vadd.f32 %v2000_v12, %v932_v28  ;;  %v2736_v8 = vld [vmem:[#allocation3_spill] sm:$0xff] }
 0x12b   : > { %v2025_v37 = vpop.f32.mrf.mxu0  ;;  %v676_v52 = vadd.f32 %v645_v42, %v491_v61  ;;  %v1180_v42 = vadd.f32 %v2022_v32, %v1055_v47 }
 0x12c   : > { %v2682_v44 = vpop.f32.mrf.mxu1  ;;  %v1182_v61 = vadd.f32 %v2025_v37, %v1057_v9 }
 0x12d   : > { %2734 = vst [vmem:[#allocation7_spill] sm:$0xff] %v2682_v44  ;;  %v1150_v38 = vpop.f32.mrf.mxu0  ;;  %v801_v49 = vadd.f32 %v2736_v8, %v676_v52  ;;  %v1308_v12 = vadd.f32 %v2050_v33, %v1180_v42 }
 0x12e   : > { %v2684_v40 = vpop.f32.mrf.mxu1 }
 0x12f   : > { %v929_v51 = vadd.f32 %v898_v18, %v801_v49  ;;  %v1687_v18 = vld [vmem:[%s2726_s2] ss:$0 sm:$0xff] }
 0x130   : > { %v2739_v32 = vld [vmem:[#allocation6_spill] sm:$0xff] }
 0x131   : > { %v2028_v21 = vpop.f32.mrf.mxu0  ;;  %v1056_v16 = vadd.f32 %v2738_v6, %v929_v51  ;;  %v1307_v34 = vadd.f32 %v2739_v32, %v1179_v17 }
 0x132   : > { %v2056_v44 = vpop.f32.mrf.mxu1  ;;  %v1184_v2 = vadd.f32 %v2028_v21, %v1059_v7 }
 0x133   : > { %v1160_v35 = vpop.f32.mrf.mxu0  ;;  %v1181_v30 = vadd.f32 %v1150_v38, %v1056_v16 }
 0x134   : > { %v1288_v36 = vpop.f32.mrf.mxu1  ;;  %v1183_v29 = vadd.f32 %v1160_v35, %v1058_v57  ;;  %v1312_v11 = vadd.f32 %v2056_v44, %v1184_v2  ;;  %v1688_v44 = vld [vmem:[%s2727_s3] ss:$0 sm:$0xff]  ;;  %v2740_v54 = vld [vmem:[#allocation7_spill] sm:$0xff] }
 0x135   : > { %v1310_v19 = vadd.f32 %v2740_v54, %v1182_v61  ;;  %v1309_v63 = vadd.f32 %v2684_v40, %v1181_v30 }
 0x136   : > { %v1311_v25 = vadd.f32 %v1288_v36, %v1183_v29 }
 0x137   : > { %v2031_v22 = vpop.f32.mrf.mxu0 }
 0x138   : > { %v2059_v0 = vpop.f32.mrf.mxu1  ;;  %v1186_v13 = vadd.f32 %v2031_v22, %v1061_v20 }
 0x139   : > { %v1170_v60 = vpop.f32.mrf.mxu0 }
 0x13a   : > { %v1298_v10 = vpop.f32.mrf.mxu1  ;;  %v1185_v33 = vadd.f32 %v1170_v60, %v1060_v26  ;;  %v1314_v21 = vadd.f32 %v2059_v0, %v1186_v13 }
 0x13c   : > { %v1313_v35 = vadd.f32 %v1298_v10, %v1185_v33 }
 0x13d   : > { %v2078_v23 = vpop.f32.mrf.mxu0 }
 0x13e   : > { %v2084_v31 = vpop.f32.mrf.mxu1  ;;  %v1435_v45 = vadd.f32 %v2078_v23, %v1308_v12 }
 0x13f   : > { %v1439_v24 = vadd.f32 %v2084_v31, %v1312_v11  ;;  %v1395_v15 = vpop.f32.mrf.mxu0 }
 0x140   : > { %v1415_v37 = vpop.f32.mrf.mxu1  ;;  %v1450_v27 = vmul.f32 %v1687_v18, %v1435_v45  ;;  %v1434_v43 = vadd.f32 %v1395_v15, %v1307_v34 }
 0x141   : > { %v1454_v41 = vmul.f32 %v1687_v18, %v1439_v24  ;;  %v1438_v48 = vadd.f32 %v1415_v37, %v1311_v25  ;;  %v2081_v55 = vpop.f32.mrf.mxu0 }
 0x142   : > { %v2087_v59 = vpop.f32.mrf.mxu1  ;;  %v1465_v14 = vadd.f32 %v1688_v44, %v1450_v27  ;;  %v1449_v38 = vmul.f32 %v1687_v18, %v1434_v43  ;;  %v1437_v36 = vadd.f32 %v2081_v55, %v1310_v19 }
 0x143   : > { %v1469_v28 = vadd.f32 %v1688_v44, %v1454_v41  ;;  %v1453_v52 = vmul.f32 %v1687_v18, %v1438_v48  ;;  %v1441_v53 = vadd.f32 %v2087_v59, %v1314_v21  ;;  %v1405_v1 = vpop.f32.mrf.mxu0 }
 0x144   : > { %v1425_v62 = vpop.f32.mrf.mxu1  ;;  %v1473_v5 = vmax.f32 %v1465_v14, 0.0  ;;  %v1464_v47 = vadd.f32 %v1688_v44, %v1449_v38  ;;  %v1452_v8 = vmul.f32 %v1687_v18, %v1437_v36  ;;  %v1436_v49 = vadd.f32 %v1405_v1, %v1309_v63 }
 0x145   : > { %v1477_v46 = vmax.f32 %v1469_v28, 0.0  ;;  %v1468_v7 = vadd.f32 %v1688_v44, %v1453_v52  ;;  %v1456_v40 = vmul.f32 %v1687_v18, %v1441_v53  ;;  %v1440_v50 = vadd.f32 %v1425_v62, %v1313_v35 }
 0x146   : > { %1481 = vst.msk [vmem:[%s2703_s16 + $0x8] sm:$0xff] %vm276_vm1, %v1473_v5  ;;  %v1472_v39 = vmax.f32 %v1464_v47, 0.0  ;;  %v1467_v22 = vadd.f32 %v1688_v44, %v1452_v8  ;;  %v1451_v58 = vmul.f32 %v1687_v18, %v1436_v49 }
 0x147   : > { %1485 = vst.msk [vmem:[%s2703_s16 + $0x28] sm:$0xff] %vm276_vm1, %v1477_v46  ;;  %v1476_v56 = vmax.f32 %v1468_v7, 0.0  ;;  %v1471_v0 = vadd.f32 %v1688_v44, %v1456_v40  ;;  %v1455_v57 = vmul.f32 %v1687_v18, %v1440_v50 }
 0x148   : > { %1480 = vst.msk [vmem:[%s2703_s16] sm:$0xff] %vm276_vm1, %v1472_v39  ;;  %v1475_v42 = vmax.f32 %v1467_v22, 0.0  ;;  %v1466_v51 = vadd.f32 %v1688_v44, %v1451_v58 }
 0x149   : > { %1484 = vst.msk [vmem:[%s2703_s16 + $0x20] sm:$0xff] %vm276_vm1, %v1476_v56  ;;  %v1479_v2 = vmax.f32 %v1471_v0, 0.0  ;;  %v1470_v4 = vadd.f32 %v1688_v44, %v1455_v57 }
 0x14a   : > { %1483 = vst.msk [vmem:[%s2703_s16 + $0x18] sm:$0xff] %vm276_vm1, %v1475_v42  ;;  %v1474_v60 = vmax.f32 %v1466_v51, 0.0 }
 0x14b   : > { %1487 = vst.msk [vmem:[%s2703_s16 + $0x38] sm:$0xff] %vm276_vm1, %v1479_v2  ;;  %v1478_v10 = vmax.f32 %v1470_v4, 0.0 }
 0x14c   : > { %1482 = vst.msk [vmem:[%s2703_s16 + $0x10] sm:$0xff] %vm276_vm1, %v1474_v60 }
 0x14d   : > { %1486 = vst.msk [vmem:[%s2703_s16 + $0x30] sm:$0xff] %vm276_vm1, %v1478_v10 }
 0x14e PF: > { %s14_s15 = sadd.s32 1, %s2119_s15  }
 0x14f   : > { %p11_p4 = scmp.ge.s32.totalorder %s14_s15, 4  }
 0x151   :  { %13 = sbr.rel (!%p11_p4) target bundleno = 1 (0x1), region = 74 }

// kernel: discrete_support_value_forward.9
= control target key start
LH: loop header
LB: loop body
LE: loop exit
PB: predicated region body
PF: predicated region fallthrough
CT: control target
= control target key end

     0   :  { %s2237_s18 = smov 0   ;;  %s2832_s0 = inlined_call_operand.vmem [shape: f32[2,10,10,64], index: 0, kind: input, shape index: {}]   ;;  %s2833_s1 = inlined_call_operand.vmem [shape: f32[9,64,64], index: 1, kind: input, shape index: {}]   ;;  %s2834_s2 = inlined_call_operand.vmem [shape: f32[1,64], index: 2, kind: input, shape index: {}]   ;;  %s2835_s3 = inlined_call_operand.vmem [shape: f32[1,64], index: 3, kind: input, shape index: {}]   ;;  %s2836_s4 = inlined_call_operand.vmem [shape: f32[2,8,8,64], index: 4, kind: input, shape index: {}]   ;;  %s2837_s5 = inlined_call_operand.vmem [shape: f32[2,8,8,64], index: 5, kind: output, shape index: {}]  }
   0x1 LB: > { %s1626_s19 = sadd.s32 4294967295, %s2205_s18   ;;  %p1630_p0 = scmp.ge.s32.totalorder %s2205_s18, 1  ;;  %s2205_s18 = sphi %s2237_s18, %s15_s18  }
   0x2   : > { %p197_p1 = scmp.lt.s32.totalorder %s2205_s18, 3 }
   0x4   : > { %p198_p2 = pnand %p1630_p0, %p197_p1 }
   0x6   : > { %201 = sbr.rel (%p198_p2) target bundleno = 338 (0x152), region = 40 }
   0xb   : > { %v1643_v0 = vld [vmem:[%s2833_s1 + $0x78] sm:$0xff]  ;;  %v1642_v2 = vld [vmem:[%s2833_s1 + $0x70] sm:$0xff]  ;;  %p230_p3 = scmp.lt.s32.totalorder %s1626_s19, 1  ;;  %v1641_v4 = vld [vmem:[%s2833_s1 + $0x68] sm:$0xff]  ;;  %vm289_vm0 = vcmask 1046528   ;;  %vm323_vm1 = vcmask 523264  }
   0xc   : > { %v272_v1 = vld [vmem:[%s2833_s1 + $0x38] sm:$0xff]  ;;  %1922 = vmatprep.subr.mxu0 %v1643_v0  ;;  %v271_v3 = vld [vmem:[%s2833_s1 + $0x30] sm:$0xff]  ;;  %v270_v5 = vld [vmem:[%s2833_s1 + $0x28] sm:$0xff]  ;;  %vm566_vm2 = vcmask 1045504  }
   0xd   : > { %1950 = vmatprep.subr.mxu1 %v272_v1  ;;  %1923 = vmatpush3.msra.mxu0 %v1643_v0  ;;  %s2851_s19 = smov (!%p230_p3, %s1626_s19), 1  ;;  %v1640_v6 = vld [vmem:[%s2833_s1 + $0x60] sm:$0xff]  ;;  %v1639_v8 = vld [vmem:[%s2833_s1 + $0x58] sm:$0xff]  ;;  %v1638_v10 = vld [vmem:[%s2833_s1 + $0x50] sm:$0xff] }
   0xe   : > { %1951 = vmatpush3.msra.mxu1 %v272_v1  ;;  %1924 = vmatprep.subr.mxu0 %v1642_v2  ;;  %v269_v7 = vld [vmem:[%s2833_s1 + $0x20] sm:$0xff]  ;;  %s2190_s11 = smul.u32 160, %s2851_s19  ;;  %v268_v9 = vld [vmem:[%s2833_s1 + $0x18] sm:$0xff]  ;;  %v267_v13 = vld [vmem:[%s2833_s1 + $0x10] sm:$0xff]  ;;  %s1776_s6 = sshll.u32 %s2851_s19, 6 }
   0xf   : > { %1952 = vmatprep.subr.mxu1 %v271_v3  ;;  %1925 = vmatpush3.msra.mxu0 %v1642_v2  ;;  %v1637_v18 = vld [vmem:[%s2833_s1 + $0x48] sm:$0xff]  ;;  %v1636_v20 = vld [vmem:[%s2833_s1 + $0x40] sm:$0xff]  ;;  %v1667_v32 = vld [vmem:[%s2833_s1 + $0xb8] sm:$0xff]  ;;  %s2794_s12 = scalar_lea.vmem %s2836_s4, %s1776_s6  ;;  %s2807_s15 = scalar_lea.vmem %s2837_s5, %s1776_s6 }
  0x10   : > { %1953 = vmatpush3.msra.mxu1 %v271_v3  ;;  %1926 = vmatprep.subr.mxu0 %v1641_v4  ;;  %s2281_s20 = scalar_lea.vmem %s2832_s0, %s2190_s11  ;;  %v266_v19 = vld [vmem:[%s2833_s1 + $0x8] sm:$0xff]  ;;  %v265_v23 = vld [vmem:[%s2833_s1] sm:$0xff]  ;;  %v1683_v33 = vld [vmem:[%s2833_s1 + $0xf8] sm:$0xff] }
  0x11   : > { %1954 = vmatprep.subr.mxu1 %v270_v5  ;;  %1927 = vmatpush3.msra.mxu0 %v1641_v4  ;;  %v2287_v11 = vld [vmem:[%s2281_s20] sm:$0xff]  ;;  %v2290_v12 = vld [vmem:[%s2281_s20 + $0x8] sm:$0x3]  ;;  %v2296_v14 = vld [vmem:[%s2281_s20 + $0x10] sm:$0xff] }
  0x12   : > { %1955 = vmatpush3.msra.mxu1 %v270_v5  ;;  %1928 = vmatprep.subr.mxu0 %v1640_v6  ;;  %v2299_v15 = vld [vmem:[%s2281_s20 + $0x18] sm:$0x3]  ;;  %v290_v16 = vrot.slane %v2287_v11, 1  ;;  %v291_v17 = vrot.slane %v2290_v12, 1  ;;  %v293_v21 = vrot.slane %v2296_v14, 1  ;;  %v2318_v24 = vld [vmem:[%s2281_s20 + $0x20] sm:$0xff] }
  0x13   : > { %1956 = vmatprep.subr.mxu1 %v269_v7  ;;  %1929 = vmatpush3.msra.mxu0 %v1640_v6  ;;  %v294_v22 = vrot.slane %v2299_v15, 1  ;;  %v2321_v25 = vld [vmem:[%s2281_s20 + $0x28] sm:$0x3]  ;;  %v2325_v27 = vld [vmem:[%s2281_s20 + $0x30] sm:$0xff]  ;;  %v2328_v28 = vld [vmem:[%s2281_s20 + $0x38] sm:$0x3] }
  0x14   : > { %1957 = vmatpush3.msra.mxu1 %v269_v7  ;;  %1930 = vmatprep.subr.mxu0 %v1639_v8  ;;  %v292_v26 = vsel %vm289_vm0, %v290_v16, %v291_v17  ;;  %v296_v30 = vrot.slane %v2318_v24, 1  ;;  %v297_v31 = vrot.slane %v2321_v25, 1  ;;  %v1666_v34 = vld [vmem:[%s2833_s1 + $0xb0] sm:$0xff]  ;;  %v299_v35 = vrot.slane %v2325_v27, 1  ;;  %v2357_v38 = vld [vmem:[%s2281_s20 + $0x40] sm:$0xff]  ;;  %v1665_v46 = vld [vmem:[%s2833_s1 + $0xa8] sm:$0xff] }
  0x15   : > { %1958 = vmatprep.subr.mxu1 %v268_v9  ;;  %1931 = vmatpush3.msra.mxu0 %v1639_v8  ;;  %v2331_v29 = vsel %vm289_vm0, %v293_v21, %v294_v22  ;;  %v300_v36 = vrot.slane %v2328_v28, 1  ;;  %v1682_v37 = vld [vmem:[%s2833_s1 + $0xf0] sm:$0xff]  ;;  %v2360_v39 = vld [vmem:[%s2281_s20 + $0x48] sm:$0x3]  ;;  %v2369_v42 = vld [vmem:[%s2281_s20 + $0x58] sm:$0x3] }
  0x16   : > { %1959 = vmatpush3.msra.mxu1 %v268_v9  ;;  %1932 = vmatprep.subr.mxu0 %v1638_v10  ;;  %v2363_v40 = vsel %vm289_vm0, %v296_v30, %v297_v31  ;;  %v2366_v41 = vld [vmem:[%s2281_s20 + $0x50] sm:$0xff]  ;;  %v302_v44 = vrot.slane %v2357_v38, 1  ;;  %v303_v45 = vrot.slane %v2360_v39, 1  ;;  %v1681_v47 = vld [vmem:[%s2833_s1 + $0xe8] sm:$0xff]  ;;  %v2387_v48 = vld [vmem:[%s2281_s20 + $0x60] sm:$0xff]  ;;  %v306_v50 = vrot.slane %v2369_v42, 1 }
  0x17   : > { %1960 = vmatprep.subr.mxu1 %v267_v13  ;;  %1933 = vmatpush3.msra.mxu0 %v1638_v10  ;;  %v2372_v43 = vsel %vm289_vm0, %v299_v35, %v300_v36  ;;  %v305_v49 = vrot.slane %v2366_v41, 1  ;;  %v2392_v51 = vld [vmem:[%s2281_s20 + $0x68] sm:$0x3]  ;;  %v1664_v52 = vld [vmem:[%s2833_s1 + $0xa0] sm:$0xff]  ;;  %v308_v56 = vrot.slane %v2387_v48, 1  ;;  %v2414_v59 = vld [vmem:[%s2281_s20 + $0x70] sm:$0xff] }
  0x18   : > { %1961 = vmatpush3.msra.mxu1 %v267_v13  ;;  %1934 = vmatprep.subr.mxu0 %v1637_v18  ;;  %v1680_v53 = vld [vmem:[%s2833_s1 + $0xe0] sm:$0xff]  ;;  %v2408_v55 = vsel %vm289_vm0, %v302_v44, %v303_v45  ;;  %v309_v58 = vrot.slane %v2392_v51, 1  ;;  %v2417_v60 = vld [vmem:[%s2281_s20 + $0x78] sm:$0x3]  ;;  %v2420_v61 = vld [vmem:[%s2281_s20 + $0x88] sm:$0x3] }
  0x19   : > { %1962 = vmatprep.subr.mxu1 %v266_v19  ;;  %1935 = vmatpush3.msra.mxu0 %v1637_v18  ;;  %v2405_v54 = vld [vmem:[%s2281_s20 + $0x80] sm:$0xff]  ;;  %v2423_v62 = vsel %vm289_vm0, %v305_v49, %v306_v50  ;;  %v856_v63 = vrot.slane %v2420_v61, 1  ;;  %v1663_v0 = vld [vmem:[%s2833_s1 + $0x98] sm:$0xff]  ;;  %v1662_v2 = vld [vmem:[%s2833_s1 + $0x90] sm:$0xff]  ;;  %v311_v3 = vrot.slane %v2414_v59, 1  ;;  %v312_v4 = vrot.slane %v2417_v60, 1 }
  0x1a   : > { %1963 = vmatpush3.msra.mxu1 %v266_v19  ;;  %1936 = vmatprep.subr.mxu0 %v1636_v20  ;;  %v855_v57 = vrot.slane %v2405_v54, 1  ;;  %v1679_v1 = vld [vmem:[%s2833_s1 + $0xd8] sm:$0xff]  ;;  %v1678_v6 = vld [vmem:[%s2833_s1 + $0xd0] sm:$0xff]  ;;  %v2452_v7 = vsel %vm289_vm0, %v308_v56, %v309_v58  ;;  %v568_v18 = vrot.slane %v2290_v12, 2  ;;  %v1661_v12 = vld [vmem:[%s2833_s1 + $0x88] sm:$0xff]  ;;  %v577_v44 = vrot.slane %v2328_v28, 2 }
  0x1b   : > { %1964 = vmatprep.subr.mxu1 %v265_v23  ;;  %1937 = vmatpush3.msra.mxu0 %v1636_v20  ;;  %v2455_v8 = vld [vmem:[%s2281_s20 + $0x90] sm:$0xff]  ;;  %v264_v9 = vld [vmem:[%s2281_s20 + $0x98] sm:$0x3]  ;;  %v2462_v19 = vsel %vm289_vm0, %v311_v3, %v312_v4  ;;  %v567_v20 = vrot.slane %v2287_v11, 2  ;;  %v1660_v30 = vld [vmem:[%s2833_s1 + $0x80] sm:$0xff]  ;;  %v585_v58 = vrot.slane %v2387_v48, 2 }
  0x1c   : > { %1938 = vmatprep.mubr.msk.f32.mxu0 %vm323_vm1, %v292_v26  ;;  %1965 = vmatpush3.msra.mxu1 %v265_v23  ;;  %v2442_v5 = vsel %vm289_vm0, %v855_v57, %v856_v63  ;;  %v1235_v10 = vrot.slane %v2455_v8, 1  ;;  %v1362_v13 = vrot.slane %v2455_v8, 2  ;;  %v1236_v16 = vrot.slane %v264_v9, 1  ;;  %v1676_v31 = vld [vmem:[%s2833_s1 + $0xc0] sm:$0xff]  ;;  %v1699_v35 = vld [vmem:[%s2833_s1 + $0x138] sm:$0xff]  ;;  %v1714_v45 = vld [vmem:[%s2833_s1 + $0x170] sm:$0xff] }
  0x1d   : > { %1966 = vmatprep.mubr.msk.f32.mxu1 %vm323_vm1, %v2287_v11  ;;  %1939 = vmatmul.mubr.msk.f32.vlgmr.msra.gmra.mxu0 %vm323_vm1, %v2331_v29  ;;  %v1363_v17 = vrot.slane %v264_v9, 2  ;;  %v1677_v11 = vld [vmem:[%s2833_s1 + $0xc8] sm:$0xff]  ;;  %v571_v23 = vrot.slane %v2299_v15, 2  ;;  %v570_v26 = vrot.slane %v2296_v14, 2  ;;  %v569_v15 = vsel %vm566_vm2, %v567_v20, %v568_v18  ;;  %v1715_v36 = vld [vmem:[%s2833_s1 + $0x178] sm:$0xff]  ;;  %v1712_v56 = vld [vmem:[%s2833_s1 + $0x160] sm:$0xff] }
  0x1e   : > { %1967 = vmatmul.mubr.msk.f32.vlgmr.msra.gmra.mxu1 %vm323_vm1, %v2296_v14  ;;  %1978 = vmatprep.subr.mxu0 %v1667_v32  ;;  %v2466_v21 = vsel %vm289_vm0, %v1235_v10, %v1236_v16  ;;  %v1697_v49 = vld [vmem:[%s2833_s1 + $0x128] sm:$0xff]  ;;  %v586_v63 = vrot.slane %v2392_v51, 2  ;;  %v589_v51 = vrot.slane %v2417_v60, 2  ;;  %v1694_v3 = vld [vmem:[%s2833_s1 + $0x110] sm:$0xff]  ;;  %v1708_v16 = vld [vmem:[%s2833_s1 + $0x140] sm:$0xff] }
  0x1f   : > { %2006 = vmatprep.subr.mxu1 %v1683_v33  ;;  %1979 = vmatpush3.msra.mxu0 %v1667_v32  ;;  %v2469_v22 = vsel %vm566_vm2, %v1362_v13, %v1363_v17  ;;  %v2495_v32 = vsel %vm566_vm2, %v570_v26, %v571_v23  ;;  %v1713_v50 = vld [vmem:[%s2833_s1 + $0x168] sm:$0xff]  ;;  %v1710_v4 = vld [vmem:[%s2833_s1 + $0x150] sm:$0xff]  ;;  %v1692_v13 = vld [vmem:[%s2833_s1 + $0x100] sm:$0xff] }
  0x20   : > { %2007 = vmatpush3.msra.mxu1 %v1683_v33  ;;  %1980 = vmatprep.subr.mxu0 %v1666_v34  ;;  %v573_v33 = vrot.slane %v2318_v24, 2  ;;  %v1693_v9 = vld [vmem:[%s2833_s1 + $0x108] sm:$0xff]  ;;  %v1731_v17 = vld [vmem:[%s2833_s1 + $0x1b8] sm:$0xff]  ;;  %v1746_v20 = vld [vmem:[%s2833_s1 + $0x1f0] sm:$0xff] }
  0x21   : > { %2008 = vmatprep.subr.mxu1 %v1682_v37  ;;  %1941 = vmatprep.mubr.msk.f32.mxu0 %vm323_vm1, %v2363_v40  ;;  %v1709_v10 = vld [vmem:[%s2833_s1 + $0x148] sm:$0xff]  ;;  %v1747_v18 = vld [vmem:[%s2833_s1 + $0x1f8] sm:$0xff]  ;;  %v1728_v23 = vld [vmem:[%s2833_s1 + $0x1a0] sm:$0xff] }
  0x22   : > { %1969 = vmatprep.mubr.msk.f32.mxu1 %vm323_vm1, %v2318_v24  ;;  %1981 = vmatpush3.msra.mxu0 %v1666_v34  ;;  %v574_v34 = vrot.slane %v2321_v25, 2  ;;  %v1698_v25 = vld [vmem:[%s2833_s1 + $0x130] sm:$0xff]  ;;  %v1744_v26 = vld [vmem:[%s2833_s1 + $0x1e0] sm:$0xff] }
  0x23   : > { %2009 = vmatpush3.msra.mxu1 %v1682_v37  ;;  %1942 = vmatmul.mubr.msk.f32.gmra.mxu0 %vm323_vm1, %v2372_v43  ;;  %v576_v37 = vrot.slane %v2325_v27, 2 }
  0x24   : > { %1970 = vmatmul.mubr.msk.f32.gmra.mxu1 %vm323_vm1, %v2325_v27  ;;  %1982 = vmatprep.subr.mxu0 %v1665_v46 }
  0x25   : > { %2010 = vmatprep.subr.mxu1 %v1681_v47  ;;  %1983 = vmatpush3.msra.mxu0 %v1665_v46  ;;  %v2524_v28 = vsel %vm566_vm2, %v576_v37, %v577_v44  ;;  %v579_v46 = vrot.slane %v2357_v38, 2  ;;  %v1724_v37 = vld [vmem:[%s2833_s1 + $0x180] sm:$0xff] }
  0x26   : > { %2011 = vmatpush3.msra.mxu1 %v1681_v47  ;;  %1984 = vmatprep.subr.mxu0 %v1664_v52  ;;  %v580_v47 = vrot.slane %v2360_v39, 2  ;;  %v583_v39 = vrot.slane %v2369_v42, 2  ;;  %v1740_v44 = vld [vmem:[%s2833_s1 + $0x1c0] sm:$0xff] }
  0x27   : > { %2012 = vmatprep.subr.mxu1 %v1680_v53  ;;  %1944 = vmatprep.mubr.msk.f32.mxu0 %vm323_vm1, %v2408_v55 }
  0x28   : > { %1972 = vmatprep.mubr.msk.f32.mxu1 %vm323_vm1, %v2357_v38  ;;  %1985 = vmatpush3.msra.mxu0 %v1664_v52  ;;  %v582_v52 = vrot.slane %v2366_v41, 2  ;;  %v2551_v57 = vsel %vm566_vm2, %v579_v46, %v580_v47 }
  0x29   : > { %2013 = vmatpush3.msra.mxu1 %v1680_v53  ;;  %1945 = vmatmul.mubr.msk.f32.gmra.mxu0 %vm323_vm1, %v2423_v62  ;;  %v1696_v53 = vld [vmem:[%s2833_s1 + $0x120] sm:$0xff] }
  0x2a   : > { %1973 = vmatmul.mubr.msk.f32.gmra.mxu1 %vm323_vm1, %v2366_v41  ;;  %1986 = vmatprep.subr.mxu0 %v1663_v0  ;;  %v2554_v42 = vsel %vm566_vm2, %v582_v52, %v583_v39 }
  0x2b   : > { %2014 = vmatprep.subr.mxu1 %v1679_v1  ;;  %1987 = vmatpush3.msra.mxu0 %v1663_v0  ;;  %v1695_v0 = vld [vmem:[%s2833_s1 + $0x118] sm:$0xff] }
  0x2c   : > { %2015 = vmatpush3.msra.mxu1 %v1679_v1  ;;  %1988 = vmatprep.subr.mxu0 %v1662_v2  ;;  %v1711_v1 = vld [vmem:[%s2833_s1 + $0x158] sm:$0xff] }
  0x2d   : > { %2016 = vmatprep.subr.mxu1 %v1678_v6  ;;  %1947 = vmatprep.mubr.msk.f32.mxu0 %vm323_vm1, %v2452_v7 }
  0x2e   : > { %1975 = vmatprep.mubr.msk.f32.mxu1 %vm323_vm1, %v2387_v48  ;;  %1989 = vmatpush3.msra.mxu0 %v1662_v2  ;;  %v588_v2 = vrot.slane %v2414_v59, 2 }
  0x2f   : > { %2017 = vmatpush3.msra.mxu1 %v1678_v6  ;;  %1948 = vmatmul.mubr.msk.f32.gmra.mxu0 %vm323_vm1, %v2462_v19  ;;  %v2581_v6 = vsel %vm566_vm2, %v585_v58, %v586_v63 }
  0x30   : > { %1976 = vmatmul.mubr.msk.f32.gmra.mxu1 %vm323_vm1, %v2414_v59  ;;  %1990 = vmatprep.subr.mxu0 %v1661_v12  ;;  %v2584_v60 = vsel %vm566_vm2, %v588_v2, %v589_v51 }
  0x31   : > { %2018 = vmatprep.subr.mxu1 %v1677_v11  ;;  %1991 = vmatpush3.msra.mxu0 %v1661_v12  ;;  %v1729_v12 = vld [vmem:[%s2833_s1 + $0x1a8] sm:$0xff] }
  0x32   : > { %2019 = vmatpush3.msra.mxu1 %v1677_v11  ;;  %1992 = vmatprep.subr.mxu0 %v1660_v30  ;;  %v1745_v11 = vld [vmem:[%s2833_s1 + $0x1e8] sm:$0xff] }
  0x33   : > { %2020 = vmatprep.subr.mxu1 %v1676_v31  ;;  %1993 = vmatpush3.msra.mxu0 %v1660_v30  ;;  %v1727_v30 = vld [vmem:[%s2833_s1 + $0x198] sm:$0xff] }
  0x34   : > { %1994 = vmatprep.mubr.msk.f32.mxu0 %vm323_vm1, %v569_v15  ;;  %2021 = vmatpush3.msra.mxu1 %v1676_v31  ;;  %v1743_v31 = vld [vmem:[%s2833_s1 + $0x1d8] sm:$0xff]  ;;  %v982_v15 = vrot.slane %v2405_v54, 2 }
  0x35   : > { %2022 = vmatprep.mubr.msk.f32.mxu1 %vm323_vm1, %v2296_v14  ;;  %1995 = vmatmul.mubr.msk.f32.vlgmr.msra.gmra.mxu0 %vm323_vm1, %v2495_v32  ;;  %v2521_v14 = vsel %vm566_vm2, %v573_v33, %v574_v34  ;;  %v1726_v33 = vld [vmem:[%s2833_s1 + $0x190] sm:$0xff] }
  0x36   : > { %2023 = vmatmul.mubr.msk.f32.vlgmr.msra.gmra.mxu1 %vm323_vm1, %v2318_v24  ;;  %2034 = vmatprep.subr.mxu0 %v1699_v35  ;;  %v1742_v34 = vld [vmem:[%s2833_s1 + $0x1d0] sm:$0xff] }
  0x37   : > { %2062 = vmatprep.subr.mxu1 %v1715_v36  ;;  %2035 = vmatpush3.msra.mxu0 %v1699_v35  ;;  %v1725_v35 = vld [vmem:[%s2833_s1 + $0x188] sm:$0xff] }
  0x38   : > { %2063 = vmatpush3.msra.mxu1 %v1715_v36  ;;  %2036 = vmatprep.subr.mxu0 %v1698_v25  ;;  %v1741_v36 = vld [vmem:[%s2833_s1 + $0x1c8] sm:$0xff] }
  0x39   : > { %2064 = vmatprep.subr.mxu1 %v1714_v45  ;;  %1997 = vmatprep.mubr.msk.f32.mxu0 %vm323_vm1, %v2521_v14 }
  0x3a   : > { %2025 = vmatprep.mubr.msk.f32.mxu1 %vm323_vm1, %v2325_v27  ;;  %2037 = vmatpush3.msra.mxu0 %v1698_v25  ;;  %v1763_v25 = vld [vmem:[%s2833_s1 + $0x238] sm:$0xff] }
  0x3b   : > { %2065 = vmatpush3.msra.mxu1 %v1714_v45  ;;  %1998 = vmatmul.mubr.msk.f32.gmra.mxu0 %vm323_vm1, %v2524_v28  ;;  %v1762_v45 = vld [vmem:[%s2833_s1 + $0x230] sm:$0xff] }
  0x3c   : > { %2026 = vmatmul.mubr.msk.f32.gmra.mxu1 %vm323_vm1, %v2357_v38  ;;  %2038 = vmatprep.subr.mxu0 %v1697_v49 }
  0x3d   : > { %2066 = vmatprep.subr.mxu1 %v1713_v50  ;;  %2039 = vmatpush3.msra.mxu0 %v1697_v49 }
  0x3e   : > { %2067 = vmatpush3.msra.mxu1 %v1713_v50  ;;  %2040 = vmatprep.subr.mxu0 %v1696_v53 }
  0x3f   : > { %2068 = vmatprep.subr.mxu1 %v1712_v56  ;;  %2000 = vmatprep.mubr.msk.f32.mxu0 %vm323_vm1, %v2551_v57 }
  0x40   : > { %2028 = vmatprep.mubr.msk.f32.mxu1 %vm323_vm1, %v2366_v41  ;;  %2041 = vmatpush3.msra.mxu0 %v1696_v53 }
  0x41   : > { %2069 = vmatpush3.msra.mxu1 %v1712_v56  ;;  %2001 = vmatmul.mubr.msk.f32.gmra.mxu0 %vm323_vm1, %v2554_v42 }
  0x42   : > { %2029 = vmatmul.mubr.msk.f32.gmra.mxu1 %vm323_vm1, %v2387_v48  ;;  %2042 = vmatprep.subr.mxu0 %v1695_v0 }
  0x43   : > { %2070 = vmatprep.subr.mxu1 %v1711_v1  ;;  %2043 = vmatpush3.msra.mxu0 %v1695_v0 }
  0x44   : > { %2071 = vmatpush3.msra.mxu1 %v1711_v1  ;;  %2044 = vmatprep.subr.mxu0 %v1694_v3 }
  0x45   : > { %2072 = vmatprep.subr.mxu1 %v1710_v4  ;;  %2003 = vmatprep.mubr.msk.f32.mxu0 %vm323_vm1, %v2581_v6 }
  0x46   : > { %2031 = vmatprep.mubr.msk.f32.mxu1 %vm323_vm1, %v2414_v59  ;;  %2045 = vmatpush3.msra.mxu0 %v1694_v3 }
  0x47   : > { %2073 = vmatpush3.msra.mxu1 %v1710_v4  ;;  %2004 = vmatmul.mubr.msk.f32.gmra.mxu0 %vm323_vm1, %v2584_v60 }
  0x48   : > { %2032 = vmatmul.mubr.msk.f32.gmra.mxu1 %vm323_vm1, %v2405_v54  ;;  %2046 = vmatprep.subr.mxu0 %v1693_v9 }
  0x49   : > { %2074 = vmatprep.subr.mxu1 %v1709_v10  ;;  %2047 = vmatpush3.msra.mxu0 %v1693_v9 }
  0x4a   : > { %2075 = vmatpush3.msra.mxu1 %v1709_v10  ;;  %2048 = vmatprep.subr.mxu0 %v1692_v13 }
  0x4b   : > { %2076 = vmatprep.subr.mxu1 %v1708_v16  ;;  %2049 = vmatpush3.msra.mxu0 %v1692_v13 }
  0x4c   : > { %2050 = vmatprep.mubr.msk.f32.mxu0 %vm323_vm1, %v2331_v29  ;;  %2077 = vmatpush3.msra.mxu1 %v1708_v16  ;;  %v1730_v29 = vld [vmem:[%s2833_s1 + $0x1b0] sm:$0xff] }
  0x4d   : > { %2078 = vmatprep.mubr.msk.f32.mxu1 %vm323_vm1, %v2495_v32  ;;  %2051 = vmatmul.mubr.msk.f32.vlgmr.msra.gmra.mxu0 %vm323_vm1, %v2363_v40  ;;  %v983_v32 = vrot.slane %v2420_v61, 2 }
  0x4e   : > { %2079 = vmatmul.mubr.msk.f32.vlgmr.msra.gmra.mxu1 %vm323_vm1, %v2521_v14  ;;  %2090 = vmatprep.subr.mxu0 %v1731_v17 }
  0x4f   : > { %2118 = vmatprep.subr.mxu1 %v1747_v18  ;;  %2091 = vmatpush3.msra.mxu0 %v1731_v17  ;;  %v2669_v61 = vsel %vm566_vm2, %v982_v15, %v983_v32 }
  0x50   : > { %2119 = vmatpush3.msra.mxu1 %v1747_v18  ;;  %2092 = vmatprep.subr.mxu0 %v1730_v29 }
  0x51   : > { %2120 = vmatprep.subr.mxu1 %v1746_v20  ;;  %2053 = vmatprep.mubr.msk.f32.mxu0 %vm323_vm1, %v2372_v43 }
  0x52   : > { %2081 = vmatprep.mubr.msk.f32.mxu1 %vm323_vm1, %v2524_v28  ;;  %2093 = vmatpush3.msra.mxu0 %v1730_v29 }
  0x53   : > { %2121 = vmatpush3.msra.mxu1 %v1746_v20  ;;  %2054 = vmatmul.mubr.msk.f32.gmra.mxu0 %vm323_vm1, %v2408_v55 }
  0x54   : > { %2082 = vmatmul.mubr.msk.f32.gmra.mxu1 %vm323_vm1, %v2551_v57  ;;  %2094 = vmatprep.subr.mxu0 %v1729_v12 }
  0x55   : > { %2122 = vmatprep.subr.mxu1 %v1745_v11  ;;  %2095 = vmatpush3.msra.mxu0 %v1729_v12 }
  0x56   : > { %2123 = vmatpush3.msra.mxu1 %v1745_v11  ;;  %2096 = vmatprep.subr.mxu0 %v1728_v23 }
  0x57   : > { %2124 = vmatprep.subr.mxu1 %v1744_v26  ;;  %2056 = vmatprep.mubr.msk.f32.mxu0 %vm323_vm1, %v2423_v62 }
  0x58   : > { %2084 = vmatprep.mubr.msk.f32.mxu1 %vm323_vm1, %v2554_v42  ;;  %2097 = vmatpush3.msra.mxu0 %v1728_v23 }
  0x59   : > { %2125 = vmatpush3.msra.mxu1 %v1744_v26  ;;  %2057 = vmatmul.mubr.msk.f32.gmra.mxu0 %vm323_vm1, %v2452_v7 }
  0x5a   : > { %2085 = vmatmul.mubr.msk.f32.gmra.mxu1 %vm323_vm1, %v2581_v6  ;;  %2098 = vmatprep.subr.mxu0 %v1727_v30 }
  0x5b   : > { %2126 = vmatprep.subr.mxu1 %v1743_v31  ;;  %2099 = vmatpush3.msra.mxu0 %v1727_v30 }
  0x5c   : > { %2127 = vmatpush3.msra.mxu1 %v1743_v31  ;;  %2100 = vmatprep.subr.mxu0 %v1726_v33 }
  0x5d   : > { %2128 = vmatprep.subr.mxu1 %v1742_v34  ;;  %2059 = vmatprep.mubr.msk.f32.mxu0 %vm323_vm1, %v2462_v19 }
  0x5e   : > { %2087 = vmatprep.mubr.msk.f32.mxu1 %vm323_vm1, %v2584_v60  ;;  %2101 = vmatpush3.msra.mxu0 %v1726_v33 }
  0x5f   : > { %2129 = vmatpush3.msra.mxu1 %v1742_v34  ;;  %2060 = vmatmul.mubr.msk.f32.gmra.mxu0 %vm323_vm1, %v2442_v5 }
  0x60   : > { %2088 = vmatmul.mubr.msk.f32.gmra.mxu1 %vm323_vm1, %v2669_v61  ;;  %2102 = vmatprep.subr.mxu0 %v1725_v35 }
  0x61   : > { %2130 = vmatprep.subr.mxu1 %v1741_v36  ;;  %2103 = vmatpush3.msra.mxu0 %v1725_v35 }
  0x62   : > { %2131 = vmatpush3.msra.mxu1 %v1741_v36  ;;  %2104 = vmatprep.subr.mxu0 %v1724_v37 }
  0x63   : > { %2132 = vmatprep.subr.mxu1 %v1740_v44  ;;  %2105 = vmatpush3.msra.mxu0 %v1724_v37 }
  0x64   : > { %2106 = vmatprep.mubr.msk.f32.mxu0 %vm323_vm1, %v2318_v24  ;;  %2133 = vmatpush3.msra.mxu1 %v1740_v44  ;;  %v1761_v24 = vld [vmem:[%s2833_s1 + $0x228] sm:$0xff] }
  0x65   : > { %2134 = vmatprep.mubr.msk.f32.mxu1 %vm323_vm1, %v2363_v40  ;;  %2107 = vmatmul.mubr.msk.f32.vlgmr.msra.gmra.mxu0 %vm323_vm1, %v2325_v27  ;;  %v1760_v27 = vld [vmem:[%s2833_s1 + $0x220] sm:$0xff]  ;;  %v1758_v40 = vld [vmem:[%s2833_s1 + $0x210] sm:$0xff] }
  0x66   : > { %2135 = vmatmul.mubr.msk.f32.vlgmr.msra.gmra.mxu1 %vm323_vm1, %v2372_v43  ;;  %2146 = vmatprep.subr.mxu0 %v1763_v25  ;;  %v1756_v43 = vld [vmem:[%s2833_s1 + $0x200] sm:$0xff] }
  0x67   : > { %2174 = vmatprep.subr.mxu1 %v1763_v25  ;;  %2147 = vmatpush3.msra.mxu0 %v1763_v25 }
  0x68   : > { %2182 = vmatpush3.msra.mxu1 %v1763_v25  ;;  %2148 = vmatprep.subr.mxu0 %v1762_v45 }
  0x69   : > { %2175 = vmatprep.subr.mxu1 %v1762_v45  ;;  %2109 = vmatprep.mubr.msk.f32.mxu0 %vm323_vm1, %v2357_v38  ;;  %v1759_v38 = vld [vmem:[%s2833_s1 + $0x218] sm:$0xff] }
  0x6a   : > { %2137 = vmatprep.mubr.msk.f32.mxu1 %vm323_vm1, %v2408_v55  ;;  %2149 = vmatpush3.msra.mxu0 %v1762_v45 }
  0x6b   : > { %2183 = vmatpush3.msra.mxu1 %v1762_v45  ;;  %2110 = vmatmul.mubr.msk.f32.gmra.mxu0 %vm323_vm1, %v2366_v41  ;;  %v1757_v41 = vld [vmem:[%s2833_s1 + $0x208] sm:$0xff] }
  0x6c   : > { %2138 = vmatmul.mubr.msk.f32.gmra.mxu1 %vm323_vm1, %v2423_v62  ;;  %2150 = vmatprep.subr.mxu0 %v1761_v24 }
  0x6d   : > { %2176 = vmatprep.subr.mxu1 %v1761_v24  ;;  %2151 = vmatpush3.msra.mxu0 %v1761_v24 }
  0x6e   : > { %2184 = vmatpush3.msra.mxu1 %v1761_v24  ;;  %2152 = vmatprep.subr.mxu0 %v1760_v27 }
  0x6f   : > { %2177 = vmatprep.subr.mxu1 %v1760_v27  ;;  %2112 = vmatprep.mubr.msk.f32.mxu0 %vm323_vm1, %v2387_v48 }
  0x70   : > { %2140 = vmatprep.mubr.msk.f32.mxu1 %vm323_vm1, %v2452_v7  ;;  %2153 = vmatpush3.msra.mxu0 %v1760_v27 }
  0x71   : > { %2185 = vmatpush3.msra.mxu1 %v1760_v27  ;;  %2113 = vmatmul.mubr.msk.f32.gmra.mxu0 %vm323_vm1, %v2414_v59 }
  0x72   : > { %2141 = vmatmul.mubr.msk.f32.gmra.mxu1 %vm323_vm1, %v2462_v19  ;;  %2154 = vmatprep.subr.mxu0 %v1759_v38 }
  0x73   : > { %2178 = vmatprep.subr.mxu1 %v1759_v38  ;;  %2155 = vmatpush3.msra.mxu0 %v1759_v38 }
  0x74   : > { %2186 = vmatpush3.msra.mxu1 %v1759_v38  ;;  %2156 = vmatprep.subr.mxu0 %v1758_v40 }
  0x75   : > { %2179 = vmatprep.subr.mxu1 %v1758_v40  ;;  %2115 = vmatprep.mubr.msk.f32.mxu0 %vm323_vm1, %v2405_v54 }
  0x76   : > { %2143 = vmatprep.mubr.msk.f32.mxu1 %vm323_vm1, %v2442_v5  ;;  %2157 = vmatpush3.msra.mxu0 %v1758_v40 }
  0x77   : > { %2187 = vmatpush3.msra.mxu1 %v1758_v40  ;;  %2116 = vmatmul.mubr.msk.f32.gmra.mxu0 %vm323_vm1, %v2455_v8 }
  0x78   : > { %2144 = vmatmul.mubr.msk.f32.gmra.mxu1 %vm323_vm1, %v2466_v21  ;;  %2158 = vmatprep.subr.mxu0 %v1757_v41 }
  0x79   : > { %2180 = vmatprep.subr.mxu1 %v1757_v41  ;;  %2159 = vmatpush3.msra.mxu0 %v1757_v41 }
  0x7a   : > { %2188 = vmatpush3.msra.mxu1 %v1757_v41  ;;  %2160 = vmatprep.subr.mxu0 %v1756_v43 }
  0x7b   : > { %2181 = vmatprep.subr.mxu1 %v1756_v43  ;;  %2161 = vmatpush3.msra.mxu0 %v1756_v43 }
  0x7c   : > { %2189 = vmatpush3.msra.mxu1 %v1756_v43  ;;  %2162 = vmatprep.mubr.msk.f32.mxu0 %vm323_vm1, %v2521_v14 }
  0x7d   : > { %2168 = vmatprep.mubr.msk.f32.mxu1 %vm323_vm1, %v2581_v6  ;;  %2163 = vmatmul.mubr.msk.f32.vlgmr.msra.gmra.mxu0 %vm323_vm1, %v2524_v28 }
  0x7e   : > { %2169 = vmatmul.mubr.msk.f32.vlgmr.msra.gmra.mxu1 %vm323_vm1, %v2584_v60  ;;  %2165 = vmatprep.mubr.msk.f32.mxu0 %vm323_vm1, %v2551_v57 }
  0x7f   : > { %2171 = vmatprep.mubr.msk.f32.mxu1 %vm323_vm1, %v2669_v61 }
  0x81   : > { %2166 = vmatmul.mubr.msk.f32.gmra.mxu0 %vm323_vm1, %v2554_v42 }
  0x82   : > { %2172 = vmatmul.mubr.msk.f32.gmra.mxu1 %vm323_vm1, %v2469_v22 }
  0xdd   : > { %v1940_v48 = vpop.f32.mrf.mxu0 }
  0xde   : > { %v1968_v54 = vpop.f32.mrf.mxu1 }
  0xdf   : > { %v406_v55 = vpop.f32.mrf.mxu0  ;;  %v533_v35 = vadd.f32 %v1968_v54, %v1940_v48 }
  0xe0   : > { %v527_v59 = vpop.f32.mrf.mxu1 }
  0xe1   : > { %v528_v25 = vadd.f32 %v527_v59, %v406_v55 }
  0xe3   : > { %v1943_v62 = vpop.f32.mrf.mxu0 }
  0xe4   : > { %v1971_v5 = vpop.f32.mrf.mxu1 }
  0xe5   : > { %v416_v7 = vpop.f32.mrf.mxu0 }
  0xe6   : > { %v537_v8 = vpop.f32.mrf.mxu1 }
  0xe9   : > { %v1946_v19 = vpop.f32.mrf.mxu0 }
  0xea   : > { %v1974_v21 = vpop.f32.mrf.mxu1 }
  0xeb   : > { %v426_v14 = vpop.f32.mrf.mxu0  ;;  %v553_v36 = vadd.f32 %v1974_v21, %v1946_v19 }
  0xec   : > { %v547_v28 = vpop.f32.mrf.mxu1 }
  0xed   : > { %v548_v45 = vadd.f32 %v547_v28, %v426_v14 }
  0xef   : > { %v1949_v46 = vpop.f32.mrf.mxu0 }
  0xf0   : > { %v1977_v47 = vpop.f32.mrf.mxu1 }
  0xf1   : > { %v436_v49 = vpop.f32.mrf.mxu0 }
  0xf2   : > { %v557_v50 = vpop.f32.mrf.mxu1 }
  0xf3   : > { %v558_v48 = vadd.f32 %v557_v50, %v436_v49 }
  0xf5   : > { %v1996_v52 = vpop.f32.mrf.mxu0 }
  0xf6   : > { %v2024_v39 = vpop.f32.mrf.mxu1  ;;  %v722_v24 = vadd.f32 %v1996_v52, %v533_v35 }
  0xf7   : > { %v682_v53 = vpop.f32.mrf.mxu0 }
  0xf8   : > { %v807_v22 = vpop.f32.mrf.mxu1  ;;  %v721_v41 = vadd.f32 %v682_v53, %v528_v25 }
  0xfa   : > { %v846_v55 = vadd.f32 %v807_v22, %v721_v41 }
  0xfb   : > { %v1999_v56 = vpop.f32.mrf.mxu0 }
  0xfc   : > { %v2763_v57 = vpop.f32.mrf.mxu1 }
  0xfd   : > { %2838 = vst [vmem:[#allocation2_spill] sm:$0xff] %v2763_v57  ;;  %v692_v42 = vpop.f32.mrf.mxu0 }
  0xfe   : > { %v2765_v58 = vpop.f32.mrf.mxu1 }
  0xff   : > { %2839 = vst [vmem:[#allocation3_spill] sm:$0xff] %v2765_v58  ;;  %v847_v58 = vadd.f32 %v2024_v39, %v722_v24 }
 0x101   : > { %v2002_v63 = vpop.f32.mrf.mxu0 }
 0x102   : > { %v2030_v0 = vpop.f32.mrf.mxu1  ;;  %v726_v27 = vadd.f32 %v2002_v63, %v553_v36 }
 0x103   : > { %v702_v1 = vpop.f32.mrf.mxu0 }
 0x104   : > { %v827_v2 = vpop.f32.mrf.mxu1  ;;  %v725_v43 = vadd.f32 %v702_v1, %v548_v45  ;;  %v851_v57 = vadd.f32 %v2030_v0, %v726_v27 }
 0x106   : > { %v850_v59 = vadd.f32 %v827_v2, %v725_v43 }
 0x107   : > { %v2005_v51 = vpop.f32.mrf.mxu0 }
 0x108   : > { %v2033_v3 = vpop.f32.mrf.mxu1 }
 0x109   : > { %v712_v4 = vpop.f32.mrf.mxu0 }
 0x10a   : > { %v837_v6 = vpop.f32.mrf.mxu1  ;;  %v727_v63 = vadd.f32 %v712_v4, %v558_v48 }
 0x10c   : > { %v852_v50 = vadd.f32 %v837_v6, %v727_v63 }
 0x10d   : > { %v2052_v60 = vpop.f32.mrf.mxu0 }
 0x10e   : > { %v2080_v9 = vpop.f32.mrf.mxu1  ;;  %v975_v14 = vadd.f32 %v2052_v60, %v847_v58 }
 0x10f   : > { %v935_v10 = vpop.f32.mrf.mxu0 }
 0x110   : > { %v1062_v13 = vpop.f32.mrf.mxu1  ;;  %v974_v53 = vadd.f32 %v935_v10, %v846_v55 }
 0x112   : > { %v1101_v58 = vadd.f32 %v1062_v13, %v974_v53  ;;  %v1532_v53 = vld [vmem:[%s2794_s12 + $0x28] sm:$0xff] }
 0x113   : > { %v2055_v16 = vpop.f32.mrf.mxu0 }
 0x114   : > { %v2767_v17 = vpop.f32.mrf.mxu1 }
 0x115   : > { %2840 = vst [vmem:[#allocation4_spill] sm:$0xff] %v2767_v17  ;;  %v945_v18 = vpop.f32.mrf.mxu0  ;;  %v563_v17 = vadd.f32 %v1977_v47, %v1949_v46  ;;  %v1102_v47 = vadd.f32 %v2080_v9, %v975_v14 }
 0x116   : > { %v2769_v29 = vpop.f32.mrf.mxu1 }
 0x117   : > { %2841 = vst [vmem:[#allocation5_spill] sm:$0xff] %v2769_v29  ;;  %v543_v29 = vadd.f32 %v1971_v5, %v1943_v62  ;;  %v728_v19 = vadd.f32 %v2005_v51, %v563_v17  ;;  %v2844_v62 = vld [vmem:[#allocation2_spill] sm:$0xff] }
 0x119   : > { %v2058_v20 = vpop.f32.mrf.mxu0  ;;  %v724_v54 = vadd.f32 %v1999_v56, %v543_v29  ;;  %v853_v46 = vadd.f32 %v2033_v3, %v728_v19 }
 0x11a   : > { %v2086_v12 = vpop.f32.mrf.mxu1  ;;  %v979_v28 = vadd.f32 %v2058_v20, %v851_v57 }
 0x11b   : > { %v955_v11 = vpop.f32.mrf.mxu0  ;;  %v849_v5 = vadd.f32 %v2844_v62, %v724_v54 }
 0x11c   : > { %v1082_v23 = vpop.f32.mrf.mxu1  ;;  %v978_v1 = vadd.f32 %v955_v11, %v850_v59  ;;  %v2846_v9 = vld [vmem:[#allocation4_spill] sm:$0xff] }
 0x11d   : > { %v977_v39 = vadd.f32 %v2055_v16, %v849_v5 }
 0x11e   : > { %v1105_v57 = vadd.f32 %v1082_v23, %v978_v1  ;;  %v2847_v16 = vld [vmem:[#allocation5_spill] sm:$0xff] }
 0x11f   : > { %v2061_v26 = vpop.f32.mrf.mxu0  ;;  %v1104_v29 = vadd.f32 %v2846_v9, %v977_v39  ;;  %v1531_v39 = vld [vmem:[%s2794_s12 + $0x20] sm:$0xff] }
 0x120   : > { %v2089_v30 = vpop.f32.mrf.mxu1  ;;  %v981_v56 = vadd.f32 %v2061_v26, %v853_v46 }
 0x121   : > { %v965_v31 = vpop.f32.mrf.mxu0 }
 0x122   : > { %v1092_v15 = vpop.f32.mrf.mxu1  ;;  %v980_v4 = vadd.f32 %v965_v31, %v852_v50  ;;  %v1108_v20 = vadd.f32 %v2089_v30, %v981_v56  ;;  %v1527_v50 = vld [vmem:[%s2794_s12] sm:$0xff] }
 0x124   : > { %v1107_v26 = vadd.f32 %v1092_v15, %v980_v4  ;;  %v1773_v15 = vld [vmem:[%s2835_s3] ss:$0 sm:$0xff] }
 0x125   : > { %v2108_v32 = vpop.f32.mrf.mxu0 }
 0x126   : > { %v2136_v33 = vpop.f32.mrf.mxu1 }
 0x127   : > { %v1187_v34 = vpop.f32.mrf.mxu0 }
 0x128   : > { %v2771_v61 = vpop.f32.mrf.mxu1  ;;  %v1226_v17 = vadd.f32 %v1187_v34, %v1101_v58 }
 0x129   : > { %2842 = vst [vmem:[#allocation6_spill] sm:$0xff] %v2771_v61  ;;  %v538_v61 = vadd.f32 %v537_v8, %v416_v7  ;;  %v1106_v7 = vadd.f32 %v2086_v12, %v979_v28  ;;  %v2845_v8 = vld [vmem:[#allocation3_spill] sm:$0xff] }
 0x12b   : > { %v2111_v37 = vpop.f32.mrf.mxu0  ;;  %v723_v52 = vadd.f32 %v692_v42, %v538_v61  ;;  %v1227_v42 = vadd.f32 %v2108_v32, %v1102_v47 }
 0x12c   : > { %v2773_v44 = vpop.f32.mrf.mxu1  ;;  %v1229_v13 = vadd.f32 %v2111_v37, %v1104_v29 }
 0x12d   : > { %2843 = vst [vmem:[#allocation7_spill] sm:$0xff] %v2773_v44  ;;  %v1197_v38 = vpop.f32.mrf.mxu0  ;;  %v848_v49 = vadd.f32 %v2845_v8, %v723_v52  ;;  %v1355_v12 = vadd.f32 %v2136_v33, %v1227_v42 }
 0x12e   : > { %v2775_v40 = vpop.f32.mrf.mxu1 }
 0x12f   : > { %v976_v51 = vadd.f32 %v945_v18, %v848_v49  ;;  %v1772_v18 = vld [vmem:[%s2834_s2] ss:$0 sm:$0xff] }
 0x130   : > { %v2848_v34 = vld [vmem:[#allocation6_spill] sm:$0xff] }
 0x131   : > { %v2114_v21 = vpop.f32.mrf.mxu0  ;;  %v1103_v11 = vadd.f32 %v2847_v16, %v976_v51  ;;  %v1354_v61 = vadd.f32 %v2848_v34, %v1226_v17 }
 0x132   : > { %v2142_v44 = vpop.f32.mrf.mxu1  ;;  %v1231_v2 = vadd.f32 %v2114_v21, %v1106_v7 }
 0x133   : > { %v1207_v35 = vpop.f32.mrf.mxu0  ;;  %v1228_v33 = vadd.f32 %v1197_v38, %v1103_v11 }
 0x134   : > { %v1335_v36 = vpop.f32.mrf.mxu1  ;;  %v1230_v3 = vadd.f32 %v1207_v35, %v1105_v57  ;;  %v1359_v6 = vadd.f32 %v2142_v44, %v1231_v2  ;;  %v2849_v38 = vld [vmem:[#allocation7_spill] sm:$0xff] }
 0x135   : > { %v1357_v54 = vadd.f32 %v2849_v38, %v1229_v13  ;;  %v1356_v63 = vadd.f32 %v2775_v40, %v1228_v33 }
 0x136   : > { %v1358_v25 = vadd.f32 %v1335_v36, %v1230_v3  ;;  %v1528_v36 = vld [vmem:[%s2794_s12 + $0x8] sm:$0xff] }
 0x137   : > { %v2117_v22 = vpop.f32.mrf.mxu0 }
 0x138   : > { %v2145_v0 = vpop.f32.mrf.mxu1  ;;  %v1233_v23 = vadd.f32 %v2117_v22, %v1108_v20  ;;  %v1530_v20 = vld [vmem:[%s2794_s12 + $0x18] sm:$0xff] }
 0x139   : > { %v1217_v60 = vpop.f32.mrf.mxu0 }
 0x13a   : > { %v1345_v10 = vpop.f32.mrf.mxu1  ;;  %v1232_v44 = vadd.f32 %v1217_v60, %v1107_v26  ;;  %v1361_v19 = vadd.f32 %v2145_v0, %v1233_v23 }
 0x13c   : > { %v1360_v35 = vadd.f32 %v1345_v10, %v1232_v44 }
 0x13d   : > { %v2164_v32 = vpop.f32.mrf.mxu0 }
 0x13e   : > { %v2170_v31 = vpop.f32.mrf.mxu1  ;;  %v1482_v45 = vadd.f32 %v2164_v32, %v1355_v12  ;;  %v1534_v12 = vld [vmem:[%s2794_s12 + $0x38] sm:$0xff]  ;;  %v1529_v32 = vld [vmem:[%s2794_s12 + $0x10] sm:$0xff] }
 0x13f   : > { %v1486_v30 = vadd.f32 %v2170_v31, %v1359_v6  ;;  %v1442_v37 = vpop.f32.mrf.mxu0 }
 0x140   : > { %v1462_v24 = vpop.f32.mrf.mxu1  ;;  %v1497_v27 = vmul.f32 %v1772_v18, %v1482_v45  ;;  %v1481_v43 = vadd.f32 %v1442_v37, %v1354_v61 }
 0x141   : > { %v1501_v41 = vmul.f32 %v1772_v18, %v1486_v30  ;;  %v1485_v48 = vadd.f32 %v1462_v24, %v1358_v25  ;;  %v2167_v21 = vpop.f32.mrf.mxu0 }
 0x142   : > { %v2173_v55 = vpop.f32.mrf.mxu1  ;;  %v1512_v59 = vadd.f32 %v1773_v15, %v1497_v27  ;;  %v1496_v28 = vmul.f32 %v1772_v18, %v1481_v43  ;;  %v1484_v1 = vadd.f32 %v2167_v21, %v1357_v54 }
 0x143   : > { %v1516_v14 = vadd.f32 %v1773_v15, %v1501_v41  ;;  %v1500_v52 = vmul.f32 %v1772_v18, %v1485_v48  ;;  %v1488_v62 = vadd.f32 %v2173_v55, %v1361_v19  ;;  %v1452_v5 = vpop.f32.mrf.mxu0 }
 0x144   : > { %v1472_v46 = vpop.f32.mrf.mxu1  ;;  %v1520_v47 = vmax.f32 %v1512_v59, 0.0  ;;  %v1511_v8 = vadd.f32 %v1773_v15, %v1496_v28  ;;  %v1499_v56 = vmul.f32 %v1772_v18, %v1484_v1  ;;  %v1483_v0 = vadd.f32 %v1452_v5, %v1356_v63 }
 0x145   : > { %v1524_v7 = vmax.f32 %v1516_v14, 0.0  ;;  %v1515_v49 = vadd.f32 %v1773_v15, %v1500_v52  ;;  %v1503_v22 = vmul.f32 %v1772_v18, %v1488_v62  ;;  %v1487_v40 = vadd.f32 %v1472_v46, %v1360_v35 }
 0x146   : > { %v1536_v58 = vadd.f32 %v1528_v36, %v1520_v47  ;;  %v1519_v42 = vmax.f32 %v1511_v8, 0.0  ;;  %v1514_v51 = vadd.f32 %v1773_v15, %v1499_v56  ;;  %v1498_v60 = vmul.f32 %v1772_v18, %v1483_v0 }
 0x147   : > { %v1540_v57 = vadd.f32 %v1532_v53, %v1524_v7  ;;  %v1523_v2 = vmax.f32 %v1515_v49, 0.0  ;;  %v1518_v4 = vadd.f32 %v1773_v15, %v1503_v22  ;;  %v1502_v10 = vmul.f32 %v1772_v18, %v1487_v40  ;;  %v1533_v18 = vld [vmem:[%s2794_s12 + $0x30] sm:$0xff] }
 0x148   : > { %v1544_v17 = vmax.f32 %v1536_v58, 0.0  ;;  %v1535_v9 = vadd.f32 %v1527_v50, %v1519_v42  ;;  %v1522_v6 = vmax.f32 %v1514_v51, 0.0  ;;  %v1513_v11 = vadd.f32 %v1773_v15, %v1498_v60 }
 0x149   : > { %v1548_v3 = vmax.f32 %v1540_v57, 0.0  ;;  %v1539_v29 = vadd.f32 %v1531_v39, %v1523_v2  ;;  %v1526_v16 = vmax.f32 %v1518_v4, 0.0  ;;  %v1517_v26 = vadd.f32 %v1773_v15, %v1502_v10 }
 0x14a   : > { %1552 = vst.msk [vmem:[%s2807_s15 + $0x8] sm:$0xff] %vm323_vm1, %v1544_v17  ;;  %v1543_v13 = vmax.f32 %v1535_v9, 0.0  ;;  %v1538_v31 = vadd.f32 %v1530_v20, %v1522_v6  ;;  %v1521_v61 = vmax.f32 %v1513_v11, 0.0 }
 0x14b   : > { %1556 = vst.msk [vmem:[%s2807_s15 + $0x28] sm:$0xff] %vm323_vm1, %v1548_v3  ;;  %v1547_v23 = vmax.f32 %v1539_v29, 0.0  ;;  %v1542_v34 = vadd.f32 %v1534_v12, %v1526_v16  ;;  %v1525_v25 = vmax.f32 %v1517_v26, 0.0 }
 0x14c   : > { %1551 = vst.msk [vmem:[%s2807_s15] sm:$0xff] %vm323_vm1, %v1543_v13  ;;  %v1546_v45 = vmax.f32 %v1538_v31, 0.0  ;;  %v1537_v33 = vadd.f32 %v1529_v32, %v1521_v61 }
 0x14d   : > { %1555 = vst.msk [vmem:[%s2807_s15 + $0x20] sm:$0xff] %vm323_vm1, %v1547_v23  ;;  %v1550_v30 = vmax.f32 %v1542_v34, 0.0  ;;  %v1541_v44 = vadd.f32 %v1533_v18, %v1525_v25 }
 0x14e   : > { %1554 = vst.msk [vmem:[%s2807_s15 + $0x18] sm:$0xff] %vm323_vm1, %v1546_v45  ;;  %v1545_v15 = vmax.f32 %v1537_v33, 0.0 }
 0x14f   : > { %1558 = vst.msk [vmem:[%s2807_s15 + $0x38] sm:$0xff] %vm323_vm1, %v1550_v30  ;;  %v1549_v37 = vmax.f32 %v1541_v44, 0.0 }
 0x150   : > { %1553 = vst.msk [vmem:[%s2807_s15 + $0x10] sm:$0xff] %vm323_vm1, %v1545_v15 }
 0x151   : > { %1557 = vst.msk [vmem:[%s2807_s15 + $0x30] sm:$0xff] %vm323_vm1, %v1549_v37 }
 0x152 PF: > { %s15_s18 = sadd.s32 1, %s2205_s18  }
 0x153   : > { %p12_p4 = scmp.ge.s32.totalorder %s15_s18, 4  }
 0x155   :  { %14 = sbr.rel (!%p12_p4) target bundleno = 1 (0x1), region = 81 }

// kernel: discrete_support_value_forward.13
= control target key start
LH: loop header
LB: loop body
LE: loop exit
PB: predicated region body
PF: predicated region fallthrough
CT: control target
= control target key end

     0   :  { %v354_v0 = vmov 0.0   ;;  %vm355_vm0 = vmmov 0   ;;  %vm211_vm1 = vcmask 171008   ;;  %vm235_vm2 = vcmask 7168   ;;  %s539_s1 = inlined_call_operand.vmem [shape: f32[128,128], index: 1, kind: input, shape index: {}]   ;;  %s540_s3 = inlined_call_operand.vmem [shape: f32[128,21], index: 3, kind: input, shape index: {}]   ;;  %s541_s0 = inlined_call_operand.vmem [shape: f32[8,128], index: 0, kind: input, shape index: {}]   ;;  %s542_s2 = inlined_call_operand.vmem [shape: f32[1,128], index: 2, kind: input, shape index: {}]   ;;  %s543_s4 = inlined_call_operand.vmem [shape: f32[1,21], index: 4, kind: input, shape index: {}]   ;;  %s544_s5 = inlined_call_operand.vmem [shape: f32[1,21], index: 5, kind: input, shape index: {}]   ;;  %s545_s6 = inlined_call_operand.vmem [shape: f32[8,1], index: 6, kind: output, shape index: {}]  }
   0x1   :  { %278 = vmatprep.subr.mxu0 %v354_v0  ;;  %v39_v1 = vld [vmem:[%s539_s1 + $0x78] sm:$0xff]  ;;  %v38_v2 = vld [vmem:[%s539_s1 + $0x70] sm:$0xff]  ;;  %310 = vmatprep.mubr.msk.f32.mxu0 %vm355_vm0, %v354_v0  ;;  %v37_v3 = vld [vmem:[%s539_s1 + $0x68] sm:$0xff] }
   0x2   :  { %279 = vmatpush3.msra.mxu0 %v39_v1  ;;  %313 = vmatprep.subr.mxu1 %v354_v0  ;;  %v36_v4 = vld [vmem:[%s539_s1 + $0x60] sm:$0xff]  ;;  %v133_v5 = vld [vmem:[%s540_s3 + $0x78] sm:$0xff]  ;;  %v132_v7 = vld [vmem:[%s540_s3 + $0x70] sm:$0xff] }
   0x3   :  { %280 = vmatprep.subr.mxu0 %v354_v0  ;;  %345 = vmatprep.mubr.msk.f32.mxu1 %vm355_vm0, %v354_v0  ;;  %v35_v6 = vld [vmem:[%s539_s1 + $0x58] sm:$0xff]  ;;  %v131_v8 = vld [vmem:[%s540_s3 + $0x68] sm:$0xff]  ;;  %v34_v9 = vld [vmem:[%s539_s1 + $0x50] sm:$0xff] }
   0x4   :  { %281 = vmatpush3.msra.mxu0 %v38_v2  ;;  %314 = vmatpush3.msra.mxu1 %v133_v5  ;;  %v130_v10 = vld [vmem:[%s540_s3 + $0x60] sm:$0xff]  ;;  %v33_v11 = vld [vmem:[%s539_s1 + $0x48] sm:$0xff]  ;;  %v129_v12 = vld [vmem:[%s540_s3 + $0x58] sm:$0xff] }
   0x5   :  { %282 = vmatprep.subr.mxu0 %v354_v0  ;;  %315 = vmatprep.subr.mxu1 %v354_v0  ;;  %v32_v13 = vld [vmem:[%s539_s1 + $0x40] sm:$0xff]  ;;  %v128_v14 = vld [vmem:[%s540_s3 + $0x50] sm:$0xff]  ;;  %v31_v15 = vld [vmem:[%s539_s1 + $0x38] sm:$0xff] }
   0x6   :  { %283 = vmatpush3.msra.mxu0 %v37_v3  ;;  %316 = vmatpush3.msra.mxu1 %v132_v7  ;;  %v127_v16 = vld [vmem:[%s540_s3 + $0x48] sm:$0xff]  ;;  %v30_v17 = vld [vmem:[%s539_s1 + $0x30] sm:$0xff]  ;;  %v126_v18 = vld [vmem:[%s540_s3 + $0x40] sm:$0xff] }
   0x7   :  { %284 = vmatprep.subr.mxu0 %v354_v0  ;;  %317 = vmatprep.subr.mxu1 %v354_v0  ;;  %v29_v19 = vld [vmem:[%s539_s1 + $0x28] sm:$0xff]  ;;  %v125_v20 = vld [vmem:[%s540_s3 + $0x38] sm:$0xff]  ;;  %v28_v21 = vld [vmem:[%s539_s1 + $0x20] sm:$0xff] }
   0x8   :  { %285 = vmatpush3.msra.mxu0 %v36_v4  ;;  %318 = vmatpush3.msra.mxu1 %v131_v8  ;;  %v124_v22 = vld [vmem:[%s540_s3 + $0x30] sm:$0xff]  ;;  %v27_v23 = vld [vmem:[%s539_s1 + $0x18] sm:$0xff]  ;;  %v123_v24 = vld [vmem:[%s540_s3 + $0x28] sm:$0xff] }
   0x9   :  { %286 = vmatprep.subr.mxu0 %v354_v0  ;;  %319 = vmatprep.subr.mxu1 %v354_v0  ;;  %v26_v25 = vld [vmem:[%s539_s1 + $0x10] sm:$0xff]  ;;  %v122_v26 = vld [vmem:[%s540_s3 + $0x20] sm:$0xff]  ;;  %v25_v27 = vld [vmem:[%s539_s1 + $0x8] sm:$0xff] }
   0xa   :  { %287 = vmatpush3.msra.mxu0 %v35_v6  ;;  %320 = vmatpush3.msra.mxu1 %v130_v10  ;;  %v121_v28 = vld [vmem:[%s540_s3 + $0x18] sm:$0xff]  ;;  %v24_v29 = vld [vmem:[%s539_s1] sm:$0xff]  ;;  %v120_v31 = vld [vmem:[%s540_s3 + $0x10] sm:$0xff] }
   0xb   :  { %288 = vmatprep.subr.mxu0 %v354_v0  ;;  %321 = vmatprep.subr.mxu1 %v354_v0  ;;  %v23_v30 = vld [vmem:[%s541_s0] sm:$0xff]  ;;  %v119_v32 = vld [vmem:[%s540_s3 + $0x8] sm:$0xff] }
   0xc   :  { %289 = vmatpush3.msra.mxu0 %v34_v9  ;;  %322 = vmatpush3.msra.mxu1 %v129_v12  ;;  %v118_v33 = vld [vmem:[%s540_s3] sm:$0xff] }
   0xd   :  { %290 = vmatprep.subr.mxu0 %v354_v0  ;;  %323 = vmatprep.subr.mxu1 %v354_v0  ;;  %v241_v34 = vld [vmem:[%s542_s2] ss:$0 sm:$0xff] }
   0xe   :  { %291 = vmatpush3.msra.mxu0 %v33_v11  ;;  %324 = vmatpush3.msra.mxu1 %v128_v14  ;;  %v242_v39 = vld [vmem:[%s543_s4] ss:$0 sm:$0xff] }
   0xf   :  { %292 = vmatprep.subr.mxu0 %v354_v0  ;;  %325 = vmatprep.subr.mxu1 %v354_v0  ;;  %v243_v51 = vld [vmem:[%s544_s5] ss:$0 sm:$0xff] }
  0x10   :  { %293 = vmatpush3.msra.mxu0 %v32_v13  ;;  %326 = vmatpush3.msra.mxu1 %v127_v16 }
  0x11   :  { %294 = vmatprep.subr.mxu0 %v354_v0  ;;  %327 = vmatprep.subr.mxu1 %v354_v0 }
  0x12   :  { %295 = vmatpush3.msra.mxu0 %v31_v15  ;;  %328 = vmatpush3.msra.mxu1 %v126_v18 }
  0x13   :  { %296 = vmatprep.subr.mxu0 %v354_v0  ;;  %329 = vmatprep.subr.mxu1 %v354_v0 }
  0x14   :  { %297 = vmatpush3.msra.mxu0 %v30_v17  ;;  %330 = vmatpush3.msra.mxu1 %v125_v20 }
  0x15   :  { %298 = vmatprep.subr.mxu0 %v354_v0  ;;  %331 = vmatprep.subr.mxu1 %v354_v0 }
  0x16   :  { %299 = vmatpush3.msra.mxu0 %v29_v19  ;;  %332 = vmatpush3.msra.mxu1 %v124_v22 }
  0x17   :  { %300 = vmatprep.subr.mxu0 %v354_v0  ;;  %333 = vmatprep.subr.mxu1 %v354_v0 }
  0x18   :  { %301 = vmatpush3.msra.mxu0 %v28_v21  ;;  %334 = vmatpush3.msra.mxu1 %v123_v24 }
  0x19   :  { %302 = vmatprep.subr.mxu0 %v354_v0  ;;  %335 = vmatprep.subr.mxu1 %v354_v0 }
  0x1a   :  { %303 = vmatpush3.msra.mxu0 %v27_v23  ;;  %336 = vmatpush3.msra.mxu1 %v122_v26 }
  0x1b   :  { %304 = vmatprep.subr.mxu0 %v354_v0  ;;  %337 = vmatprep.subr.mxu1 %v354_v0 }
  0x1c   :  { %305 = vmatpush3.msra.mxu0 %v26_v25  ;;  %338 = vmatpush3.msra.mxu1 %v121_v28 }
  0x1d   :  { %306 = vmatprep.subr.mxu0 %v354_v0  ;;  %339 = vmatprep.subr.mxu1 %v354_v0 }
  0x1e   :  { %307 = vmatpush3.msra.mxu0 %v25_v27  ;;  %340 = vmatpush3.msra.mxu1 %v120_v31 }
  0x1f   :  { %308 = vmatprep.subr.mxu0 %v354_v0  ;;  %341 = vmatprep.subr.mxu1 %v354_v0 }
  0x20   :  { %309 = vmatpush3.msra.mxu0 %v24_v29  ;;  %342 = vmatpush3.msra.mxu1 %v119_v32 }
  0x21   :  { %311 = vmatmul.mubr.f32.vlgmr.msra.gmra.mxu0 %v23_v30  ;;  %343 = vmatprep.subr.mxu1 %v354_v0 }
  0x22   :  { %344 = vmatpush3.msra.mxu1 %v118_v33 }
  0xe1   :  { %v113_v35 = vpop.f32.mrf.mxu0 }
  0xe2   :  { %v114_v36 = vadd.f32 %v241_v34, %v113_v35 }
  0xe3   :  { %v312_v37 = vpop.f32.mrf.mxu0 }
  0xe4   :  { %v117_v38 = vmax.f32 %v114_v36, 0.0 }
  0xe6   :  { %346 = vmatmul.mubr.f32.vlgmr.msra.gmra.mxu1 %v117_v38 }
 0x1a6   :  { %v207_v40 = vpop.f32.mrf.mxu1 }
 0x1a7   :  { %v208_v41 = vadd.f32 %v242_v39, %v207_v40 }
 0x1a8   :  { %v347_v42 = vpop.f32.mrf.mxu1 }
 0x1a9   :  { %v212_v43 = vsel %vm211_vm1, %v208_v41, -inf }
 0x1aa   :  { %213 = vmax.xlane.f32.xlu0 %v212_v43 }
 0x233   :  { %v214_v44 = vpop.xlane.xlu0 %213 }
 0x234   :  { %v215_v45 = vsub.f32 %v208_v41, %v214_v44 }
 0x236   :  { %v216_v46 = vmul.f32 1.442695, %v215_v45 }
 0x238   :  { %350 = vpow2.f32 %v216_v46 }
 0x245   :  { %v351_v47 = vpop.eup %350 }
 0x246   :  { %v218_v48 = vsel %vm211_vm1, %v351_v47, 0.0 }
 0x247   :  { %219 = vadd.xlane.f32.xlu0 %v218_v48 }
 0x2d0   :  { %v220_v49 = vpop.xlane.xlu0 %219 }
 0x2d1   :  { %352 = vrcp.f32 %v220_v49 }
 0x2de   :  { %v353_v50 = vpop.eup %352 }
 0x2df   :  { %v222_v52 = vmul.f32 %v353_v50, %v351_v47 }
 0x2e1   :  { %v230_v53 = vmul.f32 %v243_v51, %v222_v52 }
 0x2e3   :  { %v231_v54 = vsel %vm211_vm1, %v230_v53, 0.0 }
 0x2e4   :  { %232 = vadd.xlane.f32.xlu1 %v231_v54 }
 0x36d   :  { %v233_v55 = vpop.xlane.xlu1 %232 }
 0x36e   :  { %v234_v56 = vmul.f32 0.1, %v233_v55 }
 0x370   :  { %236 = vst.msk [vmem:[%s545_s6] sm:$0xff] %vm235_vm2, %v234_v56 }

</bundles_post_ra>
